<compile_context>
chip_gen: v7x
topology: tpu7x:2x2x1
jax: 0.10.0
libtpu: 0.0.40
codegen_flags: <defaults>
</compile_context>

<pallas_src>
import jax
import jax.numpy as jnp
from jax import lax
from jax.experimental import pallas as pl
from jax.experimental.pallas import tpu as pltpu

FEATURES = 4      # node feature dim (in_channels of conv1)
HID1 = 32         # conv1 out_channels (also padded node-feature width)
HID2 = 32         # conv2 out_channels
EDGE_DIM = 2      # edge attribute dim
HID_EDGE = 16     # hidden dim of the edge networks
OUT_DIM = 2       # fc2 out
LANE = 128        # TPU lane width
TILE_E = 512      # edge tile size (multiple of LANE; capped at 512 for v7x VMEM)
ZK = HID_EDGE * HID1  # 512 — fused edge-net K dimension


def _round_up(v, m):
    return (v + m - 1) // m * m


# ---------------------------------------------------------------------------
# Kernel
# ---------------------------------------------------------------------------
def net_mp_kernel(src_ref, tgt_ref, ea_ref, x_ref, invd_ref,
                  w1_ref, b1_ref, w2r_ref, b2r_ref, root_ref, bias_ref,
                  fc1w_ref, fc1b_ref, fc2w_ref, fc2b_ref,
                  out_ref,
                  node_ref, acc_ref, z_ref):
    layer = pl.program_id(0)
    t = pl.program_id(1)
    n_tiles = pl.num_programs(1)
    tile_e = src_ref.shape[0]
    n_pad = x_ref.shape[0]

    # Load the node table once (layer 0 input features).
    @pl.when(jnp.logical_and(layer == 0, t == 0))
    def _load_node_table():
        node_ref[...] = x_ref[...]

    # Zero the message accumulator at the start of every layer.
    @pl.when(t == 0)
    def _zero_acc():
        acc_ref[...] = jnp.zeros_like(acc_ref)

    base = pl.multiple_of(t * tile_e, LANE)
    src = src_ref[...]                                 # (tile_e, 1) int32
    tgt = tgt_ref[...]                                 # (1, tile_e) int32
    ea = ea_ref[pl.ds(base, tile_e), :]                # (tile_e, EDGE_DIM)

    node = node_ref[...]                               # (n_pad, HID1)

    # (1) Vectorized gather: x_src = onehot(src) @ node_table  (single MXU matmul).
    onehot_src = (src == lax.broadcasted_iota(jnp.int32, (tile_e, n_pad), 1)
                  ).astype(jnp.float32)
    xs = jnp.dot(onehot_src, node, preferred_element_type=jnp.float32)      # (tile_e, HID1)

    # (2) Edge-net first layer: Linear(2,16) folded onto the VPU (K=2), ReLU.
    w1 = w1_ref[...]
    h = jnp.maximum(ea[:, 0:1] * w1[0:1, :] + ea[:, 1:2] * w1[1:2, :] + b1_ref[...], 0.0)

    # (3) Fused edge-net second layer + message: one big-K (=512) MXU matmul.
    #     z[e, k*HID1 + c] = h[e, k] * xs[e, c];   msg = z @ w2r + xs @ b2r
    for k in range(HID_EDGE):
        z_ref[:, k * HID1:(k + 1) * HID1] = h[:, k:k + 1] * xs
    msg = (jnp.dot(z_ref[...], w2r_ref[...], preferred_element_type=jnp.float32)
           + jnp.dot(xs, b2r_ref[...], preferred_element_type=jnp.float32))  # (tile_e, HID1)

    # (4) Vectorized scatter-add: acc += onehot(tgt)^T @ msg  (single MXU matmul).
    onehot_tgt_t = (lax.broadcasted_iota(jnp.int32, (n_pad, tile_e), 0) == tgt
                    ).astype(jnp.float32)
    acc_ref[...] = acc_ref[...] + jnp.dot(onehot_tgt_t, msg,
                                          preferred_element_type=jnp.float32)

    # (5) Per-layer finalize: mean, root term, bias, outer ReLU; fc head after conv2.
    @pl.when(t == n_tiles - 1)
    def _finalize():
        aggr = acc_ref[...] * invd_ref[...]
        conv = jnp.maximum(
            aggr
            + jnp.dot(node, root_ref[...], preferred_element_type=jnp.float32)
            + bias_ref[...],
            0.0)
        node_ref[...] = conv          # becomes the next layer's node table (x1 / x2)

        @pl.when(layer == 1)
        def _head():
            hfc = jnp.maximum(
                jnp.dot(conv, fc1w_ref[...], preferred_element_type=jnp.float32)
                + fc1b_ref[...], 0.0)
            out_ref[...] = (jnp.dot(hfc, fc2w_ref[...],
                                    preferred_element_type=jnp.float32)
                            + fc2b_ref[...])


# ---------------------------------------------------------------------------
# Wrapper: padding / weight re-layout (plain JAX) + pallas_call
# ---------------------------------------------------------------------------
@jax.jit
def net_mp_forward(x, edge_index, edge_attr, params):
    (c1w1, c1b1, c1w2, c1b2, c1root, c1bias,
     c2w1, c2b1, c2w2, c2b2, c2root, c2bias,
     fc1w, fc1b, fc2w, fc2b) = params

    num_nodes = x.shape[0]
    num_edges = edge_attr.shape[0]

    tile_e = min(TILE_E, _round_up(num_edges, LANE))
    e_pad = _round_up(num_edges, tile_e)
    n_tiles = e_pad // tile_e
    n_pad = _round_up(num_nodes + 1, 8)      # +1 dummy node row absorbs padded edges

    src = edge_index[0].astype(jnp.int32)
    tgt = edge_index[1].astype(jnp.int32)
    src_col = jnp.full((e_pad, 1), num_nodes, jnp.int32).at[:num_edges, 0].set(src)
    tgt_row = jnp.full((1, e_pad), num_nodes, jnp.int32).at[0, :num_edges].set(tgt)

    ea_p = jnp.zeros((e_pad, EDGE_DIM), jnp.float32).at[:num_edges].set(edge_attr)
    # Node features padded to HID1 columns so both layers share one node-table width.
    x_p = jnp.zeros((n_pad, HID1), jnp.float32).at[:num_nodes, :FEATURES].set(x)

    deg = jax.ops.segment_sum(jnp.ones((num_edges,), jnp.float32), tgt,
                              num_segments=num_nodes)
    invd = 1.0 / jnp.maximum(deg, 1.0)
    invd_p = jnp.zeros((n_pad, 1), jnp.float32).at[:num_nodes, 0].set(invd)

    def reorder_w2(w2, b2, fin):
        # w2: (HID_EDGE, fin*HID1)  ->  w2r: (HID_EDGE*HID1, HID1)
        # with row index k*HID1 + c  so it matches  z[e, k*HID1 + c] = h[e,k]*xs[e,c].
        w2r = (jnp.zeros((HID_EDGE, HID1, HID1), jnp.float32)
               .at[:, :fin, :].set(w2.reshape(HID_EDGE, fin, HID1))
               .reshape(HID_EDGE * HID1, HID1))
        b2r = (jnp.zeros((HID1, HID1), jnp.float32)
               .at[:fin, :].set(b2.reshape(fin, HID1)))
        return w2r, b2r

    c1w2r, c1b2r = reorder_w2(c1w2, c1b2, FEATURES)
    c2w2r, c2b2r = reorder_w2(c2w2, c2b2, HID1)
    c1rootp = jnp.zeros((HID1, HID1), jnp.float32).at[:FEATURES].set(c1root)

    # Stack per-layer weights; the grid's layer axis selects them via the index map.
    w1s = jnp.stack([c1w1, c2w1])           # (2, 2, 16)
    b1s = jnp.stack([c1b1, c2b1])           # (2, 1, 16)
    w2rs = jnp.stack([c1w2r, c2w2r])        # (2, 512, 32)
    b2rs = jnp.stack([c1b2r, c2b2r])        # (2, 32, 32)
    roots = jnp.stack([c1rootp, c2root])    # (2, 32, 32)
    biass = jnp.stack([c1bias, c2bias])     # (2, 1, 32)

    # Lane-dense HBM output: pad fc2 to 128 output lanes (unmasked vst), slice afterwards.
    fc2wp = jnp.zeros((HID2, LANE), jnp.float32).at[:, :OUT_DIM].set(fc2w)
    fc2bp = jnp.zeros((1, LANE), jnp.float32).at[:, :OUT_DIM].set(fc2b)

    def fixed(l, t):
        return (0, 0)

    def by_layer(l, t):
        return (l, 0, 0)

    def resident(a):
        return pl.BlockSpec(a.shape, fixed)

    def per_layer(a):
        return pl.BlockSpec((None,) + a.shape[1:], by_layer)

    tensor_args = (src_col, tgt_row, ea_p, x_p, invd_p,
                   w1s, b1s, w2rs, b2rs, roots, biass,
                   fc1w, fc1b, fc2wp, fc2bp)

    in_specs = [
        pl.BlockSpec((tile_e, 1), lambda l, t: (t, 0)),   # src (edge-tile streamed)
        pl.BlockSpec((1, tile_e), lambda l, t: (0, t)),   # tgt (edge-tile streamed)
        resident(ea_p), resident(x_p), resident(invd_p),
        per_layer(w1s), per_layer(b1s), per_layer(w2rs), per_layer(b2rs),
        per_layer(roots), per_layer(biass),
        resident(fc1w), resident(fc1b), resident(fc2wp), resident(fc2bp),
    ]

    per_tile = (4 * tile_e * n_pad * HID1           # gather + scatter matmuls
                + 2 * tile_e * ZK * HID1            # fused edge-net matmul
                + 2 * tile_e * HID1 * HID1          # bias matmul
                + tile_e * (4 * HID_EDGE + ZK))     # edge-net layer 1 + z build
    flops = int(2 * n_tiles * per_tile
                + 2 * 2 * n_pad * HID1 * HID1
                + 2 * n_pad * HID1 * HID2
                + 2 * n_pad * HID2 * LANE)
    bytes_accessed = int(4 * (sum(int(a.size) for a in tensor_args) + n_pad * LANE))

    out = pl.pallas_call(
        net_mp_kernel,
        out_shape=jax.ShapeDtypeStruct((n_pad, LANE), jnp.float32),
        grid_spec=pltpu.PrefetchScalarGridSpec(
            num_scalar_prefetch=0,
            grid=(2, n_tiles),
            in_specs=in_specs,
            out_specs=pl.BlockSpec((n_pad, LANE), fixed),
            scratch_shapes=[
                pltpu.VMEM((n_pad, HID1), jnp.float32),   # node table (x -> x1 -> x2)
                pltpu.VMEM((n_pad, HID1), jnp.float32),   # message accumulator
                pltpu.VMEM((tile_e, ZK), jnp.float32),    # fused edge-net LHS (z)
            ]),
        compiler_params=pltpu.CompilerParams(
            # Both axes must stay serial: the layer axis carries node_ref across layers,
            # the edge-tile axis read-modify-writes the shared accumulator.
            dimension_semantics=("arbitrary", "arbitrary"),
            # 48 MiB leaves headroom on v7x's 64 MiB/TC; plenty on v5e/v6e (128 MiB).
            vmem_limit_bytes=48 * 1024 * 1024),
        cost_estimate=pl.CostEstimate(flops=flops, transcendentals=0,
                                      bytes_accessed=bytes_accessed),
    )(*tensor_args)

    return out[:num_nodes, :OUT_DIM]


# ---------------------------------------------------------------------------
# Deterministic parameter initialization (shapes from Net_MP.__init__)
# ---------------------------------------------------------------------------
def init_params(key):
    def lin(key, fan_in, fan_out):
        kw, kb = jax.random.split(key)
        scale = 1.0 / jnp.sqrt(jnp.float32(fan_in))
        w = jax.random.uniform(kw, (fan_in, fan_out), jnp.float32, -scale, scale)
        b = jax.random.uniform(kb, (1, fan_out), jnp.float32, -scale, scale)
        return w, b

    keys = jax.random.split(key, 10)
    # conv1 edge net: Linear(2,16) -> ReLU -> Linear(16, FEATURES*HID1)
    c1w1, c1b1 = lin(keys[0], EDGE_DIM, HID_EDGE)
    c1w2, c1b2 = lin(keys[1], HID_EDGE, FEATURES * HID1)
    c1root, c1bias = lin(keys[2], FEATURES, HID1)
    # conv2 edge net: Linear(2,16) -> ReLU -> Linear(16, HID1*HID2) = 1024
    c2w1, c2b1 = lin(keys[3], EDGE_DIM, HID_EDGE)
    c2w2, c2b2 = lin(keys[4], HID_EDGE, HID1 * HID2)
    c2root, c2bias = lin(keys[5], HID1, HID2)
    # fc layers
    fc1w, fc1b = lin(keys[6], HID2, 32)
    fc2w, fc2b = lin(keys[7], 32, OUT_DIM)
    return (c1w1, c1b1, c1w2, c1b2, c1root, c1bias,
            c2w1, c2b1, c2w2, c2b2, c2root, c2bias,
            fc1w, fc1b, fc2w, fc2b)


# ---------------------------------------------------------------------------
# Pure-JAX reference (segment-based scatter) for a correctness check
# ---------------------------------------------------------------------------
def ref_forward(x, edge_index, edge_attr, params):
    (c1w1, c1b1, c1w2, c1b2, c1root, c1bias,
     c2w1, c2b1, c2w2, c2b2, c2root, c2bias,
     fc1w, fc1b, fc2w, fc2b) = params
    n = x.shape[0]
    src, tgt = edge_index[0], edge_index[1]

    def nnconv(x, w1, b1, w2, b2, root, bias, fin, fout):
        h = jnp.maximum(edge_attr @ w1 + b1, 0.0)
        W = (h @ w2 + b2).reshape(-1, fin, fout)
        x_src = jnp.take(x, src, axis=0)
        msg = jnp.sum(x_src[:, :, None] * W, axis=1)
        summed = jax.ops.segment_sum(msg, tgt, num_segments=n)
        cnt = jax.ops.segment_sum(jnp.ones_like(tgt, jnp.float32), tgt, num_segments=n)
        aggr = summed / jnp.maximum(cnt, 1.0)[:, None]
        return aggr + x @ root + bias

    x1 = jnp.maximum(nnconv(x, c1w1, c1b1, c1w2, c1b2, c1root, c1bias, FEATURES, HID1), 0.0)
    x2 = jnp.maximum(nnconv(x1, c2w1, c2b1, c2w2, c2b2, c2root, c2bias, HID1, HID2), 0.0)
    h = jnp.maximum(x2 @ fc1w + fc1b, 0.0)
    return h @ fc2w + fc2b


if __name__ == "__main__":
    key = jax.random.PRNGKey(0)
    k_param, k_x, k_ei, k_ea = jax.random.split(key, 4)

    N = 8    # nodes
    E = 16   # edges

    params = init_params(k_param)
    x = jax.random.normal(k_x, (N, FEATURES), jnp.float32)
    edge_index = jax.random.randint(k_ei, (2, E), 0, N, dtype=jnp.int32)
    edge_attr = jax.random.normal(k_ea, (E, EDGE_DIM), jnp.float32)

    out = jax.block_until_ready(net_mp_forward(x, edge_index, edge_attr, params))
    ref = jax.block_until_ready(ref_forward(x, edge_index, edge_attr, params))

    assert out.shape == (N, OUT_DIM)
    assert jnp.allclose(out, ref, atol=1e-3, rtol=1e-3), (out, ref)

    print("KERNEL_OK")
</pallas_src>

<mosaic_0001>
module attributes {stable_mosaic.version = 11 : i64} {
  func.func private @main(%arg0: i32) attributes {dimension_semantics = [#tpu.dimension_semantics<core_parallel>], iteration_bounds = array<i64: 2>, tpu.core_type = #tpu.core_type<sc_scalar_subcore>, window_params = []} {
    return
  }
}

module attributes {stable_mosaic.version = 11 : i64} {
  func.func private @main(%arg0: i32) attributes {dimension_semantics = [#tpu.dimension_semantics<core_parallel>], iteration_bounds = array<i64: 2>, tpu.core_type = #tpu.core_type<sc_scalar_subcore>, window_params = []} {
    return
  }
}

module attributes {stable_mosaic.version = 11 : i64} {
  func.func @net_mp_kernel(%arg0: i32, %arg1: i32, %arg2: memref<128x1xi32, #tpu.memory_space<vmem>>, %arg3: memref<1x128xi32, #tpu.memory_space<vmem>>, %arg4: memref<128x2xf32, #tpu.memory_space<vmem>>, %arg5: memref<16x32xf32, #tpu.memory_space<vmem>>, %arg6: memref<16x1xf32, #tpu.memory_space<vmem>>, %arg7: memref<1x2x16xf32, #tpu.memory_space<vmem>>, %arg8: memref<1x1x16xf32, #tpu.memory_space<vmem>>, %arg9: memref<1x512x32xf32, #tpu.memory_space<vmem>>, %arg10: memref<1x32x32xf32, #tpu.memory_space<vmem>>, %arg11: memref<1x32x32xf32, #tpu.memory_space<vmem>>, %arg12: memref<1x1x32xf32, #tpu.memory_space<vmem>>, %arg13: memref<32x32xf32, #tpu.memory_space<vmem>>, %arg14: memref<1x32xf32, #tpu.memory_space<vmem>>, %arg15: memref<32x128xf32, #tpu.memory_space<vmem>>, %arg16: memref<1x128xf32, #tpu.memory_space<vmem>>, %arg17: memref<16x128xf32, #tpu.memory_space<vmem>>, %arg18: memref<16x32xf32, #tpu.memory_space<vmem>>, %arg19: memref<16x32xf32, #tpu.memory_space<vmem>>, %arg20: memref<128x512xf32, #tpu.memory_space<vmem>>) attributes {dimension_semantics = [#tpu.dimension_semantics<arbitrary>, #tpu.dimension_semantics<arbitrary>], iteration_bounds = array<i64: 2, 1>, scalar_prefetch = 0 : i64, scratch_operands = 3 : i64, tpu.core_type = #tpu.core_type<tc>, window_params = [{transform_indices = @transform_0, window_bounds = array<i64: 128, 1>}, {transform_indices = @transform_1, window_bounds = array<i64: 1, 128>}, {pipeline_mode = #tpu.pipeline_mode<synchronous>, transform_indices = @transform_2, window_bounds = array<i64: 128, 2>}, {pipeline_mode = #tpu.pipeline_mode<synchronous>, transform_indices = @transform_3, window_bounds = array<i64: 16, 32>}, {pipeline_mode = #tpu.pipeline_mode<synchronous>, transform_indices = @transform_4, window_bounds = array<i64: 16, 1>}, {transform_indices = @transform_5, window_bounds = array<i64: 1, 2, 16>}, {transform_indices = @transform_6, window_bounds = array<i64: 1, 1, 16>}, {transform_indices = @transform_7, window_bounds = array<i64: 1, 512, 32>}, {transform_indices = @transform_8, window_bounds = array<i64: 1, 32, 32>}, {transform_indices = @transform_9, window_bounds = array<i64: 1, 32, 32>}, {transform_indices = @transform_10, window_bounds = array<i64: 1, 1, 32>}, {pipeline_mode = #tpu.pipeline_mode<synchronous>, transform_indices = @transform_11, window_bounds = array<i64: 32, 32>}, {pipeline_mode = #tpu.pipeline_mode<synchronous>, transform_indices = @transform_12, window_bounds = array<i64: 1, 32>}, {pipeline_mode = #tpu.pipeline_mode<synchronous>, transform_indices = @transform_13, window_bounds = array<i64: 32, 128>}, {pipeline_mode = #tpu.pipeline_mode<synchronous>, transform_indices = @transform_14, window_bounds = array<i64: 1, 128>}, {pipeline_mode = #tpu.pipeline_mode<synchronous>, transform_indices = @transform_15, window_bounds = array<i64: 16, 128>}]} {
    %c0_i32 = arith.constant 0 : i32
    %0 = arith.cmpi eq, %arg0, %c0_i32 : i32
    %c0_i32_0 = arith.constant 0 : i32
    %1 = arith.cmpi eq, %arg1, %c0_i32_0 : i32
    %2 = arith.andi %0, %1 : i1
    %3 = arith.extui %2 : i1 to i32
    %c0_i32_1 = arith.constant 0 : i32
    %4 = arith.cmpi ne, %3, %c0_i32_1 : i32
    scf.if %4 {
      %c0_51 = arith.constant 0 : index
      %c0_52 = arith.constant 0 : index
      %124 = vector.load %arg5[%c0_51, %c0_52] : memref<16x32xf32, #tpu.memory_space<vmem>>, vector<16x32xf32>
      %c0_53 = arith.constant 0 : index
      %c0_54 = arith.constant 0 : index
      %125 = vector.load %arg18[%c0_53, %c0_54] : memref<16x32xf32, #tpu.memory_space<vmem>>, vector<16x32xf32>
      tpu.vector_store %arg18[%c0_53, %c0_54], %124 {strides = array<i32>} : memref<16x32xf32, #tpu.memory_space<vmem>>, vector<16x32xf32>,
    } else {
    }
    %c0_i32_2 = arith.constant 0 : i32
    %5 = arith.cmpi eq, %arg1, %c0_i32_2 : i32
    %6 = arith.extui %5 : i1 to i32
    %c0_i32_3 = arith.constant 0 : i32
    %7 = arith.cmpi ne, %6, %c0_i32_3 : i32
    scf.if %7 {
      %cst_51 = arith.constant 0.000000e+00 : f32
      %124 = vector.broadcast %cst_51 : f32 to vector<16x32xf32>
      %c0_52 = arith.constant 0 : index
      %c0_53 = arith.constant 0 : index
      %125 = vector.load %arg19[%c0_52, %c0_53] : memref<16x32xf32, #tpu.memory_space<vmem>>, vector<16x32xf32>
      tpu.vector_store %arg19[%c0_52, %c0_53], %124 {strides = array<i32>} : memref<16x32xf32, #tpu.memory_space<vmem>>, vector<16x32xf32>,
    } else {
    }
    %c128_i32 = arith.constant 128 : i32
    %8 = arith.muli %arg1, %c128_i32 : i32
    %9 = tpu.assume_multiple %8, 128 : i32
    %c0 = arith.constant 0 : index
    %c0_4 = arith.constant 0 : index
    %10 = vector.load %arg2[%c0, %c0_4] : memref<128x1xi32, #tpu.memory_space<vmem>>, vector<128x1xi32>
    %c0_5 = arith.constant 0 : index
    %c0_6 = arith.constant 0 : index
    %11 = vector.load %arg3[%c0_5, %c0_6] : memref<1x128xi32, #tpu.memory_space<vmem>>, vector<1x128xi32>
    %12 = arith.index_cast %9 : i32 to index
    %c0_7 = arith.constant 0 : index
    %13 = vector.load %arg4[%12, %c0_7] : memref<128x2xf32, #tpu.memory_space<vmem>>, vector<128x2xf32>
    %c0_8 = arith.constant 0 : index
    %c0_9 = arith.constant 0 : index
    %14 = vector.load %arg18[%c0_8, %c0_9] : memref<16x32xf32, #tpu.memory_space<vmem>>, vector<16x32xf32>
    %15 = tpu.iota {dimensions = array<i32: 1>} : vector<128x16xi32>
    %16 = vector.broadcast %10 : vector<128x1xi32> to vector<128x16xi32>
    %17 = arith.cmpi eq, %16, %15 : vector<128x16xi32>
    %18 = arith.extui %17 : vector<128x16xi1> to vector<128x16xi32>
    %19 = arith.sitofp %18 : vector<128x16xi32> to vector<128x16xf32>
    %cst = arith.constant dense<0.000000e+00> : vector<128x32xf32>
    %20 = tpu.matmul %19, %14, %cst {dimension_numbers = #tpu.dot_dimension_numbers<[1], [0], [0], [1], [0, 0, 1, 1], [], []>} : vector<128x16xf32>, vector<16x32xf32>, vector<128x32xf32> -> vector<128x32xf32>
    %c0_10 = arith.constant 0 : index
    %c0_11 = arith.constant 0 : index
    %c0_12 = arith.constant 0 : index
    %21 = vector.load %arg7[%c0_10, %c0_11, %c0_12] : memref<1x2x16xf32, #tpu.memory_space<vmem>>, vector<1x2x16xf32>
    %22 = vector.shape_cast %21 : vector<1x2x16xf32> to vector<2x16xf32>
    %23 = vector.extract_strided_slice %13 {offsets = [0, 0], sizes = [128, 1], strides = [1, 1]} : vector<128x2xf32> to vector<128x1xf32>
    %24 = vector.extract_strided_slice %22 {offsets = [0, 0], sizes = [1, 16], strides = [1, 1]} : vector<2x16xf32> to vector<1x16xf32>
    %25 = vector.broadcast %23 : vector<128x1xf32> to vector<128x16xf32>
    %26 = vector.broadcast %24 : vector<1x16xf32> to vector<128x16xf32>
    %27 = arith.mulf %25, %26 : vector<128x16xf32>
    %28 = vector.extract_strided_slice %13 {offsets = [0, 1], sizes = [128, 1], strides = [1, 1]} : vector<128x2xf32> to vector<128x1xf32>
    %29 = vector.extract_strided_slice %22 {offsets = [1, 0], sizes = [1, 16], strides = [1, 1]} : vector<2x16xf32> to vector<1x16xf32>
    %30 = vector.broadcast %28 : vector<128x1xf32> to vector<128x16xf32>
    %31 = vector.broadcast %29 : vector<1x16xf32> to vector<128x16xf32>
    %32 = arith.mulf %30, %31 : vector<128x16xf32>
    %33 = arith.addf %27, %32 : vector<128x16xf32>
    %c0_13 = arith.constant 0 : index
    %c0_14 = arith.constant 0 : index
    %c0_15 = arith.constant 0 : index
    %34 = vector.load %arg8[%c0_13, %c0_14, %c0_15] : memref<1x1x16xf32, #tpu.memory_space<vmem>>, vector<1x1x16xf32>
    %35 = vector.shape_cast %34 : vector<1x1x16xf32> to vector<1x16xf32>
    %36 = vector.broadcast %35 : vector<1x16xf32> to vector<128x16xf32>
    %37 = arith.addf %33, %36 : vector<128x16xf32>
    %cst_16 = arith.constant 0.000000e+00 : f32
    %38 = vector.broadcast %cst_16 : f32 to vector<128x16xf32>
    %39 = arith.maximumf %37, %38 : vector<128x16xf32>
    %40 = vector.extract_strided_slice %39 {offsets = [0, 0], sizes = [128, 1], strides = [1, 1]} : vector<128x16xf32> to vector<128x1xf32>
    %41 = vector.broadcast %40 : vector<128x1xf32> to vector<128x32xf32>
    %42 = arith.mulf %41, %20 : vector<128x32xf32>
    %c0_17 = arith.constant 0 : index
    %c0_18 = arith.constant 0 : index
    %43 = vector.load %arg20[%c0_17, %c0_18] : memref<128x512xf32, #tpu.memory_space<vmem>>, vector<128x32xf32>
    tpu.vector_store %arg20[%c0_17, %c0_18], %42 {strides = array<i32>} : memref<128x512xf32, #tpu.memory_space<vmem>>, vector<128x32xf32>,
    %44 = vector.extract_strided_slice %39 {offsets = [0, 1], sizes = [128, 1], strides = [1, 1]} : vector<128x16xf32> to vector<128x1xf32>
    %45 = vector.broadcast %44 : vector<128x1xf32> to vector<128x32xf32>
    %46 = arith.mulf %45, %20 : vector<128x32xf32>
    %c0_19 = arith.constant 0 : index
    %c32 = arith.constant 32 : index
    %47 = vector.load %arg20[%c0_19, %c32] : memref<128x512xf32, #tpu.memory_space<vmem>>, vector<128x32xf32>
    tpu.vector_store %arg20[%c0_19, %c32], %46 {strides = array<i32>} : memref<128x512xf32, #tpu.memory_space<vmem>>, vector<128x32xf32>,
    %48 = vector.extract_strided_slice %39 {offsets = [0, 2], sizes = [128, 1], strides = [1, 1]} : vector<128x16xf32> to vector<128x1xf32>
    %49 = vector.broadcast %48 : vector<128x1xf32> to vector<128x32xf32>
    %50 = arith.mulf %49, %20 : vector<128x32xf32>
    %c0_20 = arith.constant 0 : index
    %c64 = arith.constant 64 : index
    %51 = vector.load %arg20[%c0_20, %c64] : memref<128x512xf32, #tpu.memory_space<vmem>>, vector<128x32xf32>
    tpu.vector_store %arg20[%c0_20, %c64], %50 {strides = array<i32>} : memref<128x512xf32, #tpu.memory_space<vmem>>, vector<128x32xf32>,
    %52 = vector.extract_strided_slice %39 {offsets = [0, 3], sizes = [128, 1], strides = [1, 1]} : vector<128x16xf32> to vector<128x1xf32>
    %53 = vector.broadcast %52 : vector<128x1xf32> to vector<128x32xf32>
    %54 = arith.mulf %53, %20 : vector<128x32xf32>
    %c0_21 = arith.constant 0 : index
    %c96 = arith.constant 96 : index
    %55 = vector.load %arg20[%c0_21, %c96] : memref<128x512xf32, #tpu.memory_space<vmem>>, vector<128x32xf32>
    tpu.vector_store %arg20[%c0_21, %c96], %54 {strides = array<i32>} : memref<128x512xf32, #tpu.memory_space<vmem>>, vector<128x32xf32>,
    %56 = vector.extract_strided_slice %39 {offsets = [0, 4], sizes = [128, 1], strides = [1, 1]} : vector<128x16xf32> to vector<128x1xf32>
    %57 = vector.broadcast %56 : vector<128x1xf32> to vector<128x32xf32>
    %58 = arith.mulf %57, %20 : vector<128x32xf32>
    %c0_22 = arith.constant 0 : index
    %c128 = arith.constant 128 : index
    %59 = vector.load %arg20[%c0_22, %c128] : memref<128x512xf32, #tpu.memory_space<vmem>>, vector<128x32xf32>
    tpu.vector_store %arg20[%c0_22, %c128], %58 {strides = array<i32>} : memref<128x512xf32, #tpu.memory_space<vmem>>, vector<128x32xf32>,
    %60 = vector.extract_strided_slice %39 {offsets = [0, 5], sizes = [128, 1], strides = [1, 1]} : vector<128x16xf32> to vector<128x1xf32>
    %61 = vector.broadcast %60 : vector<128x1xf32> to vector<128x32xf32>
    %62 = arith.mulf %61, %20 : vector<128x32xf32>
    %c0_23 = arith.constant 0 : index
    %c160 = arith.constant 160 : index
    %63 = vector.load %arg20[%c0_23, %c160] : memref<128x512xf32, #tpu.memory_space<vmem>>, vector<128x32xf32>
    tpu.vector_store %arg20[%c0_23, %c160], %62 {strides = array<i32>} : memref<128x512xf32, #tpu.memory_space<vmem>>, vector<128x32xf32>,
    %64 = vector.extract_strided_slice %39 {offsets = [0, 6], sizes = [128, 1], strides = [1, 1]} : vector<128x16xf32> to vector<128x1xf32>
    %65 = vector.broadcast %64 : vector<128x1xf32> to vector<128x32xf32>
    %66 = arith.mulf %65, %20 : vector<128x32xf32>
    %c0_24 = arith.constant 0 : index
    %c192 = arith.constant 192 : index
    %67 = vector.load %arg20[%c0_24, %c192] : memref<128x512xf32, #tpu.memory_space<vmem>>, vector<128x32xf32>
    tpu.vector_store %arg20[%c0_24, %c192], %66 {strides = array<i32>} : memref<128x512xf32, #tpu.memory_space<vmem>>, vector<128x32xf32>,
    %68 = vector.extract_strided_slice %39 {offsets = [0, 7], sizes = [128, 1], strides = [1, 1]} : vector<128x16xf32> to vector<128x1xf32>
    %69 = vector.broadcast %68 : vector<128x1xf32> to vector<128x32xf32>
    %70 = arith.mulf %69, %20 : vector<128x32xf32>
    %c0_25 = arith.constant 0 : index
    %c224 = arith.constant 224 : index
    %71 = vector.load %arg20[%c0_25, %c224] : memref<128x512xf32, #tpu.memory_space<vmem>>, vector<128x32xf32>
    tpu.vector_store %arg20[%c0_25, %c224], %70 {strides = array<i32>} : memref<128x512xf32, #tpu.memory_space<vmem>>, vector<128x32xf32>,
    %72 = vector.extract_strided_slice %39 {offsets = [0, 8], sizes = [128, 1], strides = [1, 1]} : vector<128x16xf32> to vector<128x1xf32>
    %73 = vector.broadcast %72 : vector<128x1xf32> to vector<128x32xf32>
    %74 = arith.mulf %73, %20 : vector<128x32xf32>
    %c0_26 = arith.constant 0 : index
    %c256 = arith.constant 256 : index
    %75 = vector.load %arg20[%c0_26, %c256] : memref<128x512xf32, #tpu.memory_space<vmem>>, vector<128x32xf32>
    tpu.vector_store %arg20[%c0_26, %c256], %74 {strides = array<i32>} : memref<128x512xf32, #tpu.memory_space<vmem>>, vector<128x32xf32>,
    %76 = vector.extract_strided_slice %39 {offsets = [0, 9], sizes = [128, 1], strides = [1, 1]} : vector<128x16xf32> to vector<128x1xf32>
    %77 = vector.broadcast %76 : vector<128x1xf32> to vector<128x32xf32>
    %78 = arith.mulf %77, %20 : vector<128x32xf32>
    %c0_27 = arith.constant 0 : index
    %c288 = arith.constant 288 : index
    %79 = vector.load %arg20[%c0_27, %c288] : memref<128x512xf32, #tpu.memory_space<vmem>>, vector<128x32xf32>
    tpu.vector_store %arg20[%c0_27, %c288], %78 {strides = array<i32>} : memref<128x512xf32, #tpu.memory_space<vmem>>, vector<128x32xf32>,
    %80 = vector.extract_strided_slice %39 {offsets = [0, 10], sizes = [128, 1], strides = [1, 1]} : vector<128x16xf32> to vector<128x1xf32>
    %81 = vector.broadcast %80 : vector<128x1xf32> to vector<128x32xf32>
    %82 = arith.mulf %81, %20 : vector<128x32xf32>
    %c0_28 = arith.constant 0 : index
    %c320 = arith.constant 320 : index
    %83 = vector.load %arg20[%c0_28, %c320] : memref<128x512xf32, #tpu.memory_space<vmem>>, vector<128x32xf32>
    tpu.vector_store %arg20[%c0_28, %c320], %82 {strides = array<i32>} : memref<128x512xf32, #tpu.memory_space<vmem>>, vector<128x32xf32>,
    %84 = vector.extract_strided_slice %39 {offsets = [0, 11], sizes = [128, 1], strides = [1, 1]} : vector<128x16xf32> to vector<128x1xf32>
    %85 = vector.broadcast %84 : vector<128x1xf32> to vector<128x32xf32>
    %86 = arith.mulf %85, %20 : vector<128x32xf32>
    %c0_29 = arith.constant 0 : index
    %c352 = arith.constant 352 : index
    %87 = vector.load %arg20[%c0_29, %c352] : memref<128x512xf32, #tpu.memory_space<vmem>>, vector<128x32xf32>
    tpu.vector_store %arg20[%c0_29, %c352], %86 {strides = array<i32>} : memref<128x512xf32, #tpu.memory_space<vmem>>, vector<128x32xf32>,
    %88 = vector.extract_strided_slice %39 {offsets = [0, 12], sizes = [128, 1], strides = [1, 1]} : vector<128x16xf32> to vector<128x1xf32>
    %89 = vector.broadcast %88 : vector<128x1xf32> to vector<128x32xf32>
    %90 = arith.mulf %89, %20 : vector<128x32xf32>
    %c0_30 = arith.constant 0 : index
    %c384 = arith.constant 384 : index
    %91 = vector.load %arg20[%c0_30, %c384] : memref<128x512xf32, #tpu.memory_space<vmem>>, vector<128x32xf32>
    tpu.vector_store %arg20[%c0_30, %c384], %90 {strides = array<i32>} : memref<128x512xf32, #tpu.memory_space<vmem>>, vector<128x32xf32>,
    %92 = vector.extract_strided_slice %39 {offsets = [0, 13], sizes = [128, 1], strides = [1, 1]} : vector<128x16xf32> to vector<128x1xf32>
    %93 = vector.broadcast %92 : vector<128x1xf32> to vector<128x32xf32>
    %94 = arith.mulf %93, %20 : vector<128x32xf32>
    %c0_31 = arith.constant 0 : index
    %c416 = arith.constant 416 : index
    %95 = vector.load %arg20[%c0_31, %c416] : memref<128x512xf32, #tpu.memory_space<vmem>>, vector<128x32xf32>
    tpu.vector_store %arg20[%c0_31, %c416], %94 {strides = array<i32>} : memref<128x512xf32, #tpu.memory_space<vmem>>, vector<128x32xf32>,
    %96 = vector.extract_strided_slice %39 {offsets = [0, 14], sizes = [128, 1], strides = [1, 1]} : vector<128x16xf32> to vector<128x1xf32>
    %97 = vector.broadcast %96 : vector<128x1xf32> to vector<128x32xf32>
    %98 = arith.mulf %97, %20 : vector<128x32xf32>
    %c0_32 = arith.constant 0 : index
    %c448 = arith.constant 448 : index
    %99 = vector.load %arg20[%c0_32, %c448] : memref<128x512xf32, #tpu.memory_space<vmem>>, vector<128x32xf32>
    tpu.vector_store %arg20[%c0_32, %c448], %98 {strides = array<i32>} : memref<128x512xf32, #tpu.memory_space<vmem>>, vector<128x32xf32>,
    %100 = vector.extract_strided_slice %39 {offsets = [0, 15], sizes = [128, 1], strides = [1, 1]} : vector<128x16xf32> to vector<128x1xf32>
    %101 = vector.broadcast %100 : vector<128x1xf32> to vector<128x32xf32>
    %102 = arith.mulf %101, %20 : vector<128x32xf32>
    %c0_33 = arith.constant 0 : index
    %c480 = arith.constant 480 : index
    %103 = vector.load %arg20[%c0_33, %c480] : memref<128x512xf32, #tpu.memory_space<vmem>>, vector<128x32xf32>
    tpu.vector_store %arg20[%c0_33, %c480], %102 {strides = array<i32>} : memref<128x512xf32, #tpu.memory_space<vmem>>, vector<128x32xf32>,
    %c0_34 = arith.constant 0 : index
    %c0_35 = arith.constant 0 : index
    %104 = vector.load %arg20[%c0_34, %c0_35] : memref<128x512xf32, #tpu.memory_space<vmem>>, vector<128x512xf32>
    %c0_36 = arith.constant 0 : index
    %c0_37 = arith.constant 0 : index
    %c0_38 = arith.constant 0 : index
    %105 = vector.load %arg9[%c0_36, %c0_37, %c0_38] : memref<1x512x32xf32, #tpu.memory_space<vmem>>, vector<1x512x32xf32>
    %106 = vector.shape_cast %105 : vector<1x512x32xf32> to vector<512x32xf32>
    %cst_39 = arith.constant dense<0.000000e+00> : vector<128x32xf32>
    %107 = tpu.matmul %104, %106, %cst_39 {dimension_numbers = #tpu.dot_dimension_numbers<[1], [0], [0], [1], [0, 0, 1, 1], [], []>} : vector<128x512xf32>, vector<512x32xf32>, vector<128x32xf32> -> vector<128x32xf32>
    %c0_40 = arith.constant 0 : index
    %c0_41 = arith.constant 0 : index
    %c0_42 = arith.constant 0 : index
    %108 = vector.load %arg10[%c0_40, %c0_41, %c0_42] : memref<1x32x32xf32, #tpu.memory_space<vmem>>, vector<1x32x32xf32>
    %109 = vector.shape_cast %108 : vector<1x32x32xf32> to vector<32x32xf32>
    %cst_43 = arith.constant dense<0.000000e+00> : vector<128x32xf32>
    %110 = tpu.matmul %20, %109, %cst_43 {dimension_numbers = #tpu.dot_dimension_numbers<[1], [0], [0], [1], [0, 0, 1, 1], [], []>} : vector<128x32xf32>, vector<32x32xf32>, vector<128x32xf32> -> vector<128x32xf32>
    %111 = arith.addf %107, %110 : vector<128x32xf32>
    %112 = tpu.iota {dimensions = array<i32: 0>} : vector<16x128xi32>
    %113 = vector.broadcast %11 : vector<1x128xi32> to vector<16x128xi32>
    %114 = arith.cmpi eq, %112, %113 : vector<16x128xi32>
    %115 = arith.extui %114 : vector<16x128xi1> to vector<16x128xi32>
    %116 = arith.sitofp %115 : vector<16x128xi32> to vector<16x128xf32>
    %c0_44 = arith.constant 0 : index
    %c0_45 = arith.constant 0 : index
    %117 = vector.load %arg19[%c0_44, %c0_45] : memref<16x32xf32, #tpu.memory_space<vmem>>, vector<16x32xf32>
    %cst_46 = arith.constant dense<0.000000e+00> : vector<16x32xf32>
    %118 = tpu.matmul %116, %111, %cst_46 {dimension_numbers = #tpu.dot_dimension_numbers<[1], [0], [0], [1], [0, 0, 1, 1], [], []>} : vector<16x128xf32>, vector<128x32xf32>, vector<16x32xf32> -> vector<16x32xf32>
    %119 = arith.addf %117, %118 : vector<16x32xf32>
    %c0_47 = arith.constant 0 : index
    %c0_48 = arith.constant 0 : index
    %120 = vector.load %arg19[%c0_47, %c0_48] : memref<16x32xf32, #tpu.memory_space<vmem>>, vector<16x32xf32>
    tpu.vector_store %arg19[%c0_47, %c0_48], %119 {strides = array<i32>} : memref<16x32xf32, #tpu.memory_space<vmem>>, vector<16x32xf32>,
    %c0_i32_49 = arith.constant 0 : i32
    %121 = arith.cmpi eq, %arg1, %c0_i32_49 : i32
    %122 = arith.extui %121 : i1 to i32
    %c0_i32_50 = arith.constant 0 : i32
    %123 = arith.cmpi ne, %122, %c0_i32_50 : i32
    scf.if %123 {
      %c0_51 = arith.constant 0 : index
      %c0_52 = arith.constant 0 : index
      %124 = vector.load %arg19[%c0_51, %c0_52] : memref<16x32xf32, #tpu.memory_space<vmem>>, vector<16x32xf32>
      %c0_53 = arith.constant 0 : index
      %c0_54 = arith.constant 0 : index
      %125 = vector.load %arg6[%c0_53, %c0_54] : memref<16x1xf32, #tpu.memory_space<vmem>>, vector<16x1xf32>
      %126 = vector.broadcast %125 : vector<16x1xf32> to vector<16x32xf32>
      %127 = arith.mulf %124, %126 : vector<16x32xf32>
      %c0_55 = arith.constant 0 : index
      %c0_56 = arith.constant 0 : index
      %c0_57 = arith.constant 0 : index
      %128 = vector.load %arg11[%c0_55, %c0_56, %c0_57] : memref<1x32x32xf32, #tpu.memory_space<vmem>>, vector<1x32x32xf32>
      %129 = vector.shape_cast %128 : vector<1x32x32xf32> to vector<32x32xf32>
      %cst_58 = arith.constant dense<0.000000e+00> : vector<16x32xf32>
      %130 = tpu.matmul %14, %129, %cst_58 {dimension_numbers = #tpu.dot_dimension_numbers<[1], [0], [0], [1], [0, 0, 1, 1], [], []>} : vector<16x32xf32>, vector<32x32xf32>, vector<16x32xf32> -> vector<16x32xf32>
      %131 = arith.addf %127, %130 : vector<16x32xf32>
      %c0_59 = arith.constant 0 : index
      %c0_60 = arith.constant 0 : index
      %c0_61 = arith.constant 0 : index
      %132 = vector.load %arg12[%c0_59, %c0_60, %c0_61] : memref<1x1x32xf32, #tpu.memory_space<vmem>>, vector<1x1x32xf32>
      %133 = vector.shape_cast %132 : vector<1x1x32xf32> to vector<1x32xf32>
      %134 = vector.broadcast %133 : vector<1x32xf32> to vector<16x32xf32>
      %135 = arith.addf %131, %134 : vector<16x32xf32>
      %cst_62 = arith.constant 0.000000e+00 : f32
      %136 = vector.broadcast %cst_62 : f32 to vector<16x32xf32>
      %137 = arith.maximumf %135, %136 : vector<16x32xf32>
      %c0_63 = arith.constant 0 : index
      %c0_64 = arith.constant 0 : index
      %138 = vector.load %arg18[%c0_63, %c0_64] : memref<16x32xf32, #tpu.memory_space<vmem>>, vector<16x32xf32>
      tpu.vector_store %arg18[%c0_63, %c0_64], %137 {strides = array<i32>} : memref<16x32xf32, #tpu.memory_space<vmem>>, vector<16x32xf32>,
      %c1_i32 = arith.constant 1 : i32
      %139 = arith.cmpi eq, %arg0, %c1_i32 : i32
      %140 = arith.extui %139 : i1 to i32
      %c0_i32_65 = arith.constant 0 : i32
      %141 = arith.cmpi ne, %140, %c0_i32_65 : i32
      scf.if %141 {
        %c0_66 = arith.constant 0 : index
        %c0_67 = arith.constant 0 : index
        %142 = vector.load %arg13[%c0_66, %c0_67] : memref<32x32xf32, #tpu.memory_space<vmem>>, vector<32x32xf32>
        %cst_68 = arith.constant dense<0.000000e+00> : vector<16x32xf32>
        %143 = tpu.matmul %137, %142, %cst_68 {dimension_numbers = #tpu.dot_dimension_numbers<[1], [0], [0], [1], [0, 0, 1, 1], [], []>} : vector<16x32xf32>, vector<32x32xf32>, vector<16x32xf32> -> vector<16x32xf32>
        %c0_69 = arith.constant 0 : index
        %c0_70 = arith.constant 0 : index
        %144 = vector.load %arg14[%c0_69, %c0_70] : memref<1x32xf32, #tpu.memory_space<vmem>>, vector<1x32xf32>
        %145 = vector.broadcast %144 : vector<1x32xf32> to vector<16x32xf32>
        %146 = arith.addf %143, %145 : vector<16x32xf32>
        %cst_71 = arith.constant 0.000000e+00 : f32
        %147 = vector.broadcast %cst_71 : f32 to vector<16x32xf32>
        %148 = arith.maximumf %146, %147 : vector<16x32xf32>
        %c0_72 = arith.constant 0 : index
        %c0_73 = arith.constant 0 : index
        %149 = vector.load %arg15[%c0_72, %c0_73] : memref<32x128xf32, #tpu.memory_space<vmem>>, vector<32x128xf32>
        %cst_74 = arith.constant dense<0.000000e+00> : vector<16x128xf32>
        %150 = tpu.matmul %148, %149, %cst_74 {dimension_numbers = #tpu.dot_dimension_numbers<[1], [0], [0], [1], [0, 0, 1, 1], [], []>} : vector<16x32xf32>, vector<32x128xf32>, vector<16x128xf32> -> vector<16x128xf32>
        %c0_75 = arith.constant 0 : index
        %c0_76 = arith.constant 0 : index
        %151 = vector.load %arg16[%c0_75, %c0_76] : memref<1x128xf32, #tpu.memory_space<vmem>>, vector<1x128xf32>
        %152 = vector.broadcast %151 : vector<1x128xf32> to vector<16x128xf32>
        %153 = arith.addf %150, %152 : vector<16x128xf32>
        %c0_77 = arith.constant 0 : index
        %c0_78 = arith.constant 0 : index
        %154 = vector.load %arg17[%c0_77, %c0_78] : memref<16x128xf32, #tpu.memory_space<vmem>>, vector<16x128xf32>
        tpu.vector_store %arg17[%c0_77, %c0_78], %153 {strides = array<i32>} : memref<16x128xf32, #tpu.memory_space<vmem>>, vector<16x128xf32>,
      } else {
      }
    } else {
    }
    return
  }
  func.func @transform_0(%arg0: i32, %arg1: i32) -> (i32, i32) {
    %c0_i32 = arith.constant 0 : i32
    %c0_i32_0 = arith.constant 0 : i32
    return %arg1, %c0_i32 : i32, i32
  }
  func.func @transform_1(%arg0: i32, %arg1: i32) -> (i32, i32) {
    %c0_i32 = arith.constant 0 : i32
    %c0_i32_0 = arith.constant 0 : i32
    return %c0_i32, %arg1 : i32, i32
  }
  func.func @transform_2(%arg0: i32, %arg1: i32) -> (i32, i32) {
    %c0_i32 = arith.constant 0 : i32
    %c0_i32_0 = arith.constant 0 : i32
    %c0_i32_1 = arith.constant 0 : i32
    return %c0_i32, %c0_i32_0 : i32, i32
  }
  func.func @transform_3(%arg0: i32, %arg1: i32) -> (i32, i32) {
    %c0_i32 = arith.constant 0 : i32
    %c0_i32_0 = arith.constant 0 : i32
    %c0_i32_1 = arith.constant 0 : i32
    return %c0_i32, %c0_i32_0 : i32, i32
  }
  func.func @transform_4(%arg0: i32, %arg1: i32) -> (i32, i32) {
    %c0_i32 = arith.constant 0 : i32
    %c0_i32_0 = arith.constant 0 : i32
    %c0_i32_1 = arith.constant 0 : i32
    return %c0_i32, %c0_i32_0 : i32, i32
  }
  func.func @transform_5(%arg0: i32, %arg1: i32) -> (i32, i32, i32) {
    %c0_i32 = arith.constant 0 : i32
    %c0_i32_0 = arith.constant 0 : i32
    %c0_i32_1 = arith.constant 0 : i32
    return %arg0, %c0_i32, %c0_i32_0 : i32, i32, i32
  }
  func.func @transform_6(%arg0: i32, %arg1: i32) -> (i32, i32, i32) {
    %c0_i32 = arith.constant 0 : i32
    %c0_i32_0 = arith.constant 0 : i32
    %c0_i32_1 = arith.constant 0 : i32
    return %arg0, %c0_i32, %c0_i32_0 : i32, i32, i32
  }
  func.func @transform_7(%arg0: i32, %arg1: i32) -> (i32, i32, i32) {
    %c0_i32 = arith.constant 0 : i32
    %c0_i32_0 = arith.constant 0 : i32
    %c0_i32_1 = arith.constant 0 : i32
    return %arg0, %c0_i32, %c0_i32_0 : i32, i32, i32
  }
  func.func @transform_8(%arg0: i32, %arg1: i32) -> (i32, i32, i32) {
    %c0_i32 = arith.constant 0 : i32
    %c0_i32_0 = arith.constant 0 : i32
    %c0_i32_1 = arith.constant 0 : i32
    return %arg0, %c0_i32, %c0_i32_0 : i32, i32, i32
  }
  func.func @transform_9(%arg0: i32, %arg1: i32) -> (i32, i32, i32) {
    %c0_i32 = arith.constant 0 : i32
    %c0_i32_0 = arith.constant 0 : i32
    %c0_i32_1 = arith.constant 0 : i32
    return %arg0, %c0_i32, %c0_i32_0 : i32, i32, i32
  }
  func.func @transform_10(%arg0: i32, %arg1: i32) -> (i32, i32, i32) {
    %c0_i32 = arith.constant 0 : i32
    %c0_i32_0 = arith.constant 0 : i32
    %c0_i32_1 = arith.constant 0 : i32
    return %arg0, %c0_i32, %c0_i32_0 : i32, i32, i32
  }
  func.func @transform_11(%arg0: i32, %arg1: i32) -> (i32, i32) {
    %c0_i32 = arith.constant 0 : i32
    %c0_i32_0 = arith.constant 0 : i32
    %c0_i32_1 = arith.constant 0 : i32
    return %c0_i32, %c0_i32_0 : i32, i32
  }
  func.func @transform_12(%arg0: i32, %arg1: i32) -> (i32, i32) {
    %c0_i32 = arith.constant 0 : i32
    %c0_i32_0 = arith.constant 0 : i32
    %c0_i32_1 = arith.constant 0 : i32
    return %c0_i32, %c0_i32_0 : i32, i32
  }
  func.func @transform_13(%arg0: i32, %arg1: i32) -> (i32, i32) {
    %c0_i32 = arith.constant 0 : i32
    %c0_i32_0 = arith.constant 0 : i32
    %c0_i32_1 = arith.constant 0 : i32
    return %c0_i32, %c0_i32_0 : i32, i32
  }
  func.func @transform_14(%arg0: i32, %arg1: i32) -> (i32, i32) {
    %c0_i32 = arith.constant 0 : i32
    %c0_i32_0 = arith.constant 0 : i32
    %c0_i32_1 = arith.constant 0 : i32
    return %c0_i32, %c0_i32_0 : i32, i32
  }
  func.func @transform_15(%arg0: i32, %arg1: i32) -> (i32, i32) {
    %c0_i32 = arith.constant 0 : i32
    %c0_i32_0 = arith.constant 0 : i32
    %c0_i32_1 = arith.constant 0 : i32
    return %c0_i32, %c0_i32_0 : i32, i32
  }
}

</mosaic_0001>

<bundles_post_ra>
// kernel: net_mp_forward.1
= control target key start
LH: loop header
LB: loop body
LE: loop exit
PB: predicated region body
PF: predicated region fallthrough
CT: control target
= control target key end

     0   :  { %s5507_s18 = smov 0   ;;  %s5509_s19 = smov 0   ;;  %s7587_s0 = inlined_call_operand.vmem [shape: s32[128,1], index: 0, kind: input, shape index: {}]   ;;  %s7588_s1 = inlined_call_operand.vmem [shape: s32[1,128], index: 1, kind: input, shape index: {}]   ;;  %s7589_s2 = inlined_call_operand.vmem [shape: f32[128,2], index: 2, kind: input, shape index: {}]   ;;  %s7590_s3 = inlined_call_operand.vmem [shape: f32[16,32], index: 3, kind: input, shape index: {}]   ;;  %s7591_s4 = inlined_call_operand.vmem [shape: f32[16,1], index: 4, kind: input, shape index: {}]   ;;  %s7592_s5 = inlined_call_operand.vmem [shape: f32[2,2,16], index: 5, kind: input, shape index: {}]   ;;  %s7593_s6 = inlined_call_operand.vmem [shape: f32[2,1,16], index: 6, kind: input, shape index: {}]   ;;  %s7594_s7 = inlined_call_operand.vmem [shape: f32[2,512,32], index: 7, kind: input, shape index: {}]   ;;  %s7595_s8 = inlined_call_operand.vmem [shape: f32[2,32,32], index: 8, kind: input, shape index: {}]   ;;  %s7596_s9 = inlined_call_operand.vmem [shape: f32[2,32,32], index: 9, kind: input, shape index: {}]   ;;  %s7597_s10 = inlined_call_operand.vmem [shape: f32[2,1,32], index: 10, kind: input, shape index: {}]   ;;  %s7598_s11 = inlined_call_operand.vmem [shape: f32[32,32], index: 11, kind: input, shape index: {}]   ;;  %s7599_s12 = inlined_call_operand.vmem [shape: f32[1,32], index: 12, kind: input, shape index: {}]   ;;  %s7600_s13 = inlined_call_operand.vmem [shape: f32[32,128], index: 13, kind: input, shape index: {}]   ;;  %s7601_s14 = inlined_call_operand.vmem [shape: f32[1,128], index: 14, kind: input, shape index: {}]   ;;  %s7602_s15 = inlined_call_operand.vmem [shape: f32[16,128], index: 15, kind: output, shape index: {}]  }
   0x1   :  { %7658 = sst [smem:[#allocation70_spill]] %s7599_s12  ;;  %s5511_s20 = smov 0  }
   0x2   :  { %7659 = sst [smem:[#allocation71_spill]] %s7601_s14 }
   0x3   :  { %7660 = sst [smem:[#allocation72_spill]] %s7602_s15 }
   0x4 LB: > { %7661 = sst [smem:[#allocation5_spill]] %s5400_s19  ;;  %s37_s21 = sadd.s32 1, %s5400_s19  ;;  %s5404_s20 = sphi %s5511_s20, %s25_s20   ;;  %s5400_s19 = sphi %s5509_s19, %s7824_s19   ;;  %s5396_s18 = sphi %s5507_s18, %s7823_s18  }
   0x5   : > { %7662 = sst [smem:[#allocation6_spill]] %s5404_s20  ;;  %p4668_p0 = scmp.ge.s32.totalorder %s5404_s20, 1 }
   0x6   : > { %p39_p1 = scmp.ge.s32.totalorder %s37_s21, 2  ;;  %p508_p2 = scmp.lt.s32.totalorder %s5404_s20, 3 }
   0x8   : > { %s7826_s21 = smov (%p39_p1, %s37_s21), 0  ;;  %p509_p3 = pnand %p4668_p0, %p508_p2 }
   0x9   : > { %7663 = sst [smem:[#allocation7_spill]] %s7826_s21 }
   0xa   : > { %512 = sbr.rel (%p509_p3) target bundleno = 2637 (0xa4d), region = 80 }
  0x11   : > { %p588_p4 = scmp.lt.s32.totalorder %s5396_s18, 1  ;;  %p613_p5 = scmp.eq.s32.totalorder %s5396_s18, 0 }
  0x12   : > { %v619_v0 = vld [vmem:[%s7590_s3] sm:$0xff] (%p613_p5)  ;;  %vm621_vm0 = vcmask (%p613_p5), 261120   ;;  %v620_v1 = vld [vmem:[%s7590_s3 + $0x8] sm:$0xff] (%p613_p5) }
  0x13   : > { %s5530_s22 = scalar_select %p588_p4, %s5396_s18, 1 }
  0x14   : > { %618 = sbr.rel (!%p613_p5) target bundleno = 27 (0x1b), region = 84  ;;  %622 = vst.msk [vmem:[#allocation2] sm:$0xff] (%p613_p5), %vm621_vm0, %v619_v0  ;;  %623 = vst.msk [vmem:[#allocation2 + $0x8] sm:$0xff] (%p613_p5), %vm621_vm0, %v620_v1 }
  0x15   : > { %s4669_s23 = sshll.u32 %s5530_s22, 1  ;;  %s4743_s30 = sshll.u32 %s5530_s22, 9 }
  0x16   : > { %s5540_s29 = scalar_lea.vmem %s7592_s5, %s4669_s23  ;;  %s5546_s21 = scalar_lea.vmem %s7594_s7, %s4743_s30 }
  0x17   : > { %s4744_s19 = sshll.u32 %s5530_s22, 5  ;;  %s612_s28 = scalar_lea.vmem %s7597_s10, %s5530_s22 }
  0x18   : > { %s5552_s14 = scalar_lea.vmem %s7595_s8, %s4744_s19  ;;  %s5557_s25 = scalar_lea.vmem %s7596_s9, %s4744_s19 }
  0x1b PF: > { %v633_v2 = vld [vmem:[%s7587_s0 + $0x10] sm:$0xff]  ;;  %v631_v3 = vld [vmem:[%s7587_s0] sm:$0xff]  ;;  %v7606_v4 = vmov 0   ;;  %v634_v5 = vld [vmem:[%s7587_s0 + $0x18] sm:$0xff]  ;;  %v5407_v38 = vmov 1   ;;  %v667_v39 = vlaneseq  ;;  %vm765_vm1 = vcmask 130048   ;;  %s7665_s12 = scalar_lea.vmem %s7593_s6, %s5530_s22 }
  0x1c   : > { %5287 = vset.pattern.permute.xlu1 %v7606_v4  ;;  %5286 = vset.pattern.permute.xlu0 %v7606_v4  ;;  %v632_v6 = vld [vmem:[%s7587_s0 + $0x8] sm:$0xff]  ;;  %v635_v8 = vld [vmem:[%s7587_s0 + $0x20] sm:$0xff]  ;;  %v638_v10 = vld [vmem:[%s7587_s0 + $0x38] sm:$0xff]  ;;  %v5408_v43 = vmov 0.0   ;;  %s5415_s15 = smov 96   ;;  %p4734_p6 = scmp.ne.s32.totalorder %s5396_s18, 1 }
  0x1d   : > { %676 = vperm.xlu1 %5287, %v633_v2   ;;  %670 = vperm.xlu0 %5286, %v631_v3   ;;  %v636_v7 = vld [vmem:[%s7587_s0 + $0x28] sm:$0xff]  ;;  %v665_v9 = vld [vmem:[#allocation2] sm:$0xff]  ;;  %v637_v11 = vld [vmem:[%s7587_s0 + $0x30] sm:$0xff]  ;;  %v5671_v40 = vand.u32 127, %v667_v39  ;;  %s7819_s16 = sld [smem:[#allocation70_spill]] (!%p4734_p6)  ;;  %s7820_s22 = sld [smem:[#allocation71_spill]] (!%p4734_p6) }
  0x1e   : > { %v666_v12 = vld [vmem:[#allocation2 + $0x8] sm:$0xff]  ;;  %v639_v15 = vld [vmem:[%s7587_s0 + $0x40] sm:$0xff]  ;;  %v642_v16 = vld [vmem:[%s7587_s0 + $0x58] sm:$0xff] }
  0x1f   : > { %v5109_v13 = vpack.c.bf16 %v666_v12, %v665_v9  ;;  %v640_v14 = vld [vmem:[%s7587_s0 + $0x48] sm:$0xff]  ;;  %v641_v17 = vld [vmem:[%s7587_s0 + $0x50] sm:$0xff]  ;;  %v643_v19 = vld [vmem:[%s7587_s0 + $0x60] sm:$0xff] }
  0x20   : > { %v644_v18 = vld [vmem:[%s7587_s0 + $0x68] sm:$0xff]  ;;  %v646_v20 = vld [vmem:[%s7587_s0 + $0x78] sm:$0xff]  ;;  %v645_v21 = vld [vmem:[%s7587_s0 + $0x70] sm:$0xff] }
  0x21   : > { %679 = vperm.xlu1 %5287, %v634_v5   ;;  %673 = vperm.xlu0 %5286, %v632_v6   ;;  %v650_v22 = vld [vmem:[%s7589_s2 + $0x8] sm:$0xff]  ;;  %v649_v23 = vld [vmem:[%s7589_s2] sm:$0xff]  ;;  %v652_v24 = vld [vmem:[%s7589_s2 + $0x18] sm:$0xff] }
  0x22   : > { %5110 = vmatprep.subr.bf16.mxu0 %v5109_v13  ;;  %v651_v25 = vld [vmem:[%s7589_s2 + $0x10] sm:$0xff]  ;;  %v654_v26 = vld [vmem:[%s7589_s2 + $0x28] sm:$0xff]  ;;  %v653_v27 = vld [vmem:[%s7589_s2 + $0x20] sm:$0xff] }
  0x23   : > { %5112 = vmatpush3.bf16.msra.mxu0 %v5109_v13  ;;  %v656_v28 = vld [vmem:[%s7589_s2 + $0x38] sm:$0xff]  ;;  %v655_v29 = vld [vmem:[%s7589_s2 + $0x30] sm:$0xff]  ;;  %v658_v30 = vld [vmem:[%s7589_s2 + $0x48] sm:$0xff] }
  0x24   : > { %v657_v31 = vld [vmem:[%s7589_s2 + $0x40] sm:$0xff]  ;;  %v660_v32 = vld [vmem:[%s7589_s2 + $0x58] sm:$0xff]  ;;  %v659_v33 = vld [vmem:[%s7589_s2 + $0x50] sm:$0xff] }
  0x25   : > { %685 = vperm.xlu1 %5287, %v636_v7   ;;  %682 = vperm.xlu0 %5286, %v635_v8   ;;  %v662_v34 = vld [vmem:[%s7589_s2 + $0x68] sm:$0xff]  ;;  %v661_v35 = vld [vmem:[%s7589_s2 + $0x60] sm:$0xff]  ;;  %v664_v36 = vld [vmem:[%s7589_s2 + $0x78] sm:$0xff] }
  0x26   : > { %v663_v37 = vld [vmem:[%s7589_s2 + $0x70] sm:$0xff] }
  0x29   : > { %691 = vperm.xlu1 %5287, %v638_v10   ;;  %688 = vperm.xlu0 %5286, %v637_v11  }
  0x2d   : > { %697 = vperm.xlu1 %5287, %v640_v14   ;;  %694 = vperm.xlu0 %5286, %v639_v15  }
  0x31   : > { %703 = vperm.xlu1 %5287, %v642_v16   ;;  %700 = vperm.xlu0 %5286, %v641_v17  }
  0x35   : > { %709 = vperm.xlu1 %5287, %v644_v18   ;;  %706 = vperm.xlu0 %5286, %v643_v19  }
  0x39   : > { %715 = vperm.xlu1 %5287, %v646_v20   ;;  %712 = vperm.xlu0 %5286, %v645_v21  }
  0x3d   : > { %967 = vperm.xlu1 %5287, %v650_v22   ;;  %962 = vperm.xlu0 %5286, %v649_v23  }
  0x41   : > { %977 = vperm.xlu1 %5287, %v652_v24   ;;  %972 = vperm.xlu0 %5286, %v651_v25  }
  0x45   : > { %987 = vperm.xlu1 %5287, %v654_v26   ;;  %982 = vperm.xlu0 %5286, %v653_v27  }
  0x49   : > { %997 = vperm.xlu1 %5287, %v656_v28   ;;  %992 = vperm.xlu0 %5286, %v655_v29  }
  0x4d   : > { %1007 = vperm.xlu1 %5287, %v658_v30   ;;  %1002 = vperm.xlu0 %5286, %v657_v31  }
  0x51   : > { %1017 = vperm.xlu1 %5287, %v660_v32   ;;  %1012 = vperm.xlu0 %5286, %v659_v33  }
  0x55   : > { %1027 = vperm.xlu1 %5287, %v662_v34   ;;  %1022 = vperm.xlu0 %5286, %v661_v35  }
  0x59   : > { %1037 = vperm.xlu1 %5287, %v664_v36   ;;  %1032 = vperm.xlu0 %5286, %v663_v37  }
  0x5d   : > { %5289 = vset.pattern.permute.xlu1 %v5407_v38  ;;  %5288 = vset.pattern.permute.xlu0 %v5407_v38 }
  0x5e   : > { %1065 = vperm.xlu1 %5289, %v650_v22   ;;  %1061 = vperm.xlu0 %5288, %v649_v23   ;;  %v5732_v23 = vshrl.u32 %v667_v39, 7 }
  0x60   : > { %7664 = vst [vmem:[#allocation8_spill] sm:$0xff] %v5732_v23 }
  0x62   : > { %1069 = vperm.xlu1 %5289, %v651_v25   ;;  %1073 = vperm.xlu0 %5288, %v652_v24  }
  0x66   : > { %1077 = vperm.xlu1 %5289, %v653_v27   ;;  %1081 = vperm.xlu0 %5288, %v654_v26   ;;  %v1042_v26 = vsub.s32 0, %v5732_v23  ;;  %v1126_v27 = vsub.s32 1, %v5732_v23 }
  0x6a   : > { %1085 = vperm.xlu1 %5289, %v655_v29   ;;  %1089 = vperm.xlu0 %5288, %v656_v28   ;;  %v959_v28 = vld [vmem:[%s5540_s29] sm:$0x3]  ;;  %s5414_s29 = smov 64  }
  0x6e   : > { %1093 = vperm.xlu1 %5289, %v657_v31   ;;  %1097 = vperm.xlu0 %5288, %v658_v30   ;;  %v5745_v31 = vrot.slane %v959_v28, %v1042_v26  ;;  %v3654_v26 = vld [vmem:[%s5552_s14 + $0x18] sm:$0xff] }
  0x72   : > { %1101 = vperm.xlu1 %5289, %v659_v33   ;;  %1105 = vperm.xlu0 %5288, %v660_v32   ;;  %v5747_v32 = vrot.slane %v959_v28, %v1126_v27 }
  0x76   : > { %1109 = vperm.xlu1 %5289, %v661_v35   ;;  %1113 = vperm.xlu0 %5288, %v662_v34  }
  0x7a   : > { %1117 = vperm.xlu1 %5289, %v663_v37   ;;  %1121 = vperm.xlu0 %5288, %v664_v36   ;;  %v5758_v37 = vld [vmem:[%s7665_s12] ss:$0 sm:$0xff] }
  0x7e   : > { %5290 = vset.pattern.permute.xlu1 %v7606_v4 }
  0x9c   : > { %v677_v41 = vpop.permute.xlu1 %676  ;;  %v671_v42 = vpop.permute.xlu0 %670 }
  0x9d   : > { %vm717_vm2 = vcmp.eq.s32.totalorder %v671_v42, %v5671_v40  ;;  %vm719_vm3 = vcmp.eq.s32.totalorder %v677_v41, %v5671_v40 }
  0x9e   : > { %v4677_v44 = vsel %vm717_vm2, 1.0, %v5408_v43  ;;  %v4679_v48 = vsel %vm719_vm3, 1.0, %v5408_v43  ;;  %vm1456_vm3 = vcmask 523520  }
  0x9f   : > { %4985 = vmatprep.mubr.msk.f32.mxu0 %vm765_vm1, %v4677_v44 }
  0xa0   : > { %v680_v45 = vpop.permute.xlu1 %679  ;;  %v674_v46 = vpop.permute.xlu0 %673 }
  0xa1   : > { %vm718_vm4 = vcmp.eq.s32.totalorder %v674_v46, %v5671_v40  ;;  %vm720_vm5 = vcmp.eq.s32.totalorder %v680_v45, %v5671_v40 }
  0xa2   : > { %v4678_v47 = vsel %vm718_vm4, 1.0, %v5408_v43  ;;  %v4680_v51 = vsel %vm720_vm5, 1.0, %v5408_v43  ;;  %vm1617_vm4 = vcmask 785920   ;;  %vm1778_vm5 = vcmask 1048320  }
  0xa3   : > { %4986 = vmatmul.mubr.msk.f32.vlgmr.msra.gmra.mrb[0].mxu0 %vm765_vm1, %v4678_v47 }
  0xa4   : > { %v686_v49 = vpop.permute.xlu1 %685  ;;  %v683_v50 = vpop.permute.xlu0 %682  ;;  %4988 = vmatprep.mubr.msk.f32.mxu0 %vm765_vm1, %v4679_v48 }
  0xa5   : > { %vm721_vm6 = vcmp.eq.s32.totalorder %v683_v50, %v5671_v40  ;;  %vm722_vm7 = vcmp.eq.s32.totalorder %v686_v49, %v5671_v40 }
  0xa6   : > { %v4681_v52 = vsel %vm721_vm6, 1.0, %v5408_v43  ;;  %v4682_v55 = vsel %vm722_vm7, 1.0, %v5408_v43 }
  0xa7   : > { %4989 = vmatmul.mubr.msk.f32.gmra.mrb[2].mxu0 %vm765_vm1, %v4680_v51 }
  0xa8   : > { %v692_v53 = vpop.permute.xlu1 %691  ;;  %v689_v54 = vpop.permute.xlu0 %688  ;;  %4991 = vmatprep.mubr.msk.f32.mxu0 %vm765_vm1, %v4681_v52 }
  0xa9   : > { %vm723_vm8 = vcmp.eq.s32.totalorder %v689_v54, %v5671_v40  ;;  %vm724_vm9 = vcmp.eq.s32.totalorder %v692_v53, %v5671_v40 }
  0xaa   : > { %v4683_v56 = vsel %vm723_vm8, 1.0, %v5408_v43  ;;  %v4684_v59 = vsel %vm724_vm9, 1.0, %v5408_v43 }
  0xab   : > { %4992 = vmatmul.mubr.msk.f32.gmra.mrb[4].mxu0 %vm765_vm1, %v4682_v55 }
  0xac   : > { %v698_v57 = vpop.permute.xlu1 %697  ;;  %v695_v58 = vpop.permute.xlu0 %694  ;;  %4994 = vmatprep.mubr.msk.f32.mxu0 %vm765_vm1, %v4683_v56 }
  0xad   : > { %vm725_vm10 = vcmp.eq.s32.totalorder %v695_v58, %v5671_v40  ;;  %vm726_vm11 = vcmp.eq.s32.totalorder %v698_v57, %v5671_v40 }
  0xae   : > { %v4685_v60 = vsel %vm725_vm10, 1.0, %v5408_v43  ;;  %v4686_v63 = vsel %vm726_vm11, 1.0, %v5408_v43 }
  0xaf   : > { %4995 = vmatmul.mubr.msk.f32.gmra.mrb[6].mxu0 %vm765_vm1, %v4684_v59 }
  0xb0   : > { %v704_v61 = vpop.permute.xlu1 %703  ;;  %v701_v62 = vpop.permute.xlu0 %700  ;;  %4997 = vmatprep.mubr.msk.f32.mxu0 %vm765_vm1, %v4685_v60 }
  0xb1   : > { %vm727_vm12 = vcmp.eq.s32.totalorder %v701_v62, %v5671_v40  ;;  %vm728_vm13 = vcmp.eq.s32.totalorder %v704_v61, %v5671_v40 }
  0xb2   : > { %v4687_v0 = vsel %vm727_vm12, 1.0, %v5408_v43  ;;  %v4688_v3 = vsel %vm728_vm13, 1.0, %v5408_v43 }
  0xb3   : > { %4998 = vmatmul.mubr.msk.f32.gmra.mrb[8].mxu0 %vm765_vm1, %v4686_v63 }
  0xb4   : > { %v710_v1 = vpop.permute.xlu1 %709  ;;  %v707_v2 = vpop.permute.xlu0 %706  ;;  %5000 = vmatprep.mubr.msk.f32.mxu0 %vm765_vm1, %v4687_v0 }
  0xb5   : > { %vm729_vm14 = vcmp.eq.s32.totalorder %v707_v2, %v5671_v40  ;;  %vm730_vm15 = vcmp.eq.s32.totalorder %v710_v1, %v5671_v40 }
  0xb6   : > { %v4689_v5 = vsel %vm729_vm14, 1.0, %v5408_v43  ;;  %v4690_v8 = vsel %vm730_vm15, 1.0, %v5408_v43 }
  0xb7   : > { %5001 = vmatmul.mubr.msk.f32.gmra.mrb[10].mxu0 %vm765_vm1, %v4688_v3 }
  0xb8   : > { %v716_v6 = vpop.permute.xlu1 %715  ;;  %v713_v7 = vpop.permute.xlu0 %712  ;;  %5003 = vmatprep.mubr.msk.f32.mxu0 %vm765_vm1, %v4689_v5 }
  0xb9   : > { %vm731_vm0 = vcmp.eq.s32.totalorder %v713_v7, %v5671_v40  ;;  %vm732_vm2 = vcmp.eq.s32.totalorder %v716_v6, %v5671_v40  ;;  %v3651_v6 = vld [vmem:[%s5552_s14] sm:$0xff]  ;;  %v3652_v7 = vld [vmem:[%s5552_s14 + $0x8] sm:$0xff] }
  0xba   : > { %v4691_v9 = vsel %vm731_vm0, 1.0, %v5408_v43  ;;  %v4692_v12 = vsel %vm732_vm2, 1.0, %v5408_v43 }
  0xbb   : > { %5004 = vmatmul.mubr.msk.f32.gmra.mrb[12].mxu0 %vm765_vm1, %v4690_v8  ;;  %v5113_v8 = vpack.c.bf16 %v3652_v7, %v3651_v6 }
  0xbc   : > { %v5718_v10 = vpop.permute.xlu1 %967  ;;  %v963_v11 = vpop.permute.xlu0 %962  ;;  %5006 = vmatprep.mubr.msk.f32.mxu0 %vm765_vm1, %v4691_v9 }
  0xbd   : > { %v1044_v35 = vmul.f32 %v5745_v31, %v963_v11  ;;  %5114 = vmatprep.subr.bf16.mxu1 %v5113_v8 }
  0xbe   : > { %5116 = vmatpush3.bf16.msra.mxu1 %v5113_v8 }
  0xbf   : > { %5007 = vmatmul.mubr.msk.f32.gmra.mrb[14].mxu0 %vm765_vm1, %v4692_v12  ;;  %vm627_vm1 = vcmask 261120  }
  0xc0   : > { %v978_v13 = vpop.permute.xlu1 %977  ;;  %v973_v14 = vpop.permute.xlu0 %972  ;;  %628 = vst.msk [vmem:[#allocation3] sm:$0xff] %vm627_vm1, %v5408_v43  ;;  %629 = vst.msk [vmem:[#allocation3 + $0x8] sm:$0xff] %vm627_vm1, %v5408_v43 }
  0xc1   : > { %v1047_v40 = vmul.f32 %v5745_v31, %v978_v13  ;;  %v1046_v44 = vmul.f32 %v5745_v31, %v973_v14 }
  0xc4   : > { %v988_v15 = vpop.permute.xlu1 %987  ;;  %v5723_v16 = vpop.permute.xlu0 %982 }
  0xc5   : > { %v1049_v52 = vmul.f32 %v5745_v31, %v988_v15 }
  0xc8   : > { %v998_v17 = vpop.permute.xlu1 %997  ;;  %v5725_v18 = vpop.permute.xlu0 %992 }
  0xc9   : > { %v1051_v60 = vmul.f32 %v5745_v31, %v998_v17 }
  0xcc   : > { %v1008_v19 = vpop.permute.xlu1 %1007  ;;  %v5727_v20 = vpop.permute.xlu0 %1002 }
  0xcd   : > { %v1053_v2 = vmul.f32 %v5745_v31, %v1008_v19  ;;  %v3653_v19 = vld [vmem:[%s5552_s14 + $0x10] sm:$0xff]  ;;  %s5413_s14 = smov 32  }
  0xd0   : > { %v1018_v21 = vpop.permute.xlu1 %1017  ;;  %v5729_v22 = vpop.permute.xlu0 %1012 }
  0xd1   : > { %v1055_v14 = vmul.f32 %v5745_v31, %v1018_v21  ;;  %v1054_v8 = vmul.f32 %v5745_v31, %v5729_v22 }
  0xd4   : > { %v5734_v24 = vpop.permute.xlu1 %1027  ;;  %v5736_v25 = vpop.permute.xlu0 %1022 }
  0xd8   : > { %v5741_v29 = vpop.permute.xlu1 %1037  ;;  %v5743_v30 = vpop.permute.xlu0 %1032 }
  0xdd   : > { %v5749_v33 = vpop.permute.xlu1 %1065  ;;  %v1062_v34 = vpop.permute.xlu0 %1061 }
  0xde   : > { %v1128_v36 = vmul.f32 %v5747_v32, %v1062_v34 }
  0xe0   : > { %v1144_v39 = vadd.f32 %v1128_v36, %v1044_v35  ;;  %v5117_v35 = vpack.c.bf16 %v3654_v26, %v3653_v19  ;;  %v1057_v36 = vmul.f32 %v5745_v31, %v5734_v24  ;;  %v1129_v24 = vmul.f32 %v5747_v32, %v5749_v33 }
  0xe1   : > { %v1070_v41 = vpop.permute.xlu1 %1069  ;;  %v1074_v42 = vpop.permute.xlu0 %1073  ;;  %v1058_v26 = vmul.f32 %v5745_v31, %v5743_v30 }
  0xe2   : > { %v1167_v45 = vadd.f32 %v5758_v37, %v1144_v39  ;;  %v1130_v46 = vmul.f32 %v5747_v32, %v1070_v41  ;;  %v1131_v47 = vmul.f32 %v5747_v32, %v1074_v42  ;;  %5118 = vmatprep.subr.bf16.mxu1 %v5117_v35 }
  0xe3   : > { %5120 = vmatpush3.bf16.msra.mxu1 %v5117_v35 }
  0xe4   : > { %v5765_v48 = vmax.f32 %v1167_v45, 0.0  ;;  %v1146_v49 = vadd.f32 %v1130_v46, %v1046_v44  ;;  %v1147_v50 = vadd.f32 %v1131_v47, %v1047_v40  ;;  %v1059_v45 = vmul.f32 %v5745_v31, %v5741_v29 }
  0xe5   : > { %v1082_v51 = vpop.permute.xlu0 %1081  ;;  %v1078_v9 = vpop.permute.xlu1 %1077 }
  0xe6   : > { %7666 = vst [vmem:[#allocation9_spill] sm:$0xff] %v5765_v48  ;;  %v1169_v53 = vadd.f32 %v5758_v37, %v1146_v49  ;;  %v1170_v54 = vadd.f32 %v5758_v37, %v1147_v50  ;;  %v1133_v55 = vmul.f32 %v5747_v32, %v1082_v51  ;;  %1313 = vperm.xlu0 %5288, %v5765_v48  }
  0xe7   : > { %1201 = vperm.xlu1 %5290, %v5765_v48   ;;  %v1045_v49 = vmul.f32 %v5745_v31, %v5718_v10 }
  0xe8   : > { %v5773_v56 = vmax.f32 %v1169_v53, 0.0  ;;  %v5775_v57 = vmax.f32 %v1170_v54, 0.0  ;;  %v1149_v58 = vadd.f32 %v1133_v55, %v1049_v52  ;;  %v1132_v52 = vmul.f32 %v5747_v32, %v1078_v9 }
  0xe9   : > { %v1090_v59 = vpop.permute.xlu0 %1089  ;;  %v1086_v21 = vpop.permute.xlu1 %1085  ;;  %v1145_v33 = vadd.f32 %v1129_v24, %v1045_v49  ;;  %v1048_v53 = vmul.f32 %v5745_v31, %v5723_v16 }
  0xea   : > { %7667 = vst [vmem:[#allocation10_spill] sm:$0xff] %v5773_v56  ;;  %7668 = vst [vmem:[#allocation11_spill] sm:$0xff] %v5775_v57  ;;  %v1172_v61 = vadd.f32 %v5758_v37, %v1149_v58  ;;  %v1135_v62 = vmul.f32 %v5747_v32, %v1090_v59  ;;  %1325 = vperm.xlu0 %5288, %v5775_v57   ;;  %v1134_v58 = vmul.f32 %v5747_v32, %v1086_v21 }
  0xeb   : > { %1211 = vperm.xlu1 %5290, %v5773_v56   ;;  %v1168_v10 = vadd.f32 %v5758_v37, %v1145_v33  ;;  %v1148_v55 = vadd.f32 %v1132_v52, %v1048_v53 }
  0xec   : > { %v5782_v63 = vmax.f32 %v1172_v61, 0.0  ;;  %v1151_v0 = vadd.f32 %v1135_v62, %v1051_v60  ;;  %v1050_v60 = vmul.f32 %v5745_v31, %v5725_v18 }
  0xed   : > { %v1098_v1 = vpop.permute.xlu0 %1097  ;;  %v1094_v50 = vpop.permute.xlu1 %1093  ;;  %v5840_v61 = vmax.f32 %v1168_v10, 0.0  ;;  %v1171_v16 = vadd.f32 %v5758_v37, %v1148_v55 }
  0xee   : > { %7669 = vst [vmem:[#allocation12_spill] sm:$0xff] %v5782_v63  ;;  %v1174_v3 = vadd.f32 %v5758_v37, %v1151_v0  ;;  %v1137_v5 = vmul.f32 %v5747_v32, %v1098_v1  ;;  %1333 = vperm.xlu0 %5288, %v5782_v63   ;;  %v1150_v62 = vadd.f32 %v1134_v58, %v1050_v60  ;;  %v5409_v1 = vmov 2  }
  0xef   : > { %1216 = vperm.xlu1 %5290, %v5775_v57   ;;  %7675 = vst [vmem:[#allocation18_spill] sm:$0xff] %v5840_v61  ;;  %v1136_v0 = vmul.f32 %v5747_v32, %v1094_v50  ;;  %v5848_v18 = vmax.f32 %v1171_v16, 0.0 }
  0xf0   : > { %v5791_v11 = vmax.f32 %v1174_v3, 0.0  ;;  %v1153_v12 = vadd.f32 %v1137_v5, %v1053_v2  ;;  %v1052_v2 = vmul.f32 %v5745_v31, %v5727_v20  ;;  %v1173_v5 = vadd.f32 %v5758_v37, %v1150_v62 }
  0xf1   : > { %v1106_v13 = vpop.permute.xlu0 %1105  ;;  %v1102_v59 = vpop.permute.xlu1 %1101  ;;  %7676 = vst [vmem:[#allocation19_spill] sm:$0xff] %v5848_v18 }
  0xf2   : > { %7670 = vst [vmem:[#allocation13_spill] sm:$0xff] %v5791_v11  ;;  %v1176_v15 = vadd.f32 %v5758_v37, %v1153_v12  ;;  %v1139_v17 = vmul.f32 %v5747_v32, %v1106_v13  ;;  %1341 = vperm.xlu0 %5288, %v5791_v11   ;;  %v1152_v6 = vadd.f32 %v1136_v0, %v1052_v2  ;;  %v5857_v20 = vmax.f32 %v1173_v5, 0.0 }
  0xf3   : > { %1226 = vperm.xlu1 %5290, %v5782_v63   ;;  %v1138_v7 = vmul.f32 %v5747_v32, %v1102_v59 }
  0xf4   : > { %v5800_v27 = vmax.f32 %v1176_v15, 0.0  ;;  %v1155_v28 = vadd.f32 %v1139_v17, %v1055_v14  ;;  %7677 = vst [vmem:[#allocation20_spill] sm:$0xff] %v5857_v20  ;;  %v1175_v9 = vadd.f32 %v5758_v37, %v1152_v6  ;;  %v1056_v15 = vmul.f32 %v5745_v31, %v5736_v25 }
  0xf5   : > { %v1114_v34 = vpop.permute.xlu0 %1113  ;;  %v1110_v3 = vpop.permute.xlu1 %1109  ;;  %v1154_v12 = vadd.f32 %v1138_v7, %v1054_v8  ;;  %v5410_v31 = vmov 3  }
  0xf6   : > { %7671 = vst [vmem:[#allocation14_spill] sm:$0xff] %v5800_v27  ;;  %v1178_v39 = vadd.f32 %v5758_v37, %v1155_v28  ;;  %v1141_v40 = vmul.f32 %v5747_v32, %v1114_v34  ;;  %1349 = vperm.xlu0 %5288, %v5800_v27   ;;  %v1140_v13 = vmul.f32 %v5747_v32, %v1110_v3 }
  0xf7   : > { %1236 = vperm.xlu1 %5290, %v5791_v11   ;;  %v1177_v22 = vadd.f32 %v5758_v37, %v1154_v12 }
  0xf8   : > { %v5808_v41 = vmax.f32 %v1178_v39, 0.0  ;;  %v1157_v42 = vadd.f32 %v1141_v40, %v1057_v36  ;;  %v1156_v17 = vadd.f32 %v1140_v13, %v1056_v15  ;;  %v5412_v36 = vmov 5  }
  0xf9   : > { %v1122_v44 = vpop.permute.xlu0 %1121  ;;  %v1118_v14 = vpop.permute.xlu1 %1117  ;;  %v5873_v28 = vmax.f32 %v1177_v22, 0.0 }
  0xfa   : > { %7672 = vst [vmem:[#allocation15_spill] sm:$0xff] %v5808_v41  ;;  %v1180_v46 = vadd.f32 %v5758_v37, %v1157_v42  ;;  %v1143_v47 = vmul.f32 %v5747_v32, %v1122_v44  ;;  %1357 = vperm.xlu0 %5288, %v5808_v41   ;;  %v1142_v19 = vmul.f32 %v5747_v32, %v1118_v14 }
  0xfb   : > { %1246 = vperm.xlu1 %5290, %v5800_v27   ;;  %v1179_v25 = vadd.f32 %v5758_v37, %v1156_v17 }
  0xfc   : > { %v5824_v43 = vmax.f32 %v1180_v46, 0.0  ;;  %v1159_v51 = vadd.f32 %v1143_v47, %v1059_v45  ;;  %v1158_v34 = vadd.f32 %v1142_v19, %v1058_v26 }
  0xfd   : > { %v5878_v35 = vmax.f32 %v1179_v25, 0.0 }
  0xfe   : > { %7673 = vst [vmem:[#allocation16_spill] sm:$0xff] %v5824_v43  ;;  %v1182_v29 = vadd.f32 %v5758_v37, %v1159_v51  ;;  %1365 = vperm.xlu0 %5288, %v5824_v43   ;;  %v1181_v32 = vadd.f32 %v5758_v37, %v1158_v34  ;;  %v5411_v37 = vmov 4  }
  0xff   : > { %1256 = vperm.xlu1 %5290, %v5808_v41  }
 0x100   : > { %v5832_v54 = vmax.f32 %v1182_v29, 0.0  ;;  %v5883_v30 = vmax.f32 %v1181_v32, 0.0 }
 0x102   : > { %7674 = vst [vmem:[#allocation17_spill] sm:$0xff] %v5832_v54  ;;  %1373 = vperm.xlu0 %5288, %v5832_v54   ;;  %7678 = vst [vmem:[#allocation21_spill] sm:$0xff] %v5883_v30 }
 0x103   : > { %1266 = vperm.xlu1 %5290, %v5824_v43  }
 0x106   : > { %5293 = vset.pattern.permute.xlu0 %v5409_v1 }
 0x107   : > { %1276 = vperm.xlu1 %5290, %v5832_v54   ;;  %1478 = vperm.xlu0 %5293, %v5840_v61  }
 0x10b   : > { %5291 = vset.pattern.permute.xlu1 %v5407_v38  ;;  %1490 = vperm.xlu0 %5293, %v5848_v18   ;;  %v5865_v38 = vmax.f32 %v1175_v9, 0.0 }
 0x10c   : > { %1317 = vperm.xlu1 %5291, %v5840_v61  }
 0x10f   : > { %1498 = vperm.xlu0 %5293, %v5857_v20  }
 0x110   : > { %1321 = vperm.xlu1 %5291, %v5773_v56  }
 0x113   : > { %1506 = vperm.xlu0 %5293, %v5865_v38  }
 0x114   : > { %1329 = vperm.xlu1 %5291, %v5848_v18  }
 0x117   : > { %1514 = vperm.xlu0 %5293, %v5873_v28  }
 0x118   : > { %1337 = vperm.xlu1 %5291, %v5857_v20  }
 0x11b   : > { %1522 = vperm.xlu0 %5293, %v5878_v35  }
 0x11c   : > { %1345 = vperm.xlu1 %5291, %v5865_v38  }
 0x11f   : > { %1530 = vperm.xlu0 %5293, %v5883_v30  }
 0x120   : > { %1353 = vperm.xlu1 %5291, %v5873_v28  }
 0x123   : > { %5294 = vset.pattern.permute.xlu0 %v5410_v31 }
 0x124   : > { %1361 = vperm.xlu1 %5291, %v5878_v35   ;;  %1635 = vperm.xlu0 %5294, %v5765_v48  }
 0x128   : > { %1369 = vperm.xlu1 %5291, %v5883_v30   ;;  %1647 = vperm.xlu0 %5294, %v5775_v57  }
 0x12c   : > { %5292 = vset.pattern.permute.xlu1 %v5409_v1  ;;  %1655 = vperm.xlu0 %5294, %v5782_v63  }
 0x12d   : > { %1474 = vperm.xlu1 %5292, %v5765_v48  }
 0x130   : > { %1663 = vperm.xlu0 %5294, %v5791_v11  }
 0x131   : > { %1482 = vperm.xlu1 %5292, %v5773_v56  }
 0x134   : > { %1671 = vperm.xlu0 %5294, %v5800_v27  }
 0x135   : > { %1486 = vperm.xlu1 %5292, %v5775_v57  }
 0x138   : > { %1679 = vperm.xlu0 %5294, %v5808_v41  }
 0x139   : > { %1494 = vperm.xlu1 %5292, %v5782_v63  }
 0x13c   : > { %1687 = vperm.xlu0 %5294, %v5824_v43  }
 0x13d   : > { %1502 = vperm.xlu1 %5292, %v5791_v11  }
 0x140   : > { %1695 = vperm.xlu0 %5294, %v5832_v54  }
 0x141   : > { %1510 = vperm.xlu1 %5292, %v5800_v27  }
 0x144   : > { %5297 = vset.pattern.permute.xlu0 %v5411_v37 }
 0x145   : > { %1518 = vperm.xlu1 %5292, %v5808_v41   ;;  %1800 = vperm.xlu0 %5297, %v5840_v61  }
 0x149   : > { %1526 = vperm.xlu1 %5292, %v5824_v43   ;;  %1812 = vperm.xlu0 %5297, %v5848_v18  }
 0x14d   : > { %1534 = vperm.xlu1 %5292, %v5832_v54   ;;  %1820 = vperm.xlu0 %5297, %v5857_v20  }
 0x151   : > { %5295 = vset.pattern.permute.xlu1 %v5410_v31  ;;  %1828 = vperm.xlu0 %5297, %v5865_v38  }
 0x152   : > { %1639 = vperm.xlu1 %5295, %v5840_v61  }
 0x155   : > { %1836 = vperm.xlu0 %5297, %v5873_v28  }
 0x156   : > { %1643 = vperm.xlu1 %5295, %v5773_v56  }
 0x159   : > { %1844 = vperm.xlu0 %5297, %v5878_v35  }
 0x15a   : > { %1651 = vperm.xlu1 %5295, %v5848_v18  }
 0x15d   : > { %1852 = vperm.xlu0 %5297, %v5883_v30  }
 0x15e   : > { %1659 = vperm.xlu1 %5295, %v5857_v20  }
 0x161   : > { %5298 = vset.pattern.permute.xlu0 %v5412_v36 }
 0x162   : > { %1667 = vperm.xlu1 %5295, %v5865_v38   ;;  %1892 = vperm.xlu0 %5298, %v5765_v48  }
 0x165   : > { %v5920_v21 = vpop.permute.xlu0 %1313 }
 0x166   : > { %v1202_v39 = vpop.permute.xlu1 %1201  ;;  %1675 = vperm.xlu1 %5295, %v5873_v28   ;;  %1904 = vperm.xlu0 %5298, %v5775_v57  }
 0x169   : > { %v5924_v40 = vpop.permute.xlu0 %1325 }
 0x16a   : > { %v1212_v42 = vpop.permute.xlu1 %1211  ;;  %1683 = vperm.xlu1 %5295, %v5878_v35   ;;  %1912 = vperm.xlu0 %5298, %v5782_v63  }
 0x16d   : > { %v5928_v24 = vpop.permute.xlu0 %1333 }
 0x16e   : > { %v1217_v44 = vpop.permute.xlu1 %1216  ;;  %1691 = vperm.xlu1 %5295, %v5883_v30   ;;  %1920 = vperm.xlu0 %5298, %v5791_v11  }
 0x171   : > { %v5932_v45 = vpop.permute.xlu0 %1341 }
 0x172   : > { %v1227_v46 = vpop.permute.xlu1 %1226  ;;  %5296 = vset.pattern.permute.xlu1 %v5411_v37 }
 0x173   : > { %1796 = vperm.xlu1 %5296, %v5765_v48  }
 0x175   : > { %v5935_v47 = vpop.permute.xlu0 %1349 }
 0x176   : > { %v1237_v49 = vpop.permute.xlu1 %1236  ;;  %v5937_v50 = vpop.f32.mrb[0].mxu0 }
 0x177   : > { %1804 = vperm.xlu1 %5296, %v5773_v56   ;;  %v5940_v51 = vpop.f32.mrb[1].mxu0 }
 0x178   : > { %5017 = vmatprep.mubr.msk.f32.mxu1 %vm627_vm1, %v5940_v51  ;;  %v1279_v33 = vmul.f32 %v1202_v39, %v5940_v51 }
 0x179   : > { %v5945_v52 = vpop.permute.xlu0 %1357  ;;  %5018 = vmatmul.mubr.msk.f32.vlgmr.msra.gmra.mrb[0].mxu1 %vm627_vm1, %v5937_v50 }
 0x17a   : > { %v1247_v29 = vpop.permute.xlu1 %1246  ;;  %v5949_v53 = vpop.f32.mrb[2].mxu0  ;;  %1296 = vst.msk [vmem:[#allocation4] sm:$0xff] %vm627_vm1, %v1279_v33 }
 0x17b   : > { %1808 = vperm.xlu1 %5296, %v5775_v57   ;;  %v5953_v10 = vpop.f32.mrb[3].mxu0  ;;  %v1282_v55 = vmul.f32 %v5949_v53, %v1217_v44 }
 0x17c   : > { %5020 = vmatprep.mubr.msk.f32.mxu1 %vm627_vm1, %v5953_v10  ;;  %v1281_v58 = vmul.f32 %v1212_v42, %v5953_v10 }
 0x17d   : > { %v5959_v59 = vpop.permute.xlu0 %1365  ;;  %5021 = vmatmul.mubr.msk.f32.gmra.mrb[2].mxu1 %vm627_vm1, %v5949_v53  ;;  %1299 = vst.msk [vmem:[#allocation4 + $0x60] sm:$0xff] %vm627_vm1, %v1282_v55 }
 0x17e   : > { %v1257_v60 = vpop.permute.xlu1 %1256  ;;  %v5964_v16 = vpop.f32.mrb[4].mxu0  ;;  %1298 = vst.msk [vmem:[#allocation4 + $0x40] sm:$0xff] %vm627_vm1, %v1281_v58 }
 0x17f   : > { %1816 = vperm.xlu1 %5296, %v5782_v63   ;;  %v5968_v62 = vpop.f32.mrb[5].mxu0  ;;  %v1284_v0 = vmul.f32 %v5964_v16, %v1227_v46 }
 0x180   : > { %5023 = vmatprep.mubr.msk.f32.mxu1 %vm627_vm1, %v5968_v62 }
 0x181   : > { %v5973_v1 = vpop.permute.xlu0 %1373  ;;  %5024 = vmatmul.mubr.msk.f32.gmra.mrb[4].mxu1 %vm627_vm1, %v5964_v16  ;;  %1301 = vst.msk [vmem:[#allocation4 + $0xa0] sm:$0xff] %vm627_vm1, %v1284_v0 }
 0x182   : > { %v1267_v2 = vpop.permute.xlu1 %1266  ;;  %v5978_v3 = vpop.f32.mrb[6].mxu0 }
 0x183   : > { %1824 = vperm.xlu1 %5296, %v5791_v11   ;;  %v5981_v5 = vpop.f32.mrb[7].mxu0  ;;  %v1286_v6 = vmul.f32 %v5978_v3, %v1237_v49 }
 0x184   : > { %5026 = vmatprep.mubr.msk.f32.mxu1 %vm627_vm1, %v5981_v5 }
 0x185   : > { %5027 = vmatmul.mubr.msk.f32.gmra.mrb[6].mxu1 %vm627_vm1, %v5978_v3  ;;  %1303 = vst.msk [vmem:[#allocation4 + $0xe0] sm:$0xff] %vm627_vm1, %v1286_v6 }
 0x186   : > { %v1277_v7 = vpop.permute.xlu1 %1276  ;;  %v1479_v8 = vpop.permute.xlu0 %1478 }
 0x187   : > { %1832 = vperm.xlu1 %5296, %v5800_v27   ;;  %v5990_v9 = vpop.f32.mrb[8].mxu0 }
 0x188   : > { %v5992_v12 = vpop.f32.mrb[9].mxu0  ;;  %v1288_v13 = vmul.f32 %v5990_v9, %v1247_v29 }
 0x189   : > { %5029 = vmatprep.mubr.msk.f32.mxu1 %vm627_vm1, %v5992_v12 }
 0x18a   : > { %5030 = vmatmul.mubr.msk.f32.gmra.mrb[8].mxu1 %vm627_vm1, %v5990_v9  ;;  %v5999_v14 = vpop.permute.xlu0 %1490  ;;  %v6001_v15 = vpop.f32.mrb[10].mxu0  ;;  %1305 = vst.msk [vmem:[#allocation4 + $0x120] sm:$0xff] %vm627_vm1, %v1288_v13 }
 0x18b   : > { %1840 = vperm.xlu1 %5296, %v5808_v41   ;;  %v1318_v22 = vpop.permute.xlu1 %1317  ;;  %v6005_v17 = vpop.f32.mrb[11].mxu0  ;;  %v1290_v19 = vmul.f32 %v6001_v15, %v1257_v60 }
 0x18c   : > { %v1377_v26 = vmul.f32 %v5937_v50, %v1318_v22  ;;  %5032 = vmatprep.mubr.msk.f32.mxu1 %vm627_vm1, %v6005_v17  ;;  %v1376_v22 = vmul.f32 %v5920_v21, %v5940_v51 }
 0x18d   : > { %1307 = vst.msk [vmem:[#allocation4 + $0x160] sm:$0xff] %vm627_vm1, %v1290_v19 }
 0x18e   : > { %1410 = vrot.lane.b32.xlu0 %v1377_v26, %s5413_s14  ;;  %5033 = vmatmul.mubr.msk.f32.gmra.mrb[10].mxu1 %vm627_vm1, %v6001_v15  ;;  %v6015_v25 = vpop.permute.xlu0 %1498  ;;  %v6017_v34 = vpop.f32.mrb[12].mxu0 }
 0x18f   : > { %7679 = vst [vmem:[#allocation22_spill] sm:$0xff] %v6017_v34  ;;  %1848 = vperm.xlu1 %5296, %v5824_v43   ;;  %v1322_v32 = vpop.permute.xlu1 %1321  ;;  %v6020_v31 = vpop.f32.mrb[13].mxu0  ;;  %v1292_v37 = vmul.f32 %v6017_v34, %v1267_v2 }
 0x190   : > { %7680 = vst [vmem:[#allocation23_spill] sm:$0xff] %v6020_v31  ;;  %5035 = vmatprep.mubr.msk.f32.mxu1 %vm627_vm1, %v6020_v31 }
 0x191   : > { %1309 = vst.msk [vmem:[#allocation4 + $0x1a0] sm:$0xff] %vm627_vm1, %v1292_v37 }
 0x192   : > { %5036 = vmatmul.mubr.msk.f32.gmra.mrb[12].mxu1 %vm627_vm1, %v6017_v34  ;;  %v6028_v39 = vpop.permute.xlu0 %1506  ;;  %v6030_v42 = vpop.f32.mrb[14].mxu0 }
 0x193   : > { %7681 = vst [vmem:[#allocation24_spill] sm:$0xff] %v6030_v42  ;;  %1856 = vperm.xlu1 %5296, %v5832_v54   ;;  %v6033_v44 = vpop.permute.xlu1 %1329  ;;  %v6035_v46 = vpop.f32.mrb[15].mxu0  ;;  %v1294_v49 = vmul.f32 %v6030_v42, %v1277_v7 }
 0x194   : > { %7682 = vst [vmem:[#allocation25_spill] sm:$0xff] %v6035_v46  ;;  %5038 = vmatprep.mubr.msk.f32.mxu1 %vm627_vm1, %v6035_v46 }
 0x195   : > { %1311 = vst.msk [vmem:[#allocation4 + $0x1e0] sm:$0xff] %vm627_vm1, %v1294_v49 }
 0x196   : > { %5039 = vmatmul.mubr.msk.f32.gmra.mrb[14].mxu1 %vm627_vm1, %v6030_v42  ;;  %v6043_v33 = vpop.permute.xlu0 %1514 }
 0x197   : > { %5299 = vset.pattern.permute.xlu1 %v5412_v36  ;;  %v6046_v29 = vpop.permute.xlu1 %1337  ;;  %v1538_v36 = vmul.f32 %v5937_v50, %v1479_v8 }
 0x198   : > { %1896 = vperm.xlu1 %5299, %v5840_v61  }
 0x19a   : > { %v6049_v55 = vpop.permute.xlu0 %1522 }
 0x19b   : > { %v6051_v58 = vpop.permute.xlu1 %1345 }
 0x19c   : > { %1900 = vperm.xlu1 %5299, %v5773_v56  }
 0x19e   : > { %v6054_v60 = vpop.permute.xlu0 %1530 }
 0x19f   : > { %v6056_v0 = vpop.permute.xlu1 %1353 }
 0x1a0   : > { %1908 = vperm.xlu1 %5299, %v5848_v18  }
 0x1a3   : > { %v6059_v2 = vpop.permute.xlu1 %1361  ;;  %v1636_v6 = vpop.permute.xlu0 %1635 }
 0x1a4   : > { %1916 = vperm.xlu1 %5299, %v5857_v20   ;;  %v1698_v37 = vmul.f32 %v1636_v6, %v5940_v51 }
 0x1a7   : > { %v6063_v7 = vpop.permute.xlu1 %1369  ;;  %v1648_v13 = vpop.permute.xlu0 %1647 }
 0x1a8   : > { %1571 = vrot.lane.b32.xlu1 %v1538_v36, %s5414_s29 }
 0x1ab   : > { %v6068_v19 = vpop.permute.xlu0 %1655 }
 0x1ac   : > { %v1475_v26 = vpop.permute.xlu1 %1474  ;;  %1408 = vrot.lane.b32.xlu1 %v1376_v22, %s5413_s14  ;;  %v1378_v22 = vmul.f32 %v1322_v32, %v5953_v10 }
 0x1ad   : > { %v1537_v30 = vmul.f32 %v1475_v26, %v5940_v51 }
 0x1af   : > { %v6072_v49 = vpop.permute.xlu0 %1663 }
 0x1b0   : > { %v1483_v4 = vpop.permute.xlu1 %1482  ;;  %1730 = vrot.lane.b32.xlu1 %v1698_v37, %s5415_s15 }
 0x1b3   : > { %v6075_v8 = vpop.permute.xlu0 %1671 }
 0x1b4   : > { %v1487_v23 = vpop.permute.xlu1 %1486 }
 0x1b5   : > { %v1540_v36 = vmul.f32 %v5949_v53, %v1487_v23 }
 0x1b7   : > { %1575 = vrot.lane.b32.xlu1 %v1540_v36, %s5414_s29  ;;  %v6079_v21 = vpop.permute.xlu0 %1679 }
 0x1b8   : > { %v1495_v20 = vpop.permute.xlu1 %1494 }
 0x1bb   : > { %1412 = vrot.lane.b32.xlu1 %v1378_v22, %s5413_s14  ;;  %v6083_v6 = vpop.permute.xlu0 %1687 }
 0x1bc   : > { %v1503_v11 = vpop.permute.xlu1 %1502 }
 0x1bf   : > { %v6085_v18 = vpop.permute.xlu0 %1695 }
 0x1c0   : > { %v6087_v37 = vpop.permute.xlu1 %1510 }
 0x1c4   : > { %v6089_v63 = vpop.permute.xlu1 %1518  ;;  %v1801_v61 = vpop.permute.xlu0 %1800 }
 0x1c5   : > { %v1860_v23 = vmul.f32 %v5937_v50, %v1801_v61 }
 0x1c7   : > { %1876 = vst.msk [vmem:[#allocation4 + $0x28] sm:$0xff] %vm627_vm1, %v1860_v23 }
 0x1c8   : > { %v6093_v36 = vpop.permute.xlu1 %1526  ;;  %v1813_v57 = vpop.permute.xlu0 %1812 }
 0x1c9   : > { %v1863_v32 = vmul.f32 %v1813_v57, %v5968_v62 }
 0x1cb   : > { %1879 = vst.msk [vmem:[#allocation4 + $0x88] sm:$0xff] %vm627_vm1, %v1863_v32 }
 0x1cc   : > { %v6097_v22 = vpop.permute.xlu1 %1534  ;;  %v1821_v56 = vpop.permute.xlu0 %1820 }
 0x1cd   : > { %v1865_v48 = vmul.f32 %v1821_v56, %v5981_v5 }
 0x1cf   : > { %1881 = vst.msk [vmem:[#allocation4 + $0xc8] sm:$0xff] %vm627_vm1, %v1865_v48 }
 0x1d0   : > { %v1829_v54 = vpop.permute.xlu0 %1828 }
 0x1d1   : > { %v1640_v43 = vpop.permute.xlu1 %1639  ;;  %v1867_v61 = vmul.f32 %v1829_v54, %v5992_v12 }
 0x1d2   : > { %v1699_v23 = vmul.f32 %v5937_v50, %v1640_v43 }
 0x1d3   : > { %1883 = vst.msk [vmem:[#allocation4 + $0x108] sm:$0xff] %vm627_vm1, %v1867_v61  ;;  %v1542_v61 = vmul.f32 %v5964_v16, %v1495_v20 }
 0x1d4   : > { %1732 = vrot.lane.b32.xlu0 %v1699_v23, %s5415_s15  ;;  %v1837_v57 = vpop.permute.xlu0 %1836  ;;  %v1379_v23 = vmul.f32 %v5949_v53, %v5924_v40  ;;  %v1539_v40 = vmul.f32 %v1483_v4, %v5953_v10  ;;  %v1382_v4 = vmul.f32 %v6046_v29, %v5981_v5  ;;  %v1546_v29 = vmul.f32 %v5990_v9, %v6087_v37 }
 0x1d5   : > { %v1644_v41 = vpop.permute.xlu1 %1643  ;;  %v1869_v32 = vmul.f32 %v1837_v57, %v6005_v17  ;;  %v1380_v57 = vmul.f32 %v6033_v44, %v5968_v62  ;;  %v1544_v44 = vmul.f32 %v5978_v3, %v1503_v11 }
 0x1d6   : > { %v1700_v56 = vmul.f32 %v1644_v41, %v5953_v10 }
 0x1d7   : > { %1885 = vst.msk [vmem:[#allocation4 + $0x148] sm:$0xff] %vm627_vm1, %v1869_v32  ;;  %v1701_v32 = vmul.f32 %v5949_v53, %v1648_v13  ;;  %v1381_v13 = vmul.f32 %v5964_v16, %v5928_v24  ;;  %v1541_v24 = vmul.f32 %v5999_v14, %v5968_v62  ;;  %v1384_v14 = vmul.f32 %v6051_v58, %v5992_v12 }
 0x1d8   : > { %1569 = vrot.lane.b32.xlu0 %v1537_v30, %s5414_s29  ;;  %1734 = vrot.lane.b32.xlu1 %v1700_v56, %s5415_s15  ;;  %v1845_v48 = vpop.permute.xlu0 %1844 }
 0x1d9   : > { %v1652_v43 = vpop.permute.xlu1 %1651  ;;  %v1871_v54 = vmul.f32 %v1845_v48, %v6020_v31 }
 0x1da   : > { %v1702_v56 = vmul.f32 %v1652_v43, %v5968_v62  ;;  %v1703_v43 = vmul.f32 %v5964_v16, %v6068_v19  ;;  %v1383_v19 = vmul.f32 %v5978_v3, %v5932_v45  ;;  %v1543_v45 = vmul.f32 %v6015_v25, %v5981_v5 }
 0x1db   : > { %1887 = vst.msk [vmem:[#allocation4 + $0x188] sm:$0xff] %vm627_vm1, %v1871_v54 }
 0x1dc   : > { %1414 = vrot.lane.b32.xlu0 %v1379_v23, %s5413_s14  ;;  %1579 = vrot.lane.b32.xlu1 %v1542_v61, %s5414_s29  ;;  %v1853_v41 = vpop.permute.xlu0 %1852 }
 0x1dd   : > { %v1660_v26 = vpop.permute.xlu1 %1659  ;;  %v1873_v30 = vmul.f32 %v1853_v41, %v6035_v46 }
 0x1de   : > { %v1704_v61 = vmul.f32 %v1660_v26, %v5981_v5  ;;  %v1705_v26 = vmul.f32 %v5978_v3, %v6072_v49  ;;  %v1548_v49 = vmul.f32 %v6001_v15, %v6089_v63 }
 0x1df   : > { %1889 = vst.msk [vmem:[#allocation4 + $0x1c8] sm:$0xff] %vm627_vm1, %v1873_v30 }
 0x1e0   : > { %1736 = vrot.lane.b32.xlu0 %v1701_v32, %s5415_s15  ;;  %1416 = vrot.lane.b32.xlu1 %v1380_v57, %s5413_s14 }
 0x1e1   : > { %v1668_v20 = vpop.permute.xlu1 %1667 }
 0x1e2   : > { %v1706_v57 = vmul.f32 %v1668_v20, %v5992_v12  ;;  %v1386_v20 = vmul.f32 %v6056_v0, %v6005_v17 }
 0x1e4   : > { %1573 = vrot.lane.b32.xlu0 %v1539_v40, %s5414_s29  ;;  %1738 = vrot.lane.b32.xlu1 %v1702_v56, %s5415_s15  ;;  %v1385_v56 = vmul.f32 %v5990_v9, %v5935_v47  ;;  %v1545_v47 = vmul.f32 %v6028_v39, %v5992_v12 }
 0x1e5   : > { %v1676_v48 = vpop.permute.xlu1 %1675 }
 0x1e8   : > { %1418 = vrot.lane.b32.xlu0 %v1381_v13, %s5413_s14  ;;  %1583 = vrot.lane.b32.xlu1 %v1544_v44, %s5414_s29  ;;  %v1707_v44 = vmul.f32 %v5990_v9, %v6075_v8  ;;  %v1550_v8 = vmul.f32 %v6017_v34, %v6093_v36 }
 0x1e9   : > { %v6134_v54 = vpop.permute.xlu1 %1683 }
 0x1ec   : > { %1740 = vrot.lane.b32.xlu0 %v1703_v43, %s5415_s15  ;;  %1420 = vrot.lane.b32.xlu1 %v1382_v4, %s5413_s14  ;;  %v1708_v4 = vmul.f32 %v1676_v48, %v6005_v17  ;;  %v1388_v48 = vmul.f32 %v6059_v2, %v6020_v31 }
 0x1ed   : > { %v6142_v11 = vpop.permute.xlu1 %1691 }
 0x1f0   : > { %1577 = vrot.lane.b32.xlu0 %v1541_v24, %s5414_s29  ;;  %1742 = vrot.lane.b32.xlu1 %v1704_v61, %s5415_s15  ;;  %v1387_v61 = vmul.f32 %v6001_v15, %v5945_v52  ;;  %v1547_v52 = vmul.f32 %v6043_v33, %v6005_v17  ;;  %v1390_v33 = vmul.f32 %v6063_v7, %v6035_v46 }
 0x1f1   : > { %v1391_v7 = vmul.f32 %v6030_v42, %v5973_v1  ;;  %v1893_v1 = vpop.permute.xlu0 %1892 }
 0x1f2   : > { %v1797_v23 = vpop.permute.xlu1 %1796 }
 0x1f3   : > { %v1859_v41 = vmul.f32 %v1797_v23, %v5940_v51 }
 0x1f4   : > { %1422 = vrot.lane.b32.xlu0 %v1383_v19, %s5413_s14  ;;  %1587 = vrot.lane.b32.xlu1 %v1546_v29, %s5414_s29  ;;  %v1709_v29 = vmul.f32 %v6001_v15, %v6079_v21  ;;  %v1710_v19 = vmul.f32 %v6134_v54, %v6020_v31  ;;  %v1552_v21 = vmul.f32 %v6030_v42, %v6097_v22 }
 0x1f5   : > { %1875 = vst.msk [vmem:[#allocation4 + $0x8] sm:$0xff] %vm627_vm1, %v1859_v41  ;;  %v1711_v54 = vmul.f32 %v6017_v34, %v6083_v6  ;;  %v1549_v22 = vmul.f32 %v6049_v55, %v6020_v31 }
 0x1f6   : > { %v1805_v30 = vpop.permute.xlu1 %1804 }
 0x1f7   : > { %v1861_v37 = vmul.f32 %v1805_v30, %v5953_v10 }
 0x1f8   : > { %1744 = vrot.lane.b32.xlu0 %v1705_v26, %s5415_s15  ;;  %1424 = vrot.lane.b32.xlu1 %v1384_v14, %s5413_s14  ;;  %v1389_v14 = vmul.f32 %v6017_v34, %v5959_v59  ;;  %v1712_v59 = vmul.f32 %v6142_v11, %v6035_v46  ;;  %v1551_v11 = vmul.f32 %v6054_v60, %v6035_v46  ;;  %v5416_v60 = vmov 6  }
 0x1f9   : > { %1877 = vst.msk [vmem:[#allocation4 + $0x48] sm:$0xff] %vm627_vm1, %v1861_v37 }
 0x1fa   : > { %v1809_v32 = vpop.permute.xlu1 %1808 }
 0x1fb   : > { %v1862_v58 = vmul.f32 %v5949_v53, %v1809_v32 }
 0x1fc   : > { %1581 = vrot.lane.b32.xlu0 %v1543_v45, %s5414_s29  ;;  %1746 = vrot.lane.b32.xlu1 %v1706_v57, %s5415_s15  ;;  %v1713_v45 = vmul.f32 %v6030_v42, %v6085_v18  ;;  %v7684_v18 = vld [vmem:[#allocation21_spill] sm:$0xff] }
 0x1fd   : > { %1878 = vst.msk [vmem:[#allocation4 + $0x68] sm:$0xff] %vm627_vm1, %v1862_v58  ;;  %v1955_v58 = vmul.f32 %v1893_v1, %v5940_v51 }
 0x1fe   : > { %v1817_v40 = vpop.permute.xlu1 %1816 }
 0x1ff   : > { %v1864_v25 = vmul.f32 %v5964_v16, %v1817_v40 }
 0x200   : > { %1426 = vrot.lane.b32.xlu0 %v1385_v56, %s5413_s14  ;;  %1591 = vrot.lane.b32.xlu1 %v1548_v49, %s5414_s29  ;;  %v1905_v49 = vpop.permute.xlu0 %1904  ;;  %v7685_v56 = vld [vmem:[#allocation15_spill] sm:$0xff] }
 0x201   : > { %1880 = vst.msk [vmem:[#allocation4 + $0xa8] sm:$0xff] %vm627_vm1, %v1864_v25 }
 0x202   : > { %v1825_v13 = vpop.permute.xlu1 %1824 }
 0x203   : > { %v1866_v63 = vmul.f32 %v5978_v3, %v1825_v13  ;;  %v7686_v13 = vld [vmem:[#allocation16_spill] sm:$0xff] }
 0x204   : > { %1748 = vrot.lane.b32.xlu0 %v1707_v44, %s5415_s15  ;;  %1428 = vrot.lane.b32.xlu1 %v1386_v20, %s5413_s14  ;;  %v1913_v44 = vpop.permute.xlu0 %1912 }
 0x205   : > { %1882 = vst.msk [vmem:[#allocation4 + $0xe8] sm:$0xff] %vm627_vm1, %v1866_v63 }
 0x206   : > { %v1833_v43 = vpop.permute.xlu1 %1832 }
 0x207   : > { %v1868_v0 = vmul.f32 %v5990_v9, %v1833_v43 }
 0x208   : > { %1585 = vrot.lane.b32.xlu0 %v1545_v47, %s5414_s29  ;;  %1750 = vrot.lane.b32.xlu1 %v1708_v4, %s5415_s15  ;;  %v7687_v47 = vld [vmem:[#allocation17_spill] sm:$0xff]  ;;  %v1921_v4 = vpop.permute.xlu0 %1920 }
 0x209   : > { %1884 = vst.msk [vmem:[#allocation4 + $0x128] sm:$0xff] %vm627_vm1, %v1868_v0 }
 0x20a   : > { %v1841_v24 = vpop.permute.xlu1 %1840 }
 0x20b   : > { %v1870_v39 = vmul.f32 %v6001_v15, %v1841_v24 }
 0x20c   : > { %1430 = vrot.lane.b32.xlu0 %v1387_v61, %s5413_s14  ;;  %1595 = vrot.lane.b32.xlu1 %v1550_v8, %s5414_s29  ;;  %v1958_v8 = vmul.f32 %v5949_v53, %v1905_v49  ;;  %v6269_v24 = vpop.permute.xlu0 %1410  ;;  %v1960_v61 = vmul.f32 %v5964_v16, %v1913_v44 }
 0x20d   : > { %1886 = vst.msk [vmem:[#allocation4 + $0x168] sm:$0xff] %vm627_vm1, %v1870_v39  ;;  %7688 = vst [vmem:[#allocation21_spill] sm:$0xff] %v6269_v24 }
 0x20e   : > { %v1849_v23 = vpop.permute.xlu1 %1848 }
 0x20f   : > { %v1872_v36 = vmul.f32 %v6017_v34, %v1849_v23 }
 0x210   : > { %1752 = vrot.lane.b32.xlu0 %v1709_v29, %s5415_s15  ;;  %1432 = vrot.lane.b32.xlu1 %v1388_v48, %s5413_s14  ;;  %v1962_v48 = vmul.f32 %v5978_v3, %v1921_v4 }
 0x211   : > { %1888 = vst.msk [vmem:[#allocation4 + $0x1a8] sm:$0xff] %vm627_vm1, %v1872_v36 }
 0x212   : > { %v1857_v41 = vpop.permute.xlu1 %1856 }
 0x213   : > { %v1874_v2 = vmul.f32 %v6030_v42, %v1857_v41 }
 0x214   : > { %1589 = vrot.lane.b32.xlu0 %v1547_v52, %s5414_s29  ;;  %1754 = vrot.lane.b32.xlu1 %v1710_v19, %s5415_s15 }
 0x215   : > { %1890 = vst.msk [vmem:[#allocation4 + $0x1e8] sm:$0xff] %vm627_vm1, %v1874_v2 }
 0x217   : > { %v1897_v26 = vpop.permute.xlu1 %1896 }
 0x218   : > { %1434 = vrot.lane.b32.xlu0 %v1389_v14, %s5413_s14  ;;  %1599 = vrot.lane.b32.xlu1 %v1552_v21, %s5414_s29  ;;  %v1956_v43 = vmul.f32 %v5937_v50, %v1897_v26 }
 0x21b   : > { %v1901_v30 = vpop.permute.xlu1 %1900 }
 0x21c   : > { %1756 = vrot.lane.b32.xlu0 %v1711_v54, %s5415_s15  ;;  %1436 = vrot.lane.b32.xlu1 %v1390_v33, %s5413_s14  ;;  %v1957_v25 = vmul.f32 %v1901_v30, %v5953_v10 }
 0x21f   : > { %v1909_v37 = vpop.permute.xlu1 %1908 }
 0x220   : > { %1593 = vrot.lane.b32.xlu0 %v1549_v22, %s5414_s29  ;;  %1758 = vrot.lane.b32.xlu1 %v1712_v59, %s5415_s15  ;;  %v1959_v63 = vmul.f32 %v1909_v37, %v5968_v62 }
 0x223   : > { %v1917_v6 = vpop.permute.xlu1 %1916 }
 0x224   : > { %1438 = vrot.lane.b32.xlu0 %v1391_v7, %s5413_s14  ;;  %1924 = vperm.xlu1 %5299, %v5865_v38   ;;  %v1961_v0 = vmul.f32 %v1917_v6, %v5981_v5 }
 0x227   : > { %v6243_v55 = vpop.permute.xlu1 %1571 }
 0x228   : > { %7683 = vst [vmem:[#allocation26_spill] sm:$0xff] %v6243_v55  ;;  %1760 = vrot.lane.b32.xlu0 %v1713_v45, %s5415_s15  ;;  %1932 = vperm.xlu1 %5299, %v5873_v28  }
 0x22b   : > { %v1409_v57 = vpop.permute.xlu1 %1408 }
 0x22c   : > { %1457 = vst.msk [vmem:[#allocation4] sm:$0xff] %vm1456_vm3, %v1409_v57  ;;  %1597 = vrot.lane.b32.xlu0 %v1551_v11, %s5414_s29  ;;  %1940 = vperm.xlu1 %5299, %v5878_v35  }
 0x22f   : > { %v1731_v32 = vpop.permute.xlu1 %1730 }
 0x230   : > { %1928 = vperm.xlu0 %5298, %v5800_v27   ;;  %1948 = vperm.xlu1 %5299, %v7684_v18  }
 0x233   : > { %v1576_v40 = vpop.permute.xlu1 %1575 }
 0x234   : > { %1936 = vperm.xlu0 %5298, %v7685_v56   ;;  %1987 = vrot.lane.b32.xlu1 %v1955_v58, %s5413_s14 }
 0x235   : > { %5300 = vset.pattern.permute.xlu1 %v5416_v60 }
 0x237   : > { %v1413_v20 = vpop.permute.xlu1 %1412 }
 0x238   : > { %1459 = vst.msk [vmem:[#allocation4 + $0x40] sm:$0xff] %vm1456_vm3, %v1413_v20  ;;  %1944 = vperm.xlu0 %5298, %v7686_v13   ;;  %1991 = vrot.lane.b32.xlu1 %v1957_v25, %s5413_s14 }
 0x23c   : > { %1952 = vperm.xlu0 %5298, %v7687_v47   ;;  %1995 = vrot.lane.b32.xlu1 %v1959_v63, %s5413_s14 }
 0x240   : > { %1989 = vrot.lane.b32.xlu0 %v1956_v43, %s5413_s14  ;;  %1999 = vrot.lane.b32.xlu1 %v1961_v0, %s5413_s14 }
 0x241   : > { %5301 = vset.pattern.permute.xlu0 %v5416_v60 }
 0x244   : > { %1993 = vrot.lane.b32.xlu0 %v1958_v8, %s5413_s14 }
 0x246   : > { %v6273_v39 = vpop.permute.xlu0 %1732 }
 0x247   : > { %7689 = vst [vmem:[#allocation17_spill] sm:$0xff] %v6273_v39 }
 0x248   : > { %1997 = vrot.lane.b32.xlu0 %v1960_v61, %s5413_s14 }
 0x24a   : > { %v1570_v29 = vpop.permute.xlu0 %1569  ;;  %v1735_v23 = vpop.permute.xlu1 %1734 }
 0x24b   : > { %1618 = vst.msk [vmem:[#allocation4] sm:$0xff] %vm1617_vm4, %v1570_v29 }
 0x24c   : > { %1779 = vst.msk [vmem:[#allocation4] sm:$0xff] %vm1778_vm5, %v1731_v32  ;;  %2001 = vrot.lane.b32.xlu0 %v1962_v48, %s5413_s14  ;;  %v6280_v36 = vpop.f32.mrb[0].mxu1 }
 0x24d   : > { %7690 = vst [vmem:[#allocation27_spill] sm:$0xff] %v6280_v36  ;;  %v6282_v52 = vpop.f32.mrb[1].mxu1 }
 0x24e   : > { %v1415_v19 = vpop.permute.xlu0 %1414  ;;  %v1580_v41 = vpop.permute.xlu1 %1579 }
 0x24f   : > { %1460 = vst.msk [vmem:[#allocation4 + $0x60] sm:$0xff] %vm1456_vm3, %v1415_v19 }
 0x250   : > { %1621 = vst.msk [vmem:[#allocation4 + $0x60] sm:$0xff] %vm1617_vm4, %v1576_v40  ;;  %v6286_v2 = vpop.f32.mrb[2].mxu1 }
 0x251   : > { %7691 = vst [vmem:[#allocation28_spill] sm:$0xff] %v6286_v2  ;;  %v6288_v21 = vpop.f32.mrb[3].mxu1 }
 0x252   : > { %7692 = vst [vmem:[#allocation29_spill] sm:$0xff] %v6288_v21  ;;  %v1737_v14 = vpop.permute.xlu0 %1736  ;;  %v6290_v26 = vpop.permute.xlu1 %1416 }
 0x253   : > { %7693 = vst [vmem:[#allocation30_spill] sm:$0xff] %v6290_v26  ;;  %1782 = vst.msk [vmem:[#allocation4 + $0x60] sm:$0xff] %vm1778_vm5, %v1737_v14 }
 0x254   : > { %v6293_v33 = vpop.f32.mrb[4].mxu1 }
 0x255   : > { %7694 = vst [vmem:[#allocation31_spill] sm:$0xff] %v6293_v33  ;;  %v6295_v54 = vpop.f32.mrb[5].mxu1 }
 0x256   : > { %7695 = vst [vmem:[#allocation32_spill] sm:$0xff] %v6295_v54  ;;  %v1574_v30 = vpop.permute.xlu0 %1573  ;;  %v6297_v22 = vpop.permute.xlu1 %1738 }
 0x257   : > { %7696 = vst [vmem:[#allocation33_spill] sm:$0xff] %v6297_v22  ;;  %1620 = vst.msk [vmem:[#allocation4 + $0x40] sm:$0xff] %vm1617_vm4, %v1574_v30  ;;  %v7739_v22 = vmov 15  }
 0x258   : > { %1781 = vst.msk [vmem:[#allocation4 + $0x40] sm:$0xff] %vm1778_vm5, %v1735_v23  ;;  %v6301_v59 = vpop.f32.mrb[6].mxu1 }
 0x259   : > { %7697 = vst [vmem:[#allocation34_spill] sm:$0xff] %v6301_v59  ;;  %v6303_v37 = vpop.f32.mrb[7].mxu1  ;;  %v7730_v59 = vld [vmem:[#allocation20_spill] sm:$0xff] }
 0x25a   : > { %7698 = vst [vmem:[#allocation35_spill] sm:$0xff] %v6303_v37  ;;  %v1419_v7 = vpop.permute.xlu0 %1418  ;;  %v1584_v6 = vpop.permute.xlu1 %1583 }
 0x25b   : > { %1462 = vst.msk [vmem:[#allocation4 + $0xa0] sm:$0xff] %vm1456_vm3, %v1419_v7 }
 0x25c   : > { %1623 = vst.msk [vmem:[#allocation4 + $0xa0] sm:$0xff] %vm1617_vm4, %v1580_v41 }
 0x25d   : > { %v6307_v45 = vpop.f32.mrb[8].mxu1 }
 0x25e   : > { %7699 = vst [vmem:[#allocation36_spill] sm:$0xff] %v6307_v45  ;;  %v1741_v11 = vpop.permute.xlu0 %1740  ;;  %v6309_v57 = vpop.permute.xlu1 %1420 }
 0x25f   : > { %7700 = vst [vmem:[#allocation37_spill] sm:$0xff] %v6309_v57  ;;  %1784 = vst.msk [vmem:[#allocation4 + $0xa0] sm:$0xff] %vm1778_vm5, %v1741_v11  ;;  %v6312_v1 = vpop.f32.mrb[9].mxu1 }
 0x260   : > { %7701 = vst [vmem:[#allocation38_spill] sm:$0xff] %v6312_v1 }
 0x261   : > { %v6314_v32 = vpop.f32.mrb[10].mxu1 }
 0x262   : > { %7702 = vst [vmem:[#allocation39_spill] sm:$0xff] %v6314_v32  ;;  %v6316_v58 = vpop.permute.xlu0 %1577  ;;  %v6318_v49 = vpop.permute.xlu1 %1742 }
 0x263   : > { %7703 = vst [vmem:[#allocation40_spill] sm:$0xff] %v6316_v58  ;;  %7704 = vst [vmem:[#allocation41_spill] sm:$0xff] %v6318_v49  ;;  %v6320_v40 = vpop.f32.mrb[11].mxu1  ;;  %v7737_v49 = vmov 14  }
 0x264   : > { %7705 = vst [vmem:[#allocation42_spill] sm:$0xff] %v6320_v40 }
 0x265   : > { %v6322_v60 = vpop.f32.mrb[12].mxu1 }
 0x266   : > { %7706 = vst [vmem:[#allocation43_spill] sm:$0xff] %v6322_v60  ;;  %v1423_v25 = vpop.permute.xlu0 %1422  ;;  %v1588_v20 = vpop.permute.xlu1 %1587 }
 0x267   : > { %1464 = vst.msk [vmem:[#allocation4 + $0xe0] sm:$0xff] %vm1456_vm3, %v1423_v25  ;;  %v6325_v44 = vpop.f32.mrb[13].mxu1 }
 0x268   : > { %7707 = vst [vmem:[#allocation44_spill] sm:$0xff] %v6325_v44  ;;  %1625 = vst.msk [vmem:[#allocation4 + $0xe0] sm:$0xff] %vm1617_vm4, %v1584_v6 }
 0x269   : > { %v6328_v63 = vpop.f32.mrb[14].mxu1 }
 0x26a   : > { %7708 = vst [vmem:[#allocation45_spill] sm:$0xff] %v6328_v63  ;;  %v1745_v4 = vpop.permute.xlu0 %1744  ;;  %v6330_v43 = vpop.permute.xlu1 %1424 }
 0x26b   : > { %7709 = vst [vmem:[#allocation46_spill] sm:$0xff] %v6330_v43  ;;  %1786 = vst.msk [vmem:[#allocation4 + $0xe0] sm:$0xff] %vm1778_vm5, %v1745_v4  ;;  %v6333_v0 = vpop.f32.mrb[15].mxu1 }
 0x26c   : > { %7710 = vst [vmem:[#allocation47_spill] sm:$0xff] %v6333_v0 }
 0x26e   : > { %v6335_v8 = vpop.permute.xlu0 %1581  ;;  %v6337_v61 = vpop.permute.xlu1 %1746 }
 0x26f   : > { %7711 = vst [vmem:[#allocation48_spill] sm:$0xff] %v6335_v8  ;;  %7712 = vst [vmem:[#allocation49_spill] sm:$0xff] %v6337_v61 }
 0x272   : > { %v1427_v48 = vpop.permute.xlu0 %1426  ;;  %v1592_v29 = vpop.permute.xlu1 %1591 }
 0x273   : > { %1466 = vst.msk [vmem:[#allocation4 + $0x120] sm:$0xff] %vm1456_vm3, %v1427_v48 }
 0x274   : > { %1627 = vst.msk [vmem:[#allocation4 + $0x120] sm:$0xff] %vm1617_vm4, %v1588_v20 }
 0x276   : > { %v1749_v23 = vpop.permute.xlu0 %1748  ;;  %v6341_v19 = vpop.permute.xlu1 %1428 }
 0x277   : > { %7713 = vst [vmem:[#allocation50_spill] sm:$0xff] %v6341_v19  ;;  %1788 = vst.msk [vmem:[#allocation4 + $0x120] sm:$0xff] %vm1778_vm5, %v1749_v23 }
 0x27a   : > { %v6344_v41 = vpop.permute.xlu0 %1585  ;;  %v6346_v14 = vpop.permute.xlu1 %1750 }
 0x27b   : > { %7714 = vst [vmem:[#allocation51_spill] sm:$0xff] %v6344_v41  ;;  %7715 = vst [vmem:[#allocation52_spill] sm:$0xff] %v6346_v14  ;;  %v7735_v41 = vmov 9  }
 0x27e   : > { %v1431_v30 = vpop.permute.xlu0 %1430  ;;  %v1596_v7 = vpop.permute.xlu1 %1595 }
 0x27f   : > { %1468 = vst.msk [vmem:[#allocation4 + $0x160] sm:$0xff] %vm1456_vm3, %v1431_v30 }
 0x280   : > { %1629 = vst.msk [vmem:[#allocation4 + $0x160] sm:$0xff] %vm1617_vm4, %v1592_v29 }
 0x282   : > { %v1753_v6 = vpop.permute.xlu0 %1752  ;;  %v6353_v25 = vpop.permute.xlu1 %1432 }
 0x283   : > { %1790 = vst.msk [vmem:[#allocation4 + $0x160] sm:$0xff] %vm1778_vm5, %v1753_v6  ;;  %7717 = vst [vmem:[#allocation54_spill] sm:$0xff] %v6353_v25  ;;  %v3602_v25 = vld [vmem:[%s5546_s21 + $0x78] sm:$0xff] }
 0x286   : > { %v6351_v11 = vpop.permute.xlu0 %1589  ;;  %v6357_v4 = vpop.permute.xlu1 %1754 }
 0x287   : > { %7716 = vst [vmem:[#allocation53_spill] sm:$0xff] %v6351_v11  ;;  %7718 = vst [vmem:[#allocation55_spill] sm:$0xff] %v6357_v4  ;;  %v7733_v11 = vmov 11  }
 0x28a   : > { %v1435_v20 = vpop.permute.xlu0 %1434  ;;  %v1600_v29 = vpop.permute.xlu1 %1599 }
 0x28b   : > { %1470 = vst.msk [vmem:[#allocation4 + $0x1a0] sm:$0xff] %vm1456_vm3, %v1435_v20 }
 0x28c   : > { %1631 = vst.msk [vmem:[#allocation4 + $0x1a0] sm:$0xff] %vm1617_vm4, %v1596_v7 }
 0x28e   : > { %v1757_v48 = vpop.permute.xlu0 %1756  ;;  %v6364_v6 = vpop.permute.xlu1 %1436 }
 0x28f   : > { %1792 = vst.msk [vmem:[#allocation4 + $0x1a0] sm:$0xff] %vm1778_vm5, %v1757_v48  ;;  %7720 = vst [vmem:[#allocation57_spill] sm:$0xff] %v6364_v6 }
 0x292   : > { %v6360_v23 = vpop.permute.xlu0 %1593  ;;  %v6367_v20 = vpop.permute.xlu1 %1758 }
 0x293   : > { %7719 = vst [vmem:[#allocation56_spill] sm:$0xff] %v6360_v23  ;;  %7721 = vst [vmem:[#allocation58_spill] sm:$0xff] %v6367_v20  ;;  %v3601_v23 = vld [vmem:[%s5546_s21 + $0x70] sm:$0xff] }
 0x294   : > { %v5151_v14 = vpack.c.bf16 %v3602_v25, %v3601_v23 }
 0x296   : > { %v1439_v30 = vpop.permute.xlu0 %1438 }
 0x297   : > { %1472 = vst.msk [vmem:[#allocation4 + $0x1e0] sm:$0xff] %vm1456_vm3, %v1439_v30 }
 0x298   : > { %1633 = vst.msk [vmem:[#allocation4 + $0x1e0] sm:$0xff] %vm1617_vm4, %v1600_v29 }
 0x29a   : > { %v1761_v63 = vpop.permute.xlu0 %1760 }
 0x29b   : > { %1794 = vst.msk [vmem:[#allocation4 + $0x1e0] sm:$0xff] %vm1778_vm5, %v1761_v63 }
 0x29e   : > { %v6373_v30 = vpop.permute.xlu0 %1597 }
 0x29f   : > { %7722 = vst [vmem:[#allocation59_spill] sm:$0xff] %v6373_v30 }
 0x2a3   : > { %v1925_v7 = vpop.permute.xlu1 %1924 }
 0x2a4   : > { %v1963_v0 = vmul.f32 %v1925_v7, %v5992_v12 }
 0x2a6   : > { %2003 = vrot.lane.b32.xlu1 %v1963_v0, %s5413_s14 }
 0x2a7   : > { %v1933_v48 = vpop.permute.xlu1 %1932 }
 0x2a8   : > { %v1965_v60 = vmul.f32 %v1933_v48, %v6005_v17 }
 0x2aa   : > { %2007 = vrot.lane.b32.xlu1 %v1965_v60, %s5413_s14 }
 0x2ab   : > { %v1941_v29 = vpop.permute.xlu1 %1940 }
 0x2ac   : > { %v1967_v44 = vmul.f32 %v1941_v29, %v6020_v31  ;;  %v7723_v29 = vld [vmem:[#allocation9_spill] sm:$0xff] }
 0x2ae   : > { %2011 = vrot.lane.b32.xlu1 %v1967_v44, %s5413_s14 }
 0x2af   : > { %v1929_v63 = vpop.permute.xlu0 %1928  ;;  %v1949_v32 = vpop.permute.xlu1 %1948 }
 0x2b0   : > { %v1964_v40 = vmul.f32 %v5990_v9, %v1929_v63  ;;  %v1969_v7 = vmul.f32 %v1949_v32, %v6035_v46  ;;  %v7724_v32 = vld [vmem:[#allocation10_spill] sm:$0xff] }
 0x2b2   : > { %2005 = vrot.lane.b32.xlu0 %v1964_v40, %s5413_s14  ;;  %2015 = vrot.lane.b32.xlu1 %v1969_v7, %s5413_s14 }
 0x2b3   : > { %v1937_v0 = vpop.permute.xlu0 %1936  ;;  %v1988_v48 = vpop.permute.xlu1 %1987 }
 0x2b4   : > { %v1966_v60 = vmul.f32 %v6001_v15, %v1937_v0  ;;  %2035 = vst.msk [vmem:[#allocation4 + $0x8] sm:$0xff] %vm1456_vm3, %v1988_v48  ;;  %v7725_v48 = vld [vmem:[#allocation11_spill] sm:$0xff] }
 0x2b6   : > { %2009 = vrot.lane.b32.xlu0 %v1966_v60, %s5413_s14  ;;  %2052 = vperm.xlu1 %5300, %v7723_v29  }
 0x2b7   : > { %v1945_v44 = vpop.permute.xlu0 %1944  ;;  %v1992_v45 = vpop.permute.xlu1 %1991 }
 0x2b8   : > { %v1968_v63 = vmul.f32 %v6017_v34, %v1945_v44  ;;  %2037 = vst.msk [vmem:[#allocation4 + $0x48] sm:$0xff] %vm1456_vm3, %v1992_v45  ;;  %v7726_v45 = vld [vmem:[#allocation18_spill] sm:$0xff]  ;;  %v7727_v44 = vld [vmem:[#allocation12_spill] sm:$0xff] }
 0x2ba   : > { %2013 = vrot.lane.b32.xlu0 %v1968_v63, %s5413_s14  ;;  %2060 = vperm.xlu1 %5300, %v7724_v32  }
 0x2bb   : > { %v1953_v40 = vpop.permute.xlu0 %1952  ;;  %v1996_v7 = vpop.permute.xlu1 %1995 }
 0x2bc   : > { %v1970_v0 = vmul.f32 %v6030_v42, %v1953_v40  ;;  %2039 = vst.msk [vmem:[#allocation4 + $0x88] sm:$0xff] %vm1456_vm3, %v1996_v7  ;;  %v7728_v40 = vld [vmem:[#allocation19_spill] sm:$0xff]  ;;  %v7729_v7 = vld [vmem:[#allocation13_spill] sm:$0xff] }
 0x2be   : > { %2017 = vrot.lane.b32.xlu0 %v1970_v0, %s5413_s14  ;;  %2064 = vperm.xlu1 %5300, %v7725_v48  }
 0x2bf   : > { %v1990_v60 = vpop.permute.xlu0 %1989  ;;  %v2000_v1 = vpop.permute.xlu1 %1999 }
 0x2c0   : > { %2036 = vst.msk [vmem:[#allocation4 + $0x28] sm:$0xff] %vm1456_vm3, %v1990_v60  ;;  %2041 = vst.msk [vmem:[#allocation4 + $0xc8] sm:$0xff] %vm1456_vm3, %v2000_v1  ;;  %v5417_v1 = vmov 7  }
 0x2c2   : > { %2056 = vperm.xlu0 %5301, %v7726_v45   ;;  %2072 = vperm.xlu1 %5300, %v7727_v44  }
 0x2c3   : > { %v1994_v63 = vpop.permute.xlu0 %1993 }
 0x2c4   : > { %2038 = vst.msk [vmem:[#allocation4 + $0x68] sm:$0xff] %vm1456_vm3, %v1994_v63 }
 0x2c6   : > { %2068 = vperm.xlu0 %5301, %v7728_v40   ;;  %2080 = vperm.xlu1 %5300, %v7729_v7  }
 0x2c7   : > { %v1998_v0 = vpop.permute.xlu0 %1997 }
 0x2c8   : > { %2040 = vst.msk [vmem:[#allocation4 + $0xa8] sm:$0xff] %vm1456_vm3, %v1998_v0 }
 0x2ca   : > { %2076 = vperm.xlu0 %5301, %v7730_v59   ;;  %2088 = vperm.xlu1 %5300, %v5800_v27  }
 0x2cb   : > { %v2002_v60 = vpop.permute.xlu0 %2001 }
 0x2cc   : > { %2042 = vst.msk [vmem:[#allocation4 + $0xe8] sm:$0xff] %vm1456_vm3, %v2002_v60 }
 0x2ce   : > { %2084 = vperm.xlu0 %5301, %v5865_v38   ;;  %2096 = vperm.xlu1 %5300, %v7685_v56  }
 0x2d2   : > { %2092 = vperm.xlu0 %5301, %v5873_v28   ;;  %2104 = vperm.xlu1 %5300, %v7686_v13  }
 0x2d6   : > { %2100 = vperm.xlu0 %5301, %v5878_v35   ;;  %2112 = vperm.xlu1 %5300, %v7687_v47  }
 0x2da   : > { %2108 = vperm.xlu0 %5301, %v7684_v18   ;;  %5303 = vset.pattern.permute.xlu1 %v5417_v1 }
 0x2de   : > { %5302 = vset.pattern.permute.xlu0 %v5417_v1 }
 0x318   : > { %v2004_v63 = vpop.permute.xlu1 %2003 }
 0x319   : > { %2043 = vst.msk [vmem:[#allocation4 + $0x108] sm:$0xff] %vm1456_vm3, %v2004_v63 }
 0x31c   : > { %v2008_v0 = vpop.permute.xlu1 %2007 }
 0x31d   : > { %2045 = vst.msk [vmem:[#allocation4 + $0x148] sm:$0xff] %vm1456_vm3, %v2008_v0 }
 0x320   : > { %v2012_v60 = vpop.permute.xlu1 %2011 }
 0x321   : > { %2047 = vst.msk [vmem:[#allocation4 + $0x188] sm:$0xff] %vm1456_vm3, %v2012_v60 }
 0x324   : > { %v2006_v37 = vpop.permute.xlu0 %2005  ;;  %v2016_v33 = vpop.permute.xlu1 %2015 }
 0x325   : > { %2044 = vst.msk [vmem:[#allocation4 + $0x128] sm:$0xff] %vm1456_vm3, %v2006_v37  ;;  %2049 = vst.msk [vmem:[#allocation4 + $0x1c8] sm:$0xff] %vm1456_vm3, %v2016_v33 }
 0x328   : > { %v2010_v54 = vpop.permute.xlu0 %2009 }
 0x329   : > { %2046 = vst.msk [vmem:[#allocation4 + $0x168] sm:$0xff] %vm1456_vm3, %v2010_v54 }
 0x32c   : > { %v2014_v2 = vpop.permute.xlu0 %2013 }
 0x32d   : > { %2048 = vst.msk [vmem:[#allocation4 + $0x1a8] sm:$0xff] %vm1456_vm3, %v2014_v2 }
 0x330   : > { %v2018_v1 = vpop.permute.xlu0 %2017 }
 0x331   : > { %2050 = vst.msk [vmem:[#allocation4 + $0x1e8] sm:$0xff] %vm1456_vm3, %v2018_v1 }
 0x335   : > { %v2053_v63 = vpop.permute.xlu1 %2052 }
 0x336   : > { %v2115_v0 = vmul.f32 %v2053_v63, %v5940_v51 }
 0x338   : > { %2147 = vrot.lane.b32.xlu0 %v2115_v0, %s5414_s29 }
 0x339   : > { %v2061_v60 = vpop.permute.xlu1 %2060 }
 0x33a   : > { %v2117_v21 = vmul.f32 %v2061_v60, %v5953_v10 }
 0x33c   : > { %2151 = vrot.lane.b32.xlu0 %v2117_v21, %s5414_s29 }
 0x33d   : > { %v2065_v33 = vpop.permute.xlu1 %2064 }
 0x33e   : > { %v2118_v1 = vmul.f32 %v5949_v53, %v2065_v33 }
 0x341   : > { %v2057_v37 = vpop.permute.xlu0 %2056  ;;  %v2073_v36 = vpop.permute.xlu1 %2072 }
 0x342   : > { %v2116_v54 = vmul.f32 %v5937_v50, %v2057_v37  ;;  %v2120_v21 = vmul.f32 %v5964_v16, %v2073_v36 }
 0x344   : > { %2149 = vrot.lane.b32.xlu1 %v2116_v54, %s5414_s29 }
 0x345   : > { %v2069_v2 = vpop.permute.xlu0 %2068  ;;  %v2081_v20 = vpop.permute.xlu1 %2080 }
 0x346   : > { %v2119_v63 = vmul.f32 %v2069_v2, %v5968_v62  ;;  %v2122_v54 = vmul.f32 %v5978_v3, %v2081_v20 }
 0x348   : > { %2155 = vrot.lane.b32.xlu0 %v2119_v63, %s5414_s29  ;;  %2153 = vrot.lane.b32.xlu1 %v2118_v1, %s5414_s29 }
 0x349   : > { %v2077_v0 = vpop.permute.xlu0 %2076  ;;  %v2089_v60 = vpop.permute.xlu1 %2088 }
 0x34a   : > { %v2121_v30 = vmul.f32 %v2077_v0, %v5981_v5  ;;  %v2124_v63 = vmul.f32 %v5990_v9, %v2089_v60 }
 0x34c   : > { %2159 = vrot.lane.b32.xlu0 %v2121_v30, %s5414_s29  ;;  %2157 = vrot.lane.b32.xlu1 %v2120_v21, %s5414_s29 }
 0x34d   : > { %v2085_v37 = vpop.permute.xlu0 %2084  ;;  %v2097_v2 = vpop.permute.xlu1 %2096 }
 0x34e   : > { %v2123_v33 = vmul.f32 %v2085_v37, %v5992_v12  ;;  %v2126_v20 = vmul.f32 %v6001_v15, %v2097_v2  ;;  %v5418_v2 = vmov 8  }
 0x350   : > { %2163 = vrot.lane.b32.xlu0 %v2123_v33, %s5414_s29  ;;  %2161 = vrot.lane.b32.xlu1 %v2122_v54, %s5414_s29 }
 0x351   : > { %v2093_v1 = vpop.permute.xlu0 %2092  ;;  %v2105_v30 = vpop.permute.xlu1 %2104 }
 0x352   : > { %v2125_v36 = vmul.f32 %v2093_v1, %v6005_v17  ;;  %v2128_v54 = vmul.f32 %v6017_v34, %v2105_v30 }
 0x354   : > { %2167 = vrot.lane.b32.xlu0 %v2125_v36, %s5414_s29  ;;  %2165 = vrot.lane.b32.xlu1 %v2124_v63, %s5414_s29 }
 0x355   : > { %v2101_v0 = vpop.permute.xlu0 %2100  ;;  %v2113_v33 = vpop.permute.xlu1 %2112 }
 0x356   : > { %v2127_v21 = vmul.f32 %v2101_v0, %v6020_v31  ;;  %v2130_v1 = vmul.f32 %v6030_v42, %v2113_v33  ;;  %v3588_v33 = vld [vmem:[%s5546_s21 + $0x8] sm:$0xff] }
 0x358   : > { %2171 = vrot.lane.b32.xlu0 %v2127_v21, %s5414_s29  ;;  %2169 = vrot.lane.b32.xlu1 %v2126_v20, %s5414_s29  ;;  %v3603_v21 = vld [vmem:[%s5546_s21 + $0x80] sm:$0xff] }
 0x359   : > { %v2109_v37 = vpop.permute.xlu0 %2108 }
 0x35a   : > { %v2129_v60 = vmul.f32 %v2109_v37, %v6035_v46  ;;  %v3604_v37 = vld [vmem:[%s5546_s21 + $0x88] sm:$0xff] }
 0x35c   : > { %2175 = vrot.lane.b32.xlu0 %v2129_v60, %s5414_s29  ;;  %2173 = vrot.lane.b32.xlu1 %v2128_v54, %s5414_s29  ;;  %v5121_v54 = vpack.c.bf16 %v3604_v37, %v3603_v21  ;;  %v3587_v60 = vld [vmem:[%s5546_s21] sm:$0xff]  ;;  %v3590_v21 = vld [vmem:[%s5546_s21 + $0x18] sm:$0xff] }
 0x35e   : > { %5122 = vmatprep.subr.bf16.mxu0 %v5121_v54  ;;  %v3607_v54 = vld [vmem:[%s5546_s21 + $0xa0] sm:$0xff] }
 0x360   : > { %2212 = vperm.xlu0 %5302, %v7723_v29   ;;  %2177 = vrot.lane.b32.xlu1 %v2130_v1, %s5414_s29 }
 0x364   : > { %2224 = vperm.xlu0 %5302, %v7725_v48   ;;  %2216 = vperm.xlu1 %5303, %v7726_v45  }
 0x368   : > { %2232 = vperm.xlu0 %5302, %v7727_v44   ;;  %2220 = vperm.xlu1 %5303, %v7724_v32  }
 0x36c   : > { %2240 = vperm.xlu0 %5302, %v7729_v7   ;;  %2228 = vperm.xlu1 %5303, %v7728_v40  }
 0x370   : > { %2248 = vperm.xlu0 %5302, %v5800_v27   ;;  %2236 = vperm.xlu1 %5303, %v7730_v59  }
 0x374   : > { %2256 = vperm.xlu0 %5302, %v7685_v56   ;;  %2244 = vperm.xlu1 %5303, %v5865_v38  }
 0x378   : > { %2264 = vperm.xlu0 %5302, %v7686_v13   ;;  %2252 = vperm.xlu1 %5303, %v5873_v28  }
 0x37c   : > { %2272 = vperm.xlu0 %5302, %v7687_v47   ;;  %2260 = vperm.xlu1 %5303, %v5878_v35  }
 0x380   : > { %2268 = vperm.xlu1 %5303, %v7684_v18   ;;  %5305 = vset.pattern.permute.xlu0 %v5418_v2 }
 0x384   : > { %5304 = vset.pattern.permute.xlu1 %v5418_v2 }
 0x3aa   : > { %v2148_v63 = vpop.permute.xlu0 %2147 }
 0x3ab   : > { %2195 = vst.msk [vmem:[#allocation4 + $0x8] sm:$0xff] %vm1617_vm4, %v2148_v63  ;;  %v5123_v63 = vpack.c.bf16 %v3588_v33, %v3587_v60  ;;  %v3608_v60 = vld [vmem:[%s5546_s21 + $0xa8] sm:$0xff]  ;;  %v3591_v33 = vld [vmem:[%s5546_s21 + $0x20] sm:$0xff] }
 0x3ad   : > { %5124 = vmatpush3.bf16.msra.mxu0 %v5123_v63 }
 0x3ae   : > { %v2152_v36 = vpop.permute.xlu0 %2151 }
 0x3af   : > { %2197 = vst.msk [vmem:[#allocation4 + $0x48] sm:$0xff] %vm1617_vm4, %v2152_v36  ;;  %v3605_v36 = vld [vmem:[%s5546_s21 + $0x90] sm:$0xff] }
 0x3b6   : > { %v2150_v30 = vpop.permute.xlu1 %2149 }
 0x3b7   : > { %2196 = vst.msk [vmem:[#allocation4 + $0x28] sm:$0xff] %vm1617_vm4, %v2150_v30  ;;  %v3606_v30 = vld [vmem:[%s5546_s21 + $0x98] sm:$0xff] }
 0x3ba   : > { %v2156_v0 = vpop.permute.xlu0 %2155  ;;  %v2154_v20 = vpop.permute.xlu1 %2153 }
 0x3bb   : > { %2199 = vst.msk [vmem:[#allocation4 + $0x88] sm:$0xff] %vm1617_vm4, %v2156_v0  ;;  %2198 = vst.msk [vmem:[#allocation4 + $0x68] sm:$0xff] %vm1617_vm4, %v2154_v20  ;;  %v3589_v0 = vld [vmem:[%s5546_s21 + $0x10] sm:$0xff]  ;;  %v5125_v20 = vpack.c.bf16 %v3606_v30, %v3605_v36 }
 0x3bc   : > { %v5127_v37 = vpack.c.bf16 %v3590_v21, %v3589_v0  ;;  %v3594_v21 = vld [vmem:[%s5546_s21 + $0x38] sm:$0xff] }
 0x3bd   : > { %5126 = vmatprep.subr.bf16.mxu0 %v5125_v20  ;;  %v3593_v20 = vld [vmem:[%s5546_s21 + $0x30] sm:$0xff] }
 0x3be   : > { %v2160_v1 = vpop.permute.xlu0 %2159  ;;  %v2158_v2 = vpop.permute.xlu1 %2157  ;;  %5128 = vmatpush3.bf16.msra.mxu0 %v5127_v37 }
 0x3bf   : > { %2201 = vst.msk [vmem:[#allocation4 + $0xc8] sm:$0xff] %vm1617_vm4, %v2160_v1  ;;  %2200 = vst.msk [vmem:[#allocation4 + $0xa8] sm:$0xff] %vm1617_vm4, %v2158_v2  ;;  %v5129_v1 = vpack.c.bf16 %v3608_v60, %v3607_v54  ;;  %v3592_v2 = vld [vmem:[%s5546_s21 + $0x28] sm:$0xff]  ;;  %v5135_v60 = vpack.c.bf16 %v3594_v21, %v3593_v20  ;;  %v3614_v20 = vld [vmem:[%s5546_s21 + $0xd8] sm:$0xff] }
 0x3c0   : > { %v5131_v30 = vpack.c.bf16 %v3592_v2, %v3591_v33  ;;  %v3611_v33 = vld [vmem:[%s5546_s21 + $0xc0] sm:$0xff] }
 0x3c1   : > { %5130 = vmatprep.subr.bf16.mxu0 %v5129_v1  ;;  %v3612_v1 = vld [vmem:[%s5546_s21 + $0xc8] sm:$0xff] }
 0x3c2   : > { %v2164_v6 = vpop.permute.xlu0 %2163  ;;  %v2162_v4 = vpop.permute.xlu1 %2161  ;;  %5132 = vmatpush3.bf16.msra.mxu0 %v5131_v30  ;;  %v5137_v2 = vpack.c.bf16 %v3612_v1, %v3611_v33  ;;  %v3615_v1 = vld [vmem:[%s5546_s21 + $0xe0] sm:$0xff] }
 0x3c3   : > { %2203 = vst.msk [vmem:[#allocation4 + $0x108] sm:$0xff] %vm1617_vm4, %v2164_v6  ;;  %2202 = vst.msk [vmem:[#allocation4 + $0xe8] sm:$0xff] %vm1617_vm4, %v2162_v4  ;;  %v3609_v4 = vld [vmem:[%s5546_s21 + $0xb0] sm:$0xff]  ;;  %v3610_v6 = vld [vmem:[%s5546_s21 + $0xb8] sm:$0xff] }
 0x3c4   : > { %v5133_v0 = vpack.c.bf16 %v3610_v6, %v3609_v4 }
 0x3c6   : > { %v2168_v63 = vpop.permute.xlu0 %2167  ;;  %v2166_v36 = vpop.permute.xlu1 %2165  ;;  %5134 = vmatprep.subr.bf16.mxu0 %v5133_v0  ;;  %v3613_v0 = vld [vmem:[%s5546_s21 + $0xd0] sm:$0xff] }
 0x3c7   : > { %2205 = vst.msk [vmem:[#allocation4 + $0x148] sm:$0xff] %vm1617_vm4, %v2168_v63  ;;  %2204 = vst.msk [vmem:[#allocation4 + $0x128] sm:$0xff] %vm1617_vm4, %v2166_v36  ;;  %5136 = vmatpush3.bf16.msra.mxu0 %v5135_v60  ;;  %v3595_v63 = vld [vmem:[%s5546_s21 + $0x40] sm:$0xff]  ;;  %v3596_v36 = vld [vmem:[%s5546_s21 + $0x48] sm:$0xff]  ;;  %v5141_v21 = vpack.c.bf16 %v3614_v20, %v3613_v0 }
 0x3c8   : > { %v5139_v6 = vpack.c.bf16 %v3596_v36, %v3595_v63  ;;  %5138 = vmatprep.subr.bf16.mxu0 %v5137_v2  ;;  %v3616_v63 = vld [vmem:[%s5546_s21 + $0xe8] sm:$0xff]  ;;  %v3599_v36 = vld [vmem:[%s5546_s21 + $0x60] sm:$0xff]  ;;  %v3618_v0 = vld [vmem:[%s5546_s21 + $0xf8] sm:$0xff] }
 0x3c9   : > { %v5145_v2 = vpack.c.bf16 %v3616_v63, %v3615_v1 }
 0x3ca   : > { %v2172_v37 = vpop.permute.xlu0 %2171  ;;  %v2170_v54 = vpop.permute.xlu1 %2169 }
 0x3cb   : > { %2207 = vst.msk [vmem:[#allocation4 + $0x188] sm:$0xff] %vm1617_vm4, %v2172_v37  ;;  %2206 = vst.msk [vmem:[#allocation4 + $0x168] sm:$0xff] %vm1617_vm4, %v2170_v54  ;;  %5140 = vmatpush3.bf16.msra.mxu0 %v5139_v6  ;;  %v3597_v37 = vld [vmem:[%s5546_s21 + $0x50] sm:$0xff]  ;;  %v3598_v54 = vld [vmem:[%s5546_s21 + $0x58] sm:$0xff] }
 0x3cc   : > { %5142 = vmatprep.subr.bf16.mxu0 %v5141_v21  ;;  %v5143_v33 = vpack.c.bf16 %v3598_v54, %v3597_v37  ;;  %v3617_v6 = vld [vmem:[%s5546_s21 + $0xf0] sm:$0xff] }
 0x3cd   : > { %v5149_v20 = vpack.c.bf16 %v3618_v0, %v3617_v6 }
 0x3ce   : > { %v2176_v30 = vpop.permute.xlu0 %2175  ;;  %v2174_v4 = vpop.permute.xlu1 %2173 }
 0x3cf   : > { %2209 = vst.msk [vmem:[#allocation4 + $0x1c8] sm:$0xff] %vm1617_vm4, %v2176_v30  ;;  %2208 = vst.msk [vmem:[#allocation4 + $0x1a8] sm:$0xff] %vm1617_vm4, %v2174_v4  ;;  %5144 = vmatpush3.bf16.msra.mxu0 %v5143_v33  ;;  %v3600_v30 = vld [vmem:[%s5546_s21 + $0x68] sm:$0xff] }
 0x3d0   : > { %v5147_v4 = vpack.c.bf16 %v3600_v30, %v3599_v36  ;;  %5146 = vmatprep.subr.bf16.mxu0 %v5145_v2 }
 0x3d2   : > { %v2178_v60 = vpop.permute.xlu1 %2177 }
 0x3d3   : > { %2210 = vst.msk [vmem:[#allocation4 + $0x1e8] sm:$0xff] %vm1617_vm4, %v2178_v60  ;;  %5148 = vmatpush3.bf16.msra.mxu0 %v5147_v4 }
 0x3d4   : > { %5150 = vmatprep.subr.bf16.mxu0 %v5149_v20 }
 0x3d7   : > { %5152 = vmatpush3.bf16.msra.mxu0 %v5151_v14 }
 0x3df   : > { %v2213_v21 = vpop.permute.xlu0 %2212 }
 0x3e0   : > { %v2275_v37 = vmul.f32 %v2213_v21, %v5940_v51 }
 0x3e2   : > { %2307 = vrot.lane.b32.xlu1 %v2275_v37, %s5415_s15 }
 0x3e3   : > { %v2225_v54 = vpop.permute.xlu0 %2224  ;;  %v2217_v60 = vpop.permute.xlu1 %2216 }
 0x3e4   : > { %v2276_v33 = vmul.f32 %v5937_v50, %v2217_v60  ;;  %v2278_v2 = vmul.f32 %v5949_v53, %v2225_v54 }
 0x3e6   : > { %2309 = vrot.lane.b32.xlu0 %v2276_v33, %s5415_s15 }
 0x3e7   : > { %v2233_v1 = vpop.permute.xlu0 %2232  ;;  %v2221_v63 = vpop.permute.xlu1 %2220 }
 0x3e8   : > { %v2277_v36 = vmul.f32 %v2221_v63, %v5953_v10  ;;  %v2280_v23 = vmul.f32 %v5964_v16, %v2233_v1 }
 0x3ea   : > { %2313 = vrot.lane.b32.xlu0 %v2278_v2, %s5415_s15  ;;  %2311 = vrot.lane.b32.xlu1 %v2277_v36, %s5415_s15 }
 0x3eb   : > { %v2241_v14 = vpop.permute.xlu0 %2240  ;;  %v2229_v25 = vpop.permute.xlu1 %2228 }
 0x3ec   : > { %v2279_v30 = vmul.f32 %v2229_v25, %v5968_v62  ;;  %v2282_v0 = vmul.f32 %v5978_v3, %v2241_v14 }
 0x3ee   : > { %2317 = vrot.lane.b32.xlu0 %v2280_v23, %s5415_s15  ;;  %2315 = vrot.lane.b32.xlu1 %v2279_v30, %s5415_s15 }
 0x3ef   : > { %v2249_v4 = vpop.permute.xlu0 %2248  ;;  %v2237_v6 = vpop.permute.xlu1 %2236 }
 0x3f0   : > { %v2281_v20 = vmul.f32 %v2237_v6, %v5981_v5  ;;  %v2284_v54 = vmul.f32 %v5990_v9, %v2249_v4 }
 0x3f2   : > { %2321 = vrot.lane.b32.xlu0 %v2282_v0, %s5415_s15  ;;  %2319 = vrot.lane.b32.xlu1 %v2281_v20, %s5415_s15  ;;  %v7635_v0 = vmov 10   ;;  %v7641_v20 = vmov 9  }
 0x3f3   : > { %v2257_v21 = vpop.permute.xlu0 %2256  ;;  %v2245_v37 = vpop.permute.xlu1 %2244 }
 0x3f4   : > { %v2283_v60 = vmul.f32 %v2245_v37, %v5992_v12  ;;  %v2286_v63 = vmul.f32 %v6001_v15, %v2257_v21  ;;  %v7643_v21 = vmov 14   ;;  %v7645_v37 = vmov 15  }
 0x3f6   : > { %2325 = vrot.lane.b32.xlu0 %v2284_v54, %s5415_s15  ;;  %2323 = vrot.lane.b32.xlu1 %v2283_v60, %s5415_s15  ;;  %v7639_v54 = vmov 11  }
 0x3f7   : > { %v2265_v33 = vpop.permute.xlu0 %2264  ;;  %v2253_v1 = vpop.permute.xlu1 %2252 }
 0x3f8   : > { %v2285_v2 = vmul.f32 %v2253_v1, %v6005_v17  ;;  %v2288_v14 = vmul.f32 %v6017_v34, %v2265_v33  ;;  %v7634_v1 = vmov 13  }
 0x3fa   : > { %2329 = vrot.lane.b32.xlu0 %v2286_v63, %s5415_s15  ;;  %2327 = vrot.lane.b32.xlu1 %v2285_v2, %s5415_s15 }
 0x3fb   : > { %v2261_v36 = vpop.permute.xlu1 %2260  ;;  %v2273_v23 = vpop.permute.xlu0 %2272 }
 0x3fc   : > { %v2287_v25 = vmul.f32 %v2261_v36, %v6020_v31  ;;  %v2290_v4 = vmul.f32 %v6030_v42, %v2273_v23 }
 0x3fe   : > { %2333 = vrot.lane.b32.xlu0 %v2288_v14, %s5415_s15  ;;  %2331 = vrot.lane.b32.xlu1 %v2287_v25, %s5415_s15  ;;  %v3523_v14 = vld [vmem:[#allocation4] sm:$0xff] }
 0x3ff   : > { %v2269_v30 = vpop.permute.xlu1 %2268 }
 0x400   : > { %v2289_v6 = vmul.f32 %v2269_v30, %v6035_v46 }
 0x402   : > { %2337 = vrot.lane.b32.xlu0 %v2290_v4, %s5415_s15  ;;  %2335 = vrot.lane.b32.xlu1 %v2289_v6, %s5415_s15 }
 0x406   : > { %2376 = vperm.xlu0 %5305, %v7726_v45   ;;  %2372 = vperm.xlu1 %5304, %v7723_v29  }
 0x40a   : > { %2388 = vperm.xlu0 %5305, %v7728_v40   ;;  %2380 = vperm.xlu1 %5304, %v7724_v32  }
 0x40e   : > { %2396 = vperm.xlu0 %5305, %v7730_v59   ;;  %2384 = vperm.xlu1 %5304, %v7725_v48  }
 0x412   : > { %2404 = vperm.xlu0 %5305, %v5865_v38   ;;  %2392 = vperm.xlu1 %5304, %v7727_v44  }
 0x416   : > { %2412 = vperm.xlu0 %5305, %v5873_v28   ;;  %2400 = vperm.xlu1 %5304, %v7729_v7  }
 0x41a   : > { %2420 = vperm.xlu0 %5305, %v5878_v35   ;;  %2408 = vperm.xlu1 %5304, %v5800_v27  }
 0x41e   : > { %2428 = vperm.xlu0 %5305, %v7684_v18   ;;  %2416 = vperm.xlu1 %5304, %v7685_v56  }
 0x422   : > { %5308 = vset.pattern.permute.xlu0 %v7635_v0  ;;  %2424 = vperm.xlu1 %5304, %v7686_v13  }
 0x423   : > { %2628 = vperm.xlu0 %5308, %v7723_v29  }
 0x426   : > { %2432 = vperm.xlu1 %5304, %v7687_v47  }
 0x427   : > { %2632 = vperm.xlu0 %5308, %v7726_v45  }
 0x42a   : > { %5306 = vset.pattern.permute.xlu1 %v7641_v20 }
 0x42b   : > { %2636 = vperm.xlu0 %5308, %v7724_v32   ;;  %2468 = vperm.xlu1 %5306, %v7723_v29  }
 0x42f   : > { %2640 = vperm.xlu0 %5308, %v7725_v48   ;;  %5307 = vset.pattern.permute.xlu1 %v7643_v21 }
 0x430   : > { %3204 = vperm.xlu1 %5307, %v7723_v29  }
 0x433   : > { %2644 = vperm.xlu0 %5308, %v7728_v40  }
 0x434   : > { %5309 = vset.pattern.permute.xlu1 %v7645_v37 }
 0x435   : > { %3364 = vperm.xlu1 %5309, %v7723_v29  }
 0x437   : > { %2648 = vperm.xlu0 %5308, %v7727_v44  }
 0x439   : > { %5310 = vset.pattern.permute.xlu1 %v7639_v54 }
 0x43a   : > { %2788 = vperm.xlu1 %5310, %v7723_v29  }
 0x43b   : > { %2652 = vperm.xlu0 %5308, %v7730_v59  }
 0x43e   : > { %5311 = vset.pattern.permute.xlu1 %v7641_v20 }
 0x43f   : > { %2656 = vperm.xlu0 %5308, %v7729_v7   ;;  %2472 = vperm.xlu1 %5311, %v7726_v45  }
 0x443   : > { %2660 = vperm.xlu0 %5308, %v5865_v38   ;;  %5312 = vset.pattern.permute.xlu1 %v7643_v21 }
 0x444   : > { %3208 = vperm.xlu1 %5312, %v7726_v45  }
 0x447   : > { %2664 = vperm.xlu0 %5308, %v5800_v27  }
 0x448   : > { %5313 = vset.pattern.permute.xlu1 %v7645_v37 }
 0x449   : > { %3368 = vperm.xlu1 %5313, %v7726_v45  }
 0x44b   : > { %2668 = vperm.xlu0 %5308, %v5873_v28  }
 0x44d   : > { %5314 = vset.pattern.permute.xlu1 %v7639_v54 }
 0x44e   : > { %2792 = vperm.xlu1 %5314, %v7726_v45  }
 0x44f   : > { %2672 = vperm.xlu0 %5308, %v7685_v56  }
 0x452   : > { %5315 = vset.pattern.permute.xlu1 %v7641_v20 }
 0x453   : > { %2676 = vperm.xlu0 %5308, %v5878_v35   ;;  %2476 = vperm.xlu1 %5315, %v7724_v32  }
 0x454   : > { %v2308_v60 = vpop.permute.xlu1 %2307 }
 0x455   : > { %2355 = vst.msk [vmem:[#allocation4 + $0x8] sm:$0xff] %vm1778_vm5, %v2308_v60 }
 0x457   : > { %2680 = vperm.xlu0 %5308, %v7686_v13   ;;  %5316 = vset.pattern.permute.xlu1 %v7643_v21 }
 0x458   : > { %v2310_v33 = vpop.permute.xlu0 %2309  ;;  %3212 = vperm.xlu1 %5316, %v7724_v32  }
 0x459   : > { %2356 = vst.msk [vmem:[#allocation4 + $0x28] sm:$0xff] %vm1778_vm5, %v2310_v33 }
 0x45b   : > { %5361 = vset.pattern.permute.xlu0 %v7634_v1 }
 0x45c   : > { %3044 = vperm.xlu0 %5361, %v7723_v29   ;;  %v2314_v63 = vpop.permute.xlu0 %2313  ;;  %5317 = vset.pattern.permute.xlu1 %v7645_v37  ;;  %v2312_v2 = vpop.permute.xlu1 %2311  ;;  %v3524_v36 = vld [vmem:[#allocation4 + $0x8] sm:$0xff] }
 0x45d   : > { %2358 = vst.msk [vmem:[#allocation4 + $0x68] sm:$0xff] %vm1778_vm5, %v2314_v63  ;;  %2357 = vst.msk [vmem:[#allocation4 + $0x48] sm:$0xff] %vm1778_vm5, %v2312_v2  ;;  %3372 = vperm.xlu1 %5317, %v7724_v32   ;;  %3912 = vmatprep.mubr.f32.mxu0 %v3524_v36 }
 0x45e   : > { %3913 = vmatmul.mubr.f32.vlgmr.msra.gmra.mrb[16].mxu0 %v3523_v14 }
 0x460   : > { %3048 = vperm.xlu0 %5361, %v7726_v45   ;;  %v2318_v25 = vpop.permute.xlu0 %2317  ;;  %v2316_v23 = vpop.permute.xlu1 %2315  ;;  %v3528_v30 = vld [vmem:[#allocation4 + $0x28] sm:$0xff] }
 0x461   : > { %2360 = vst.msk [vmem:[#allocation4 + $0xa8] sm:$0xff] %vm1778_vm5, %v2318_v25  ;;  %2359 = vst.msk [vmem:[#allocation4 + $0x88] sm:$0xff] %vm1778_vm5, %v2316_v23  ;;  %5318 = vset.pattern.permute.xlu1 %v7639_v54  ;;  %3917 = vmatprep.mubr.f32.mxu0 %v3528_v30 }
 0x462   : > { %2796 = vperm.xlu1 %5318, %v7724_v32  }
 0x464   : > { %3052 = vperm.xlu0 %5361, %v7724_v32   ;;  %v2322_v4 = vpop.permute.xlu0 %2321  ;;  %v2320_v6 = vpop.permute.xlu1 %2319 }
 0x465   : > { %2362 = vst.msk [vmem:[#allocation4 + $0xe8] sm:$0xff] %vm1778_vm5, %v2322_v4  ;;  %2361 = vst.msk [vmem:[#allocation4 + $0xc8] sm:$0xff] %vm1778_vm5, %v2320_v6 }
 0x466   : > { %5319 = vset.pattern.permute.xlu1 %v7641_v20 }
 0x467   : > { %2480 = vperm.xlu1 %5319, %v7725_v48  }
 0x468   : > { %3056 = vperm.xlu0 %5361, %v7725_v48   ;;  %v2326_v60 = vpop.permute.xlu0 %2325  ;;  %v2324_v33 = vpop.permute.xlu1 %2323 }
 0x469   : > { %2364 = vst.msk [vmem:[#allocation4 + $0x128] sm:$0xff] %vm1778_vm5, %v2326_v60  ;;  %2363 = vst.msk [vmem:[#allocation4 + $0x108] sm:$0xff] %vm1778_vm5, %v2324_v33 }
 0x46b   : > { %5320 = vset.pattern.permute.xlu1 %v7643_v21 }
 0x46c   : > { %3060 = vperm.xlu0 %5361, %v7728_v40   ;;  %v2330_v63 = vpop.permute.xlu0 %2329  ;;  %3216 = vperm.xlu1 %5320, %v7725_v48   ;;  %v2328_v2 = vpop.permute.xlu1 %2327 }
 0x46d   : > { %2366 = vst.msk [vmem:[#allocation4 + $0x168] sm:$0xff] %vm1778_vm5, %v2330_v63  ;;  %2365 = vst.msk [vmem:[#allocation4 + $0x148] sm:$0xff] %vm1778_vm5, %v2328_v2 }
 0x470   : > { %3064 = vperm.xlu0 %5361, %v7727_v44   ;;  %v2334_v36 = vpop.permute.xlu0 %2333  ;;  %5321 = vset.pattern.permute.xlu1 %v7645_v37  ;;  %v2332_v14 = vpop.permute.xlu1 %2331 }
 0x471   : > { %2368 = vst.msk [vmem:[#allocation4 + $0x1a8] sm:$0xff] %vm1778_vm5, %v2334_v36  ;;  %2367 = vst.msk [vmem:[#allocation4 + $0x188] sm:$0xff] %vm1778_vm5, %v2332_v14  ;;  %3376 = vperm.xlu1 %5321, %v7725_v48  }
 0x474   : > { %3068 = vperm.xlu0 %5361, %v7730_v59   ;;  %v2338_v25 = vpop.permute.xlu0 %2337  ;;  %v2336_v23 = vpop.permute.xlu1 %2335 }
 0x475   : > { %2370 = vst.msk [vmem:[#allocation4 + $0x1e8] sm:$0xff] %vm1778_vm5, %v2338_v25  ;;  %2369 = vst.msk [vmem:[#allocation4 + $0x1c8] sm:$0xff] %vm1778_vm5, %v2336_v23  ;;  %5322 = vset.pattern.permute.xlu1 %v7639_v54 }
 0x476   : > { %2800 = vperm.xlu1 %5322, %v7725_v48  }
 0x478   : > { %3072 = vperm.xlu0 %5361, %v7729_v7  }
 0x47a   : > { %5323 = vset.pattern.permute.xlu1 %v7641_v20 }
 0x47b   : > { %2484 = vperm.xlu1 %5323, %v7728_v40  }
 0x47c   : > { %3076 = vperm.xlu0 %5361, %v5865_v38  }
 0x47f   : > { %5324 = vset.pattern.permute.xlu1 %v7643_v21 }
 0x480   : > { %3080 = vperm.xlu0 %5361, %v5800_v27   ;;  %3220 = vperm.xlu1 %5324, %v7728_v40  }
 0x484   : > { %3084 = vperm.xlu0 %5361, %v5873_v28   ;;  %5325 = vset.pattern.permute.xlu1 %v7645_v37 }
 0x485   : > { %v2377_v30 = vpop.permute.xlu0 %2376  ;;  %3380 = vperm.xlu1 %5325, %v7728_v40   ;;  %v2373_v4 = vpop.permute.xlu1 %2372 }
 0x486   : > { %v2436_v6 = vmul.f32 %v5937_v50, %v2377_v30  ;;  %v2435_v60 = vmul.f32 %v2373_v4, %v5940_v51 }
 0x488   : > { %2452 = vst.msk [vmem:[#allocation4 + $0x30] sm:$0xff] %vm627_vm1, %v2436_v6  ;;  %2451 = vst.msk [vmem:[#allocation4 + $0x10] sm:$0xff] %vm627_vm1, %v2435_v60  ;;  %3088 = vperm.xlu0 %5361, %v7685_v56  }
 0x489   : > { %v2389_v33 = vpop.permute.xlu0 %2388  ;;  %5326 = vset.pattern.permute.xlu1 %v7639_v54  ;;  %v2381_v63 = vpop.permute.xlu1 %2380 }
 0x48a   : > { %v2439_v2 = vmul.f32 %v2389_v33, %v5968_v62  ;;  %v2437_v36 = vmul.f32 %v2381_v63, %v5953_v10  ;;  %2804 = vperm.xlu1 %5326, %v7728_v40  }
 0x48c   : > { %2455 = vst.msk [vmem:[#allocation4 + $0x90] sm:$0xff] %vm627_vm1, %v2439_v2  ;;  %2453 = vst.msk [vmem:[#allocation4 + $0x50] sm:$0xff] %vm627_vm1, %v2437_v36  ;;  %3092 = vperm.xlu0 %5361, %v5878_v35  }
 0x48d   : > { %v2397_v14 = vpop.permute.xlu0 %2396  ;;  %v2385_v25 = vpop.permute.xlu1 %2384 }
 0x48e   : > { %v2441_v23 = vmul.f32 %v2397_v14, %v5981_v5  ;;  %v2438_v30 = vmul.f32 %v5949_v53, %v2385_v25  ;;  %5327 = vset.pattern.permute.xlu1 %v7641_v20 }
 0x48f   : > { %2488 = vperm.xlu1 %5327, %v7727_v44  }
 0x490   : > { %2457 = vst.msk [vmem:[#allocation4 + $0xd0] sm:$0xff] %vm627_vm1, %v2441_v23  ;;  %2454 = vst.msk [vmem:[#allocation4 + $0x70] sm:$0xff] %vm627_vm1, %v2438_v30  ;;  %3096 = vperm.xlu0 %5361, %v7686_v13  }
 0x491   : > { %v2405_v4 = vpop.permute.xlu0 %2404  ;;  %v2393_v6 = vpop.permute.xlu1 %2392 }
 0x492   : > { %v2443_v60 = vmul.f32 %v2405_v4, %v5992_v12  ;;  %v2440_v33 = vmul.f32 %v5964_v16, %v2393_v6 }
 0x493   : > { %5328 = vset.pattern.permute.xlu1 %v7643_v21 }
 0x494   : > { %2459 = vst.msk [vmem:[#allocation4 + $0x110] sm:$0xff] %vm627_vm1, %v2443_v60  ;;  %2456 = vst.msk [vmem:[#allocation4 + $0xb0] sm:$0xff] %vm627_vm1, %v2440_v33  ;;  %3100 = vperm.xlu0 %5361, %v7684_v18   ;;  %3224 = vperm.xlu1 %5328, %v7727_v44  }
 0x495   : > { %v2413_v63 = vpop.permute.xlu0 %2412  ;;  %v2401_v2 = vpop.permute.xlu1 %2400 }
 0x496   : > { %v2445_v36 = vmul.f32 %v2413_v63, %v6005_v17  ;;  %v2442_v14 = vmul.f32 %v5978_v3, %v2401_v2 }
 0x498   : > { %2461 = vst.msk [vmem:[#allocation4 + $0x150] sm:$0xff] %vm627_vm1, %v2445_v36  ;;  %2458 = vst.msk [vmem:[#allocation4 + $0xf0] sm:$0xff] %vm627_vm1, %v2442_v14  ;;  %5366 = vset.pattern.permute.xlu0 %v7643_v21  ;;  %5329 = vset.pattern.permute.xlu1 %v7645_v37 }
 0x499   : > { %3260 = vperm.xlu0 %5366, %v7684_v18   ;;  %v2421_v25 = vpop.permute.xlu0 %2420  ;;  %3384 = vperm.xlu1 %5329, %v7727_v44   ;;  %v2409_v23 = vpop.permute.xlu1 %2408 }
 0x49a   : > { %v2447_v30 = vmul.f32 %v2421_v25, %v6020_v31  ;;  %v2444_v4 = vmul.f32 %v5990_v9, %v2409_v23 }
 0x49c   : > { %2463 = vst.msk [vmem:[#allocation4 + $0x190] sm:$0xff] %vm627_vm1, %v2447_v30  ;;  %2460 = vst.msk [vmem:[#allocation4 + $0x130] sm:$0xff] %vm627_vm1, %v2444_v4  ;;  %v7637_v4 = vmov 12  }
 0x49d   : > { %5369 = vset.pattern.permute.xlu0 %v7639_v54  ;;  %v2429_v6 = vpop.permute.xlu0 %2428  ;;  %5330 = vset.pattern.permute.xlu1 %v7639_v54  ;;  %v2417_v60 = vpop.permute.xlu1 %2416 }
 0x49e   : > { %v2449_v33 = vmul.f32 %v2429_v6, %v6035_v46  ;;  %v2446_v63 = vmul.f32 %v6001_v15, %v2417_v60  ;;  %2844 = vperm.xlu0 %5369, %v7684_v18   ;;  %2808 = vperm.xlu1 %5330, %v7727_v44  }
 0x4a0   : > { %2465 = vst.msk [vmem:[#allocation4 + $0x1d0] sm:$0xff] %vm627_vm1, %v2449_v33  ;;  %2462 = vst.msk [vmem:[#allocation4 + $0x170] sm:$0xff] %vm627_vm1, %v2446_v63 }
 0x4a1   : > { %v2425_v2 = vpop.permute.xlu1 %2424 }
 0x4a2   : > { %v2448_v36 = vmul.f32 %v6017_v34, %v2425_v2  ;;  %5374 = vset.pattern.permute.xlu0 %v7645_v37  ;;  %v6692_v14 = vpop.permute.xlu0 %2628  ;;  %5331 = vset.pattern.permute.xlu1 %v7641_v20 }
 0x4a3   : > { %3424 = vperm.xlu0 %5374, %v7687_v47   ;;  %2492 = vperm.xlu1 %5331, %v7730_v59  }
 0x4a4   : > { %2464 = vst.msk [vmem:[#allocation4 + $0x1b0] sm:$0xff] %vm627_vm1, %v2448_v36 }
 0x4a5   : > { %v2433_v25 = vpop.permute.xlu1 %2432 }
 0x4a6   : > { %v2450_v23 = vmul.f32 %v6030_v42, %v2433_v25  ;;  %v6699_v30 = vpop.permute.xlu0 %2632 }
 0x4a7   : > { %5375 = vset.pattern.permute.xlu0 %v7637_v4  ;;  %5332 = vset.pattern.permute.xlu1 %v7643_v21 }
 0x4a8   : > { %2466 = vst.msk [vmem:[#allocation4 + $0x1f0] sm:$0xff] %vm627_vm1, %v2450_v23  ;;  %2952 = vperm.xlu0 %5375, %v7726_v45   ;;  %3228 = vperm.xlu1 %5332, %v7730_v59  }
 0x4aa   : > { %v6706_v6 = vpop.permute.xlu0 %2636  ;;  %v6708_v60 = vpop.permute.xlu1 %2468 }
 0x4ac   : > { %5333 = vset.pattern.permute.xlu1 %v7645_v37 }
 0x4ad   : > { %3388 = vperm.xlu1 %5333, %v7730_v59  }
 0x4ae   : > { %v6712_v33 = vpop.permute.xlu0 %2640 }
 0x4af   : > { %v3205_v63 = vpop.permute.xlu1 %3204 }
 0x4b1   : > { %5334 = vset.pattern.permute.xlu1 %v7639_v54 }
 0x4b2   : > { %v6715_v2 = vpop.permute.xlu0 %2644  ;;  %2812 = vperm.xlu1 %5334, %v7730_v59  }
 0x4b4   : > { %v6718_v36 = vpop.permute.xlu1 %3364 }
 0x4b6   : > { %v6720_v25 = vpop.permute.xlu0 %2648  ;;  %5335 = vset.pattern.permute.xlu1 %v7641_v20 }
 0x4b7   : > { %7731 = vst [vmem:[#allocation9_spill] sm:$0xff] %v6720_v25  ;;  %2496 = vperm.xlu1 %5335, %v7729_v7  }
 0x4b9   : > { %v6724_v23 = vpop.permute.xlu1 %2788 }
 0x4ba   : > { %v6726_v1 = vpop.permute.xlu0 %2652 }
 0x4bb   : > { %5336 = vset.pattern.permute.xlu1 %v7643_v21 }
 0x4bc   : > { %3232 = vperm.xlu1 %5336, %v7729_v7  }
 0x4be   : > { %v6730_v0 = vpop.permute.xlu0 %2656  ;;  %v6732_v4 = vpop.permute.xlu1 %2472 }
 0x4bf   : > { %7732 = vst [vmem:[#allocation10_spill] sm:$0xff] %v6730_v0 }
 0x4c0   : > { %5337 = vset.pattern.permute.xlu1 %v7645_v37 }
 0x4c1   : > { %3392 = vperm.xlu1 %5337, %v7729_v7  }
 0x4c2   : > { %v6736_v54 = vpop.permute.xlu0 %2660 }
 0x4c3   : > { %v3209_v20 = vpop.permute.xlu1 %3208 }
 0x4c4   : > { %v3268_v46 = vmul.f32 %v5937_v50, %v3209_v20 }
 0x4c5   : > { %5338 = vset.pattern.permute.xlu1 %v7733_v11 }
 0x4c6   : > { %v6739_v19 = vpop.permute.xlu0 %2664  ;;  %2816 = vperm.xlu1 %5338, %v7729_v7  }
 0x4c7   : > { %7734 = vst [vmem:[#allocation11_spill] sm:$0xff] %v6739_v19  ;;  %v3267_v19 = vmul.f32 %v3205_v63, %v5940_v51 }
 0x4c8   : > { %v6742_v21 = vpop.permute.xlu1 %3368 }
 0x4ca   : > { %v6744_v61 = vpop.permute.xlu0 %2668  ;;  %5339 = vset.pattern.permute.xlu1 %v7735_v41 }
 0x4cb   : > { %2500 = vperm.xlu1 %5339, %v5865_v38  }
 0x4cd   : > { %v2793_v37 = vpop.permute.xlu1 %2792 }
 0x4ce   : > { %v6748_v43 = vpop.permute.xlu0 %2672  ;;  %v2852_v20 = vmul.f32 %v5937_v50, %v2793_v37 }
 0x4cf   : > { %7736 = vst [vmem:[#allocation18_spill] sm:$0xff] %v6748_v43  ;;  %5340 = vset.pattern.permute.xlu1 %v7737_v49 }
 0x4d0   : > { %3236 = vperm.xlu1 %5340, %v5865_v38  }
 0x4d2   : > { %v6752_v8 = vpop.permute.xlu0 %2676  ;;  %v2477_v57 = vpop.permute.xlu1 %2476 }
 0x4d3   : > { %7738 = vst [vmem:[#allocation12_spill] sm:$0xff] %v6752_v8 }
 0x4d4   : > { %5341 = vset.pattern.permute.xlu1 %v7739_v22 }
 0x4d5   : > { %3396 = vperm.xlu1 %5341, %v5865_v38  }
 0x4d6   : > { %v6756_v58 = vpop.permute.xlu0 %2680 }
 0x4d7   : > { %7740 = vst [vmem:[#allocation19_spill] sm:$0xff] %v6756_v58  ;;  %v6758_v26 = vpop.permute.xlu1 %3212 }
 0x4d9   : > { %5342 = vset.pattern.permute.xlu1 %v7733_v11 }
 0x4da   : > { %2820 = vperm.xlu1 %5342, %v5865_v38  }
 0x4db   : > { %v3045_v39 = vpop.permute.xlu0 %3044 }
 0x4dc   : > { %v3107_v55 = vmul.f32 %v3045_v39, %v5940_v51  ;;  %v3373_v24 = vpop.permute.xlu1 %3372 }
 0x4de   : > { %3139 = vrot.lane.b32.xlu0 %v3107_v55, %s5413_s14  ;;  %5343 = vset.pattern.permute.xlu1 %v7735_v41 }
 0x4df   : > { %v3049_v43 = vpop.permute.xlu0 %3048  ;;  %2504 = vperm.xlu1 %5343, %v5800_v27  }
 0x4e0   : > { %v3108_v42 = vmul.f32 %v5937_v50, %v3049_v43 }
 0x4e1   : > { %v6767_v58 = vpop.permute.xlu1 %2796 }
 0x4e2   : > { %3299 = vrot.lane.b32.xlu0 %v3267_v19, %s5414_s29 }
 0x4e3   : > { %v6770_v0 = vpop.permute.xlu0 %3052  ;;  %5344 = vset.pattern.permute.xlu1 %v7737_v49 }
 0x4e4   : > { %3240 = vperm.xlu1 %5344, %v5800_v27  }
 0x4e6   : > { %2960 = vperm.xlu0 %5375, %v7725_v48   ;;  %v6775_v55 = vpop.permute.xlu1 %2480 }
 0x4e7   : > { %v3057_v39 = vpop.permute.xlu0 %3056 }
 0x4e8   : > { %5345 = vset.pattern.permute.xlu1 %v7739_v22 }
 0x4e9   : > { %3400 = vperm.xlu1 %5345, %v5800_v27  }
 0x4ea   : > { %3141 = vrot.lane.b32.xlu0 %v3108_v42, %s5413_s14 }
 0x4eb   : > { %v6781_v19 = vpop.permute.xlu0 %3060  ;;  %v3217_v63 = vpop.permute.xlu1 %3216 }
 0x4ed   : > { %5346 = vset.pattern.permute.xlu1 %v7733_v11 }
 0x4ee   : > { %2824 = vperm.xlu1 %5346, %v5800_v27   ;;  %3301 = vrot.lane.b32.xlu0 %v3268_v46, %s5414_s29  ;;  %v2533_v46 = vmul.f32 %v2477_v57, %v5953_v10  ;;  %v3429_v57 = vmul.f32 %v3373_v24, %v5953_v10  ;;  %v3270_v24 = vmul.f32 %v5949_v53, %v3217_v63 }
 0x4ef   : > { %v6787_v48 = vpop.permute.xlu0 %3064 }
 0x4f0   : > { %v6789_v43 = vpop.permute.xlu1 %3376 }
 0x4f2   : > { %5347 = vset.pattern.permute.xlu1 %v7735_v41  ;;  %2964 = vperm.xlu0 %5375, %v7728_v40  }
 0x4f3   : > { %v6793_v42 = vpop.permute.xlu0 %3068  ;;  %2508 = vperm.xlu1 %5347, %v5873_v28  }
 0x4f4   : > { %7741 = vst [vmem:[#allocation13_spill] sm:$0xff] %v6793_v42  ;;  %v2693_v42 = vmul.f32 %v6706_v6, %v5953_v10  ;;  %v3110_v6 = vmul.f32 %v5949_v53, %v3057_v39 }
 0x4f5   : > { %v2801_v34 = vpop.permute.xlu1 %2800 }
 0x4f6   : > { %2885 = vrot.lane.b32.xlu0 %v2852_v20, %s5415_s15 }
 0x4f7   : > { %v6798_v27 = vpop.permute.xlu0 %3072  ;;  %5348 = vset.pattern.permute.xlu1 %v7737_v49 }
 0x4f8   : > { %3244 = vperm.xlu1 %5348, %v5873_v28  }
 0x4fa   : > { %2567 = vrot.lane.b32.xlu0 %v2533_v46, %s5413_s14  ;;  %v2485_v25 = vpop.permute.xlu1 %2484 }
 0x4fb   : > { %v6804_v8 = vpop.permute.xlu0 %3076 }
 0x4fc   : > { %7742 = vst [vmem:[#allocation20_spill] sm:$0xff] %v6804_v8  ;;  %5349 = vset.pattern.permute.xlu1 %v7739_v22 }
 0x4fd   : > { %3404 = vperm.xlu1 %5349, %v5873_v28  }
 0x4fe   : > { %2727 = vrot.lane.b32.xlu0 %v2693_v42, %s5414_s29 }
 0x4ff   : > { %v6811_v37 = vpop.permute.xlu0 %3080  ;;  %v6813_v20 = vpop.permute.xlu1 %3220 }
 0x501   : > { %5350 = vset.pattern.permute.xlu1 %v7733_v11 }
 0x502   : > { %2828 = vperm.xlu1 %5350, %v5873_v28   ;;  %3463 = vrot.lane.b32.xlu0 %v3429_v57, %s5415_s15 }
 0x503   : > { %v6819_v46 = vpop.permute.xlu0 %3084 }
 0x504   : > { %7743 = vst [vmem:[#allocation60_spill] sm:$0xff] %v6819_v46  ;;  %v3381_v8 = vpop.permute.xlu1 %3380  ;;  %v2854_v46 = vmul.f32 %v5949_v53, %v2801_v34  ;;  %v2695_v34 = vmul.f32 %v6715_v2, %v5968_v62  ;;  %v3112_v2 = vmul.f32 %v5964_v16, %v6787_v48 }
 0x506   : > { %5351 = vset.pattern.permute.xlu1 %v7735_v41  ;;  %3145 = vrot.lane.b32.xlu0 %v3110_v6, %s5413_s14 }
 0x507   : > { %v6824_v42 = vpop.permute.xlu0 %3088  ;;  %2512 = vperm.xlu1 %5351, %v7685_v56  }
 0x509   : > { %v6828_v31 = vpop.permute.xlu1 %2804 }
 0x50a   : > { %3305 = vrot.lane.b32.xlu0 %v3270_v24, %s5414_s29 }
 0x50b   : > { %v6831_v57 = vpop.permute.xlu0 %3092  ;;  %5352 = vset.pattern.permute.xlu1 %v7737_v49 }
 0x50c   : > { %7744 = vst [vmem:[#allocation61_spill] sm:$0xff] %v6831_v57  ;;  %3248 = vperm.xlu1 %5352, %v7685_v56   ;;  %v2535_v57 = vmul.f32 %v2485_v25, %v5968_v62  ;;  %v3431_v25 = vmul.f32 %v3381_v8, %v5968_v62 }
 0x50e   : > { %2972 = vperm.xlu0 %5375, %v7730_v59   ;;  %v6836_v39 = vpop.permute.xlu1 %2488 }
 0x50f   : > { %7745 = vst [vmem:[#allocation62_spill] sm:$0xff] %v6836_v39  ;;  %v6838_v6 = vpop.permute.xlu0 %3096 }
 0x510   : > { %7746 = vst [vmem:[#allocation63_spill] sm:$0xff] %v6838_v6  ;;  %5353 = vset.pattern.permute.xlu1 %v7739_v22 }
 0x511   : > { %3408 = vperm.xlu1 %5353, %v7685_v56  }
 0x512   : > { %2889 = vrot.lane.b32.xlu0 %v2854_v46, %s5415_s15 }
 0x513   : > { %v6844_v63 = vpop.permute.xlu0 %3100  ;;  %v3225_v24 = vpop.permute.xlu1 %3224 }
 0x515   : > { %5354 = vset.pattern.permute.xlu1 %v7733_v11 }
 0x516   : > { %2832 = vperm.xlu1 %5354, %v7685_v56   ;;  %2571 = vrot.lane.b32.xlu0 %v2535_v57, %s5413_s14 }
 0x518   : > { %v6852_v6 = vpop.permute.xlu0 %3260  ;;  %v6854_v39 = vpop.permute.xlu1 %3384 }
 0x519   : > { %7747 = vst [vmem:[#allocation64_spill] sm:$0xff] %v6852_v6  ;;  %v3272_v6 = vmul.f32 %v5964_v16, %v3225_v24 }
 0x51a   : > { %5355 = vset.pattern.permute.xlu1 %v7735_v41  ;;  %2731 = vrot.lane.b32.xlu0 %v2695_v34, %s5414_s29 }
 0x51b   : > { %2516 = vperm.xlu1 %5355, %v5878_v35  }
 0x51d   : > { %v6860_v46 = vpop.permute.xlu0 %2844  ;;  %v2809_v56 = vpop.permute.xlu1 %2808 }
 0x51e   : > { %7748 = vst [vmem:[#allocation65_spill] sm:$0xff] %v6860_v46  ;;  %3467 = vrot.lane.b32.xlu0 %v3431_v25, %s5415_s15  ;;  %v2856_v24 = vmul.f32 %v5964_v16, %v2809_v56  ;;  %v2697_v56 = vmul.f32 %v6726_v1, %v5981_v5  ;;  %v3114_v1 = vmul.f32 %v5978_v3, %v6798_v27  ;;  %v7752_v27 = vmov 12  }
 0x51f   : > { %5356 = vset.pattern.permute.xlu1 %v7737_v49 }
 0x520   : > { %3252 = vperm.xlu1 %5356, %v5878_v35  }
 0x522   : > { %v6867_v57 = vpop.permute.xlu0 %3424  ;;  %3149 = vrot.lane.b32.xlu0 %v3112_v2, %s5413_s14  ;;  %v2493_v34 = vpop.permute.xlu1 %2492 }
 0x523   : > { %7749 = vst [vmem:[#allocation66_spill] sm:$0xff] %v6867_v57 }
 0x524   : > { %5357 = vset.pattern.permute.xlu1 %v7739_v22 }
 0x525   : > { %3412 = vperm.xlu1 %5357, %v5878_v35  }
 0x526   : > { %3309 = vrot.lane.b32.xlu0 %v3272_v6, %s5414_s29  ;;  %v2537_v6 = vmul.f32 %v2493_v34, %v5981_v5 }
 0x527   : > { %v2953_v8 = vpop.permute.xlu0 %2952  ;;  %v6874_v25 = vpop.permute.xlu1 %3228 }
 0x528   : > { %v3012_v48 = vmul.f32 %v5937_v50, %v2953_v8 }
 0x529   : > { %5358 = vset.pattern.permute.xlu1 %v7733_v11 }
 0x52a   : > { %3028 = vst.msk [vmem:[#allocation4 + $0x38] sm:$0xff] %vm627_vm1, %v3012_v48  ;;  %2836 = vperm.xlu1 %5358, %v5878_v35   ;;  %2980 = vperm.xlu0 %5375, %v5865_v38  }
 0x52c   : > { %v3389_v2 = vpop.permute.xlu1 %3388 }
 0x52e   : > { %5359 = vset.pattern.permute.xlu1 %v7735_v41  ;;  %2893 = vrot.lane.b32.xlu0 %v2856_v24, %s5415_s15 }
 0x52f   : > { %2520 = vperm.xlu1 %5359, %v7686_v13  }
 0x531   : > { %v6886_v8 = vpop.permute.xlu1 %2812  ;;  %v4817_v46 = vpop.f32.mrb[16].mxu0 }
 0x532   : > { %7750 = vst [vmem:[#allocation67_spill] sm:$0xff] %v6886_v8  ;;  %2575 = vrot.lane.b32.xlu0 %v2537_v6, %s5413_s14  ;;  %v4818_v48 = vpop.f32.mrb[17].mxu0  ;;  %v3433_v8 = vmul.f32 %v3389_v2, %v5981_v5 }
 0x533   : > { %v4819_v57 = vadd.f32 %v4818_v48, %v4817_v46  ;;  %5360 = vset.pattern.permute.xlu1 %v7737_v49 }
 0x534   : > { %3256 = vperm.xlu1 %5360, %v7686_v13  }
 0x535   : > { %v6894_v24 = vadd.f32 %v4819_v57, %v6282_v52 }
 0x536   : > { %2735 = vrot.lane.b32.xlu0 %v2697_v56, %s5414_s29  ;;  %v6897_v34 = vpop.permute.xlu1 %2496  ;;  %v7753_v56 = vmov 10  }
 0x537   : > { %7751 = vst [vmem:[#allocation68_spill] sm:$0xff] %v6894_v24  ;;  %v3620_v24 = vld [vmem:[%s5546_s21 + $0x108] sm:$0xff] }
 0x538   : > { %5362 = vset.pattern.permute.xlu1 %v7739_v22 }
 0x539   : > { %3416 = vperm.xlu1 %5362, %v7686_v13  }
 0x53a   : > { %3471 = vrot.lane.b32.xlu0 %v3433_v8, %s5415_s15 }
 0x53b   : > { %v3233_v46 = vpop.permute.xlu1 %3232 }
 0x53c   : > { %v3274_v52 = vmul.f32 %v5978_v3, %v3233_v46 }
 0x53d   : > { %5363 = vset.pattern.permute.xlu1 %v7733_v11 }
 0x53e   : > { %2840 = vperm.xlu1 %5363, %v7686_v13   ;;  %3153 = vrot.lane.b32.xlu0 %v3114_v1, %s5413_s14  ;;  %v2699_v1 = vmul.f32 %v6736_v54, %v5992_v12 }
 0x540   : > { %v6909_v57 = vpop.permute.xlu1 %3392 }
 0x542   : > { %5364 = vset.pattern.permute.xlu1 %v7735_v41  ;;  %3313 = vrot.lane.b32.xlu0 %v3274_v52, %s5414_s29 }
 0x543   : > { %2524 = vperm.xlu1 %5364, %v7684_v18  }
 0x545   : > { %v2817_v2 = vpop.permute.xlu1 %2816 }
 0x546   : > { %2988 = vperm.xlu0 %5375, %v5873_v28   ;;  %v2858_v6 = vmul.f32 %v5978_v3, %v2817_v2  ;;  %v7754_v2 = vmov 13  }
 0x547   : > { %5365 = vset.pattern.permute.xlu1 %v7752_v27 }
 0x548   : > { %2948 = vperm.xlu1 %5365, %v7723_v29  }
 0x54a   : > { %2897 = vrot.lane.b32.xlu0 %v2858_v6, %s5415_s15  ;;  %v2501_v8 = vpop.permute.xlu1 %2500  ;;  %v3116_v6 = vmul.f32 %v5990_v9, %v6811_v37 }
 0x54b   : > { %v2539_v48 = vmul.f32 %v2501_v8, %v5992_v12 }
 0x54c   : > { %5367 = vset.pattern.permute.xlu1 %v7753_v56 }
 0x54d   : > { %2684 = vperm.xlu1 %5367, %v7684_v18  }
 0x54e   : > { %2579 = vrot.lane.b32.xlu0 %v2539_v48, %s5413_s14 }
 0x54f   : > { %v6923_v46 = vpop.permute.xlu1 %3236 }
 0x551   : > { %5368 = vset.pattern.permute.xlu1 %v7739_v22  ;;  %v6938_v22 = vpop.permute.xlu0 %3139 }
 0x552   : > { %3420 = vperm.xlu1 %5368, %v7684_v18   ;;  %2739 = vrot.lane.b32.xlu0 %v2699_v1, %s5414_s29 }
 0x554   : > { %v3397_v29 = vpop.permute.xlu1 %3396 }
 0x555   : > { %v3435_v52 = vmul.f32 %v3397_v29, %v5992_v12  ;;  %v6946_v48 = vpop.permute.xlu0 %3299 }
 0x556   : > { %5370 = vset.pattern.permute.xlu1 %v7754_v2 }
 0x557   : > { %3104 = vperm.xlu1 %5370, %v7687_v47   ;;  %3475 = vrot.lane.b32.xlu0 %v3435_v52, %s5415_s15  ;;  %v3635_v52 = vld [vmem:[%s5546_s21 + $0x180] sm:$0xff] }
 0x559   : > { %v6936_v8 = vpop.permute.xlu1 %2820 }
 0x55b   : > { %5371 = vset.pattern.permute.xlu1 %v7735_v41  ;;  %3157 = vrot.lane.b32.xlu0 %v3116_v6, %s5413_s14  ;;  %v3619_v6 = vld [vmem:[%s5546_s21 + $0x100] sm:$0xff] }
 0x55c   : > { %2528 = vperm.xlu1 %5371, %v7687_v47  }
 0x55e   : > { %v6943_v54 = vpop.permute.xlu1 %2504 }
 0x560   : > { %5372 = vset.pattern.permute.xlu1 %v7737_v49  ;;  %v3636_v49 = vld [vmem:[%s5546_s21 + $0x188] sm:$0xff] }
 0x561   : > { %3264 = vperm.xlu1 %5372, %v7687_v47   ;;  %v5153_v2 = vpack.c.bf16 %v3636_v49, %v3635_v52  ;;  %v3621_v52 = vld [vmem:[%s5546_s21 + $0x110] sm:$0xff] }
 0x563   : > { %v3241_v37 = vpop.permute.xlu1 %3240  ;;  %5154 = vmatprep.subr.bf16.mxu1 %v5153_v2 }
 0x564   : > { %v3276_v1 = vmul.f32 %v5990_v9, %v3241_v37 }
 0x565   : > { %v2961_v29 = vpop.permute.xlu0 %2960  ;;  %5373 = vset.pattern.permute.xlu1 %v7753_v56  ;;  %v5155_v56 = vpack.c.bf16 %v3620_v24, %v3619_v6  ;;  %v3622_v24 = vld [vmem:[%s5546_s21 + $0x118] sm:$0xff] }
 0x566   : > { %v3014_v41 = vmul.f32 %v5949_v53, %v2961_v29  ;;  %2688 = vperm.xlu1 %5373, %v7687_v47   ;;  %3317 = vrot.lane.b32.xlu0 %v3276_v1, %s5414_s29  ;;  %v3637_v1 = vld [vmem:[%s5546_s21 + $0x190] sm:$0xff]  ;;  %v3638_v29 = vld [vmem:[%s5546_s21 + $0x198] sm:$0xff]  ;;  %v5159_v49 = vpack.c.bf16 %v3622_v24, %v3621_v52  ;;  %v2531_v24 = vmul.f32 %v6708_v60, %v5940_v51 }
 0x567   : > { %5156 = vmatpush3.bf16.msra.mxu1 %v5155_v56 }
 0x568   : > { %3030 = vst.msk [vmem:[#allocation4 + $0x78] sm:$0xff] %vm627_vm1, %v3014_v41  ;;  %v6959_v37 = vpop.permute.xlu1 %3400  ;;  %v5157_v41 = vpack.c.bf16 %v3638_v29, %v3637_v1  ;;  %v3623_v1 = vld [vmem:[%s5546_s21 + $0x120] sm:$0xff]  ;;  %v3624_v29 = vld [vmem:[%s5546_s21 + $0x128] sm:$0xff] }
 0x569   : > { %7755 = vst [vmem:[#allocation69_spill] sm:$0xff] %v6959_v37  ;;  %v3142_v13 = vpop.permute.xlu0 %3141  ;;  %v3640_v37 = vld [vmem:[%s5546_s21 + $0x1a8] sm:$0xff] }
 0x56a   : > { %3188 = vst.msk [vmem:[#allocation4 + $0x38] sm:$0xff] %vm1456_vm3, %v3142_v13  ;;  %5376 = vset.pattern.permute.xlu1 %v7733_v11  ;;  %2996 = vperm.xlu0 %5375, %v5878_v35   ;;  %v3639_v11 = vld [vmem:[%s5546_s21 + $0x1a0] sm:$0xff] }
 0x56b   : > { %2848 = vperm.xlu1 %5376, %v7687_v47   ;;  %5158 = vmatprep.subr.bf16.mxu1 %v5157_v41  ;;  %v5161_v56 = vpack.c.bf16 %v3640_v37, %v3639_v11  ;;  %v5163_v41 = vpack.c.bf16 %v3624_v29, %v3623_v1  ;;  %v3641_v37 = vld [vmem:[%s5546_s21 + $0x1b0] sm:$0xff]  ;;  %v2691_v1 = vmul.f32 %v6692_v14, %v5940_v51  ;;  %v3643_v29 = vld [vmem:[%s5546_s21 + $0x1c0] sm:$0xff] }
 0x56c   : > { %5160 = vmatpush3.bf16.msra.mxu1 %v5159_v49  ;;  %v3642_v49 = vld [vmem:[%s5546_s21 + $0x1b8] sm:$0xff]  ;;  %v3427_v14 = vmul.f32 %v6718_v36, %v5940_v51  ;;  %v2851_v36 = vmul.f32 %v6724_v23, %v5940_v51  ;;  %v3118_v23 = vmul.f32 %v6001_v15, %v6824_v42 }
 0x56d   : > { %v3302_v2 = vpop.permute.xlu0 %3301  ;;  %v2825_v6 = vpop.permute.xlu1 %2824  ;;  %5162 = vmatprep.subr.bf16.mxu1 %v5161_v56  ;;  %v5165_v11 = vpack.c.bf16 %v3642_v49, %v3641_v37  ;;  %v3628_v37 = vld [vmem:[%s5546_s21 + $0x148] sm:$0xff] }
 0x56e   : > { %3348 = vst.msk [vmem:[#allocation4 + $0x38] sm:$0xff] %vm1617_vm4, %v3302_v2  ;;  %v2860_v13 = vmul.f32 %v5990_v9, %v2825_v6 }
 0x56f   : > { %5377 = vset.pattern.permute.xlu1 %v7752_v27 }
 0x570   : > { %2956 = vperm.xlu1 %5377, %v7724_v32   ;;  %2901 = vrot.lane.b32.xlu0 %v2860_v13, %s5415_s15  ;;  %v3625_v32 = vld [vmem:[%s5546_s21 + $0x130] sm:$0xff]  ;;  %v3626_v13 = vld [vmem:[%s5546_s21 + $0x138] sm:$0xff] }
 0x571   : > { %v2965_v52 = vpop.permute.xlu0 %2964  ;;  %5164 = vmatpush3.bf16.msra.mxu1 %v5163_v41  ;;  %v5167_v60 = vpack.c.bf16 %v3626_v13, %v3625_v32  ;;  %v3644_v41 = vld [vmem:[%s5546_s21 + $0x1c8] sm:$0xff]  ;;  %v3629_v13 = vld [vmem:[%s5546_s21 + $0x150] sm:$0xff] }
 0x572   : > { %v3015_v2 = vmul.f32 %v2965_v52, %v5968_v62  ;;  %v2509_v27 = vpop.permute.xlu1 %2508  ;;  %5166 = vmatprep.subr.bf16.mxu1 %v5165_v11  ;;  %v2701_v52 = vmul.f32 %v6744_v61, %v6005_v17  ;;  %v3645_v61 = vld [vmem:[%s5546_s21 + $0x1d0] sm:$0xff]  ;;  %v3646_v11 = vld [vmem:[%s5546_s21 + $0x1d8] sm:$0xff] }
 0x573   : > { %v2541_v6 = vmul.f32 %v2509_v27, %v6005_v17  ;;  %v5173_v32 = vpack.c.bf16 %v3646_v11, %v3645_v61 }
 0x574   : > { %3031 = vst.msk [vmem:[#allocation4 + $0x98] sm:$0xff] %vm627_vm1, %v3015_v2  ;;  %2563 = vrot.lane.b32.xlu1 %v2531_v24, %s5413_s14  ;;  %v5169_v24 = vpack.c.bf16 %v3644_v41, %v3643_v29  ;;  %v3627_v2 = vld [vmem:[%s5546_s21 + $0x140] sm:$0xff] }
 0x575   : > { %v6988_v56 = vpop.permute.xlu0 %2885  ;;  %2583 = vrot.lane.b32.xlu0 %v2541_v6, %s5413_s14  ;;  %5168 = vmatpush3.bf16.msra.mxu1 %v5167_v60  ;;  %v5171_v49 = vpack.c.bf16 %v3628_v37, %v3627_v2  ;;  %v3630_v60 = vld [vmem:[%s5546_s21 + $0x158] sm:$0xff]  ;;  %v3648_v2 = vld [vmem:[%s5546_s21 + $0x1e8] sm:$0xff] }
 0x576   : > { %5170 = vmatprep.subr.bf16.mxu1 %v5169_v24  ;;  %v5175_v29 = vpack.c.bf16 %v3630_v60, %v3629_v13  ;;  %v3647_v24 = vld [vmem:[%s5546_s21 + $0x1e0] sm:$0xff]  ;;  %v3649_v13 = vld [vmem:[%s5546_s21 + $0x1f0] sm:$0xff]  ;;  %v3650_v60 = vld [vmem:[%s5546_s21 + $0x1f8] sm:$0xff] }
 0x577   : > { %v6997_v27 = vpop.permute.xlu1 %3244  ;;  %v5177_v37 = vpack.c.bf16 %v3648_v2, %v3647_v24  ;;  %v3428_v2 = vmul.f32 %v5937_v50, %v6742_v21 }
 0x578   : > { %2723 = vrot.lane.b32.xlu1 %v2691_v1, %s5414_s29 }
 0x579   : > { %v2568_v6 = vpop.permute.xlu0 %2567  ;;  %2743 = vrot.lane.b32.xlu0 %v2701_v52, %s5414_s29  ;;  %5172 = vmatpush3.bf16.msra.mxu1 %v5171_v49  ;;  %v3631_v49 = vld [vmem:[%s5546_s21 + $0x160] sm:$0xff] }
 0x57a   : > { %2613 = vst.msk [vmem:[#allocation4 + $0x50] sm:$0xff] %vm1456_vm3, %v2568_v6  ;;  %5174 = vmatprep.subr.bf16.mxu1 %v5173_v32  ;;  %v3632_v6 = vld [vmem:[%s5546_s21 + $0x168] sm:$0xff]  ;;  %v2532_v32 = vmul.f32 %v5937_v50, %v6732_v4 }
 0x57c   : > { %3459 = vrot.lane.b32.xlu1 %v3427_v14, %s5415_s15  ;;  %v3405_v1 = vpop.permute.xlu1 %3404  ;;  %v5179_v14 = vpack.c.bf16 %v3632_v6, %v3631_v49 }
 0x57d   : > { %v3437_v41 = vmul.f32 %v3405_v1, %v6005_v17  ;;  %v2728_v52 = vpop.permute.xlu0 %2727  ;;  %5176 = vmatpush3.bf16.msra.mxu1 %v5175_v29  ;;  %v5181_v1 = vpack.c.bf16 %v3650_v60, %v3649_v13  ;;  %v3633_v29 = vld [vmem:[%s5546_s21 + $0x170] sm:$0xff]  ;;  %v7756_v60 = vmov 0  }
 0x57e   : > { %2773 = vst.msk [vmem:[#allocation4 + $0x50] sm:$0xff] %vm1617_vm4, %v2728_v52  ;;  %5178 = vmatprep.subr.bf16.mxu1 %v5177_v37 }
 0x57f   : > { %3479 = vrot.lane.b32.xlu0 %v3437_v41, %s5415_s15  ;;  %v3634_v41 = vld [vmem:[%s5546_s21 + $0x178] sm:$0xff] }
 0x580   : > { %2883 = vrot.lane.b32.xlu1 %v2851_v36, %s5415_s15  ;;  %v5183_v52 = vpack.c.bf16 %v3634_v41, %v3633_v29  ;;  %v2692_v36 = vmul.f32 %v5937_v50, %v6699_v30  ;;  %v3109_v30 = vmul.f32 %v6770_v0, %v5953_v10  ;;  %v2853_v29 = vmul.f32 %v6767_v58, %v5953_v10 }
 0x581   : > { %v7023_v61 = vpop.permute.xlu0 %3463  ;;  %v7025_v11 = vpop.permute.xlu1 %2828  ;;  %5180 = vmatpush3.bf16.msra.mxu1 %v5179_v14  ;;  %v2694_v58 = vmul.f32 %v5949_v53, %v6712_v33  ;;  %v3111_v33 = vmul.f32 %v6781_v19, %v5968_v62 }
 0x582   : > { %5182 = vmatprep.subr.bf16.mxu1 %v5181_v1 }
 0x583   : > { %3161 = vrot.lane.b32.xlu0 %v3118_v23, %s5413_s14 }
 0x584   : > { %2565 = vrot.lane.b32.xlu1 %v2532_v32, %s5413_s14  ;;  %v3269_v32 = vmul.f32 %v6758_v26, %v5953_v10 }
 0x585   : > { %v3146_v42 = vpop.permute.xlu0 %3145  ;;  %5184 = vmatpush3.bf16.msra.mxu1 %v5183_v52  ;;  %v2534_v52 = vmul.f32 %v5949_v53, %v6775_v55  ;;  %v3430_v55 = vmul.f32 %v5949_v53, %v6789_v43 }
 0x586   : > { %3190 = vst.msk [vmem:[#allocation4 + $0x78] sm:$0xff] %vm1456_vm3, %v3146_v42  ;;  %v7038_v24 = vpop.permute.xlu1 %2512 }
 0x588   : > { %2725 = vrot.lane.b32.xlu1 %v2692_v36, %s5414_s29 }
 0x589   : > { %v3306_v4 = vpop.permute.xlu0 %3305 }
 0x58a   : > { %3350 = vst.msk [vmem:[#allocation4 + $0x78] sm:$0xff] %vm1617_vm4, %v3306_v4 }
 0x58b   : > { %v3249_v37 = vpop.permute.xlu1 %3248 }
 0x58c   : > { %v3278_v49 = vmul.f32 %v6001_v15, %v3249_v37  ;;  %3461 = vrot.lane.b32.xlu1 %v3428_v2, %s5415_s15  ;;  %v7757_v2 = vld [vmem:[#allocation23_spill] sm:$0xff] }
 0x58d   : > { %v2973_v6 = vpop.permute.xlu0 %2972 }
 0x58e   : > { %v3017_v14 = vmul.f32 %v2973_v6, %v5981_v5  ;;  %3321 = vrot.lane.b32.xlu0 %v3278_v49, %s5414_s29  ;;  %v7758_v6 = vld [vmem:[#allocation12_spill] sm:$0xff] }
 0x590   : > { %3033 = vst.msk [vmem:[#allocation4 + $0xd8] sm:$0xff] %vm627_vm1, %v3017_v14  ;;  %3143 = vrot.lane.b32.xlu1 %v3109_v30, %s5413_s14  ;;  %v7052_v21 = vpop.permute.xlu1 %3408  ;;  %v2703_v30 = vmul.f32 %v7758_v6, %v7757_v2 }
 0x591   : > { %v7054_v23 = vpop.permute.xlu0 %2889 }
 0x592   : > { %3004 = vperm.xlu0 %5375, %v7684_v18  }
 0x594   : > { %3303 = vrot.lane.b32.xlu1 %v3269_v32, %s5414_s29  ;;  %v7759_v32 = vld [vmem:[#allocation62_spill] sm:$0xff] }
 0x595   : > { %v2572_v0 = vpop.permute.xlu0 %2571  ;;  %v2833_v13 = vpop.permute.xlu1 %2832 }
 0x596   : > { %2615 = vst.msk [vmem:[#allocation4 + $0x90] sm:$0xff] %vm1456_vm3, %v2572_v0  ;;  %5378 = vset.pattern.permute.xlu0 %v7756_v60  ;;  %v2862_v19 = vmul.f32 %v6001_v15, %v2833_v13 }
 0x597   : > { %1206 = vperm.xlu0 %5378, %v7726_v45  }
 0x598   : > { %2968 = vperm.xlu1 %5377, %v7727_v44  }
 0x599   : > { %v2732_v1 = vpop.permute.xlu0 %2731 }
 0x59a   : > { %2775 = vst.msk [vmem:[#allocation4 + $0x90] sm:$0xff] %vm1617_vm4, %v2732_v1  ;;  %v2517_v26 = vpop.permute.xlu1 %2516  ;;  %v7760_v1 = vld [vmem:[#allocation9_spill] sm:$0xff] }
 0x59b   : > { %1221 = vperm.xlu0 %5378, %v7728_v40   ;;  %v2543_v37 = vmul.f32 %v2517_v26, %v7757_v2  ;;  %v7761_v26 = vld [vmem:[#allocation63_spill] sm:$0xff] }
 0x59c   : > { %2887 = vrot.lane.b32.xlu1 %v2853_v29, %s5415_s15  ;;  %v2696_v29 = vmul.f32 %v5964_v16, %v7760_v1 }
 0x59d   : > { %v7069_v41 = vpop.permute.xlu0 %3467 }
 0x59f   : > { %1231 = vperm.xlu0 %5378, %v7730_v59   ;;  %v7074_v45 = vpop.permute.xlu1 %3252 }
 0x5a0   : > { %2569 = vrot.lane.b32.xlu1 %v2534_v52, %s5413_s14  ;;  %v7762_v52 = vld [vmem:[#allocation22_spill] sm:$0xff] }
 0x5a1   : > { %v7077_v44 = vpop.permute.xlu0 %3149 }
 0x5a3   : > { %1241 = vperm.xlu0 %5378, %v5865_v38  }
 0x5a4   : > { %2729 = vrot.lane.b32.xlu1 %v2694_v58, %s5414_s29  ;;  %v3413_v40 = vpop.permute.xlu1 %3412  ;;  %v3120_v58 = vmul.f32 %v7762_v52, %v7761_v26 }
 0x5a5   : > { %v7083_v42 = vpop.permute.xlu0 %3309 }
 0x5a7   : > { %1251 = vperm.xlu0 %5378, %v5873_v28   ;;  %v3271_v28 = vmul.f32 %v6813_v20, %v5968_v62  ;;  %v2855_v20 = vmul.f32 %v6828_v31, %v5968_v62  ;;  %v3439_v31 = vmul.f32 %v3413_v40, %v7757_v2 }
 0x5a8   : > { %3465 = vrot.lane.b32.xlu1 %v3430_v55, %s5415_s15 }
 0x5a9   : > { %v2981_v59 = vpop.permute.xlu0 %2980  ;;  %v7089_v36 = vpop.permute.xlu1 %2836 }
 0x5aa   : > { %v3019_v38 = vmul.f32 %v2981_v59, %v5992_v12  ;;  %v3432_v59 = vmul.f32 %v5964_v16, %v6854_v39 }
 0x5ab   : > { %1261 = vperm.xlu0 %5378, %v5878_v35  }
 0x5ac   : > { %3035 = vst.msk [vmem:[#allocation4 + $0x118] sm:$0xff] %vm627_vm1, %v3019_v38  ;;  %3147 = vrot.lane.b32.xlu1 %v3111_v33, %s5413_s14 }
 0x5ad   : > { %v7097_v4 = vpop.permute.xlu0 %2893 }
 0x5ae   : > { %v7101_v53 = vpop.permute.xlu1 %2520 }
 0x5af   : > { %1271 = vperm.xlu0 %5378, %v7684_v18  }
 0x5b0   : > { %3307 = vrot.lane.b32.xlu1 %v3271_v28, %s5414_s29  ;;  %v7763_v28 = vld [vmem:[#allocation13_spill] sm:$0xff] }
 0x5b1   : > { %v2576_v43 = vpop.permute.xlu0 %2575 }
 0x5b2   : > { %2617 = vst.msk [vmem:[#allocation4 + $0xd0] sm:$0xff] %vm1456_vm3, %v2576_v43 }
 0x5b3   : > { %2905 = vrot.lane.b32.xlu0 %v2862_v19, %s5415_s15  ;;  %v3257_v35 = vpop.permute.xlu1 %3256  ;;  %v3113_v19 = vmul.f32 %v7763_v28, %v5981_v5 }
 0x5b4   : > { %2976 = vperm.xlu1 %5377, %v7729_v7   ;;  %v2536_v7 = vmul.f32 %v5964_v16, %v7759_v32  ;;  %v3280_v33 = vmul.f32 %v7762_v52, %v3257_v35  ;;  %v3273_v35 = vmul.f32 %v6874_v25, %v5981_v5  ;;  %v7765_v25 = vld [vmem:[#allocation14_spill] sm:$0xff] }
 0x5b5   : > { %v2736_v49 = vpop.permute.xlu0 %2735 }
 0x5b6   : > { %2777 = vst.msk [vmem:[#allocation4 + $0xd0] sm:$0xff] %vm1617_vm4, %v2736_v49 }
 0x5b7   : > { %2587 = vrot.lane.b32.xlu0 %v2543_v37, %s5413_s14 }
 0x5b8   : > { %2891 = vrot.lane.b32.xlu1 %v2855_v20, %s5415_s15  ;;  %v3417_v18 = vpop.permute.xlu1 %3416 }
 0x5b9   : > { %v7117_v14 = vpop.permute.xlu0 %3471  ;;  %v3440_v49 = vmul.f32 %v7762_v52, %v3417_v18  ;;  %v7764_v18 = vld [vmem:[#allocation25_spill] sm:$0xff] }
 0x5ba   : > { %v3121_v6 = vmul.f32 %v6844_v63, %v7764_v18 }
 0x5bb   : > { %2747 = vrot.lane.b32.xlu0 %v2703_v30, %s5414_s29 }
 0x5bc   : > { %2573 = vrot.lane.b32.xlu1 %v2536_v7, %s5413_s14 }
 0x5bd   : > { %v7124_v0 = vpop.permute.xlu0 %3153  ;;  %v7126_v13 = vpop.permute.xlu1 %2840 }
 0x5bf   : > { %3483 = vrot.lane.b32.xlu0 %v3439_v31, %s5415_s15 }
 0x5c0   : > { %2733 = vrot.lane.b32.xlu1 %v2696_v29, %s5414_s29  ;;  %v2538_v29 = vmul.f32 %v5978_v3, %v6897_v34  ;;  %v3434_v34 = vmul.f32 %v5978_v3, %v6909_v57 }
 0x5c1   : > { %v7134_v55 = vpop.permute.xlu0 %3313 }
 0x5c2   : > { %v7138_v40 = vpop.permute.xlu1 %2524 }
 0x5c3   : > { %3165 = vrot.lane.b32.xlu0 %v3120_v58, %s5413_s14 }
 0x5c4   : > { %3469 = vrot.lane.b32.xlu1 %v3432_v59, %s5415_s15  ;;  %v7768_v59 = vld [vmem:[#allocation24_spill] sm:$0xff] }
 0x5c5   : > { %v2989_v38 = vpop.permute.xlu0 %2988 }
 0x5c6   : > { %v3021_v43 = vmul.f32 %v2989_v38, %v6005_v17  ;;  %v7769_v38 = vld [vmem:[#allocation10_spill] sm:$0xff] }
 0x5c7   : > { %3325 = vrot.lane.b32.xlu0 %v3280_v33, %s5414_s29  ;;  %v2949_v37 = vpop.permute.xlu1 %2948  ;;  %v2698_v28 = vmul.f32 %v5978_v3, %v7769_v38  ;;  %v2540_v38 = vmul.f32 %v5990_v9, %v6943_v54  ;;  %v7774_v54 = vld [vmem:[#allocation69_spill] sm:$0xff] }
 0x5c8   : > { %3037 = vst.msk [vmem:[#allocation4 + $0x158] sm:$0xff] %vm627_vm1, %v3021_v43  ;;  %v3011_v39 = vmul.f32 %v2949_v37, %v5940_v51  ;;  %3151 = vrot.lane.b32.xlu1 %v3113_v19, %s5413_s14 }
 0x5c9   : > { %v7151_v20 = vpop.permute.xlu0 %2897 }
 0x5ca   : > { %3027 = vst.msk [vmem:[#allocation4 + $0x18] sm:$0xff] %vm627_vm1, %v3011_v39 }
 0x5cb   : > { %3187 = vst.msk [vmem:[#allocation4 + $0x18] sm:$0xff] %vm1456_vm3, %v6938_v22  ;;  %3485 = vrot.lane.b32.xlu0 %v3440_v49, %s5415_s15  ;;  %v7766_v22 = vld [vmem:[#allocation64_spill] sm:$0xff] }
 0x5cc   : > { %3347 = vst.msk [vmem:[#allocation4 + $0x18] sm:$0xff] %vm1617_vm4, %v6946_v48  ;;  %3311 = vrot.lane.b32.xlu1 %v3273_v35, %s5414_s29  ;;  %v7162_v51 = vpop.permute.xlu1 %2684  ;;  %v3281_v32 = vmul.f32 %v7766_v22, %v7764_v18  ;;  %v7767_v48 = vld [vmem:[#allocation67_spill] sm:$0xff]  ;;  %v7770_v49 = vld [vmem:[#allocation20_spill] sm:$0xff]  ;;  %v3275_v22 = vmul.f32 %v6923_v46, %v5992_v12  ;;  %v2859_v46 = vmul.f32 %v6936_v8, %v5992_v12 }
 0x5cd   : > { %v2580_v30 = vpop.permute.xlu0 %2579  ;;  %v2857_v1 = vmul.f32 %v7767_v48, %v5981_v5  ;;  %v3115_v35 = vmul.f32 %v7770_v49, %v5992_v12  ;;  %v7773_v8 = vld [vmem:[#allocation11_spill] sm:$0xff] }
 0x5ce   : > { %2619 = vst.msk [vmem:[#allocation4 + $0x110] sm:$0xff] %vm1456_vm3, %v2580_v30 }
 0x5cf   : > { %3167 = vrot.lane.b32.xlu0 %v3121_v6, %s5413_s14  ;;  %v7771_v6 = vld [vmem:[#allocation66_spill] sm:$0xff] }
 0x5d0   : > { %2984 = vperm.xlu1 %5377, %v7765_v25   ;;  %v3442_v30 = vmul.f32 %v7768_v59, %v7771_v6 }
 0x5d1   : > { %v2740_v7 = vpop.permute.xlu0 %2739  ;;  %v3421_v31 = vpop.permute.xlu1 %3420 }
 0x5d2   : > { %2779 = vst.msk [vmem:[#allocation4 + $0x110] sm:$0xff] %vm1617_vm4, %v2740_v7  ;;  %v3441_v63 = vmul.f32 %v3421_v31, %v7764_v18 }
 0x5d3   : > { %3327 = vrot.lane.b32.xlu0 %v3281_v32, %s5414_s29  ;;  %v4237_v32 = vld [vmem:[%s7591_s4] sm:$0xff] }
 0x5d4   : > { %2895 = vrot.lane.b32.xlu1 %v2857_v1, %s5415_s15  ;;  %v7772_v1 = vld [vmem:[#allocation15_spill] sm:$0xff] }
 0x5d5   : > { %v7181_v58 = vpop.permute.xlu0 %3475 }
 0x5d6   : > { %v3105_v26 = vpop.permute.xlu1 %3104 }
 0x5d7   : > { %3487 = vrot.lane.b32.xlu0 %v3441_v63, %s5415_s15  ;;  %v3122_v33 = vmul.f32 %v7768_v59, %v3105_v26 }
 0x5d8   : > { %2577 = vrot.lane.b32.xlu1 %v2538_v29, %s5413_s14 }
 0x5d9   : > { %v7192_v43 = vpop.permute.xlu0 %3157 }
 0x5db   : > { %3169 = vrot.lane.b32.xlu0 %v3122_v33, %s5413_s14  ;;  %v7187_v19 = vpop.permute.xlu1 %2528 }
 0x5dc   : > { %2737 = vrot.lane.b32.xlu1 %v2698_v28, %s5414_s29 }
 0x5dd   : > { %v7202_v25 = vpop.permute.xlu0 %3317 }
 0x5e0   : > { %3473 = vrot.lane.b32.xlu1 %v3434_v34, %s5415_s15  ;;  %v3265_v37 = vpop.permute.xlu1 %3264 }
 0x5e1   : > { %v3282_v39 = vmul.f32 %v7768_v59, %v3265_v37  ;;  %v2700_v37 = vmul.f32 %v5990_v9, %v7773_v8 }
 0x5e3   : > { %3329 = vrot.lane.b32.xlu0 %v3282_v39, %s5414_s29  ;;  %v3436_v39 = vmul.f32 %v5990_v9, %v7774_v54 }
 0x5e4   : > { %3155 = vrot.lane.b32.xlu1 %v3115_v35, %s5413_s14  ;;  %v7775_v35 = vld [vmem:[#allocation60_spill] sm:$0xff] }
 0x5e5   : > { %v7204_v57 = vpop.permute.xlu1 %2688  ;;  %v3117_v6 = vmul.f32 %v7775_v35, %v6005_v17 }
 0x5e7   : > { %3489 = vrot.lane.b32.xlu0 %v3442_v30, %s5415_s15 }
 0x5e8   : > { %3315 = vrot.lane.b32.xlu1 %v3275_v22, %s5414_s29 }
 0x5e9   : > { %v2997_v7 = vpop.permute.xlu0 %2996 }
 0x5ea   : > { %v3023_v31 = vmul.f32 %v2997_v7, %v7757_v2  ;;  %v7214_v48 = vpop.permute.xlu1 %2848 }
 0x5eb   : > { %4241 = vperm.xlu0 %5378, %v4237_v32   ;;  %v3277_v32 = vmul.f32 %v6997_v27, %v6005_v17  ;;  %v2861_v27 = vmul.f32 %v7025_v11, %v6005_v17 }
 0x5ec   : > { %3039 = vst.msk [vmem:[#allocation4 + $0x198] sm:$0xff] %vm627_vm1, %v3023_v31  ;;  %2992 = vperm.xlu1 %5377, %v7772_v1  }
 0x5ed   : > { %v7218_v63 = vpop.permute.xlu0 %2901 }
 0x5ef   : > { %v2957_v29 = vpop.permute.xlu1 %2956 }
 0x5f0   : > { %v3013_v26 = vmul.f32 %v2957_v29, %v5953_v10  ;;  %2899 = vrot.lane.b32.xlu1 %v2859_v46, %s5415_s15 }
 0x5f1   : > { %v2584_v33 = vpop.permute.xlu0 %2583 }
 0x5f2   : > { %3029 = vst.msk [vmem:[#allocation4 + $0x58] sm:$0xff] %vm627_vm1, %v3013_v26  ;;  %v7776_v26 = vld [vmem:[#allocation16_spill] sm:$0xff] }
 0x5f3   : > { %2621 = vst.msk [vmem:[#allocation4 + $0x150] sm:$0xff] %vm1456_vm3, %v2584_v33  ;;  %v2564_v28 = vpop.permute.xlu1 %2563 }
 0x5f4   : > { %2611 = vst.msk [vmem:[#allocation4 + $0x10] sm:$0xff] %vm1456_vm3, %v2564_v28  ;;  %2581 = vrot.lane.b32.xlu1 %v2540_v38, %s5413_s14  ;;  %v2542_v28 = vmul.f32 %v6001_v15, %v7038_v24 }
 0x5f5   : > { %v2744_v34 = vpop.permute.xlu0 %2743 }
 0x5f6   : > { %2781 = vst.msk [vmem:[#allocation4 + $0x150] sm:$0xff] %vm1617_vm4, %v2744_v34 }
 0x5f7   : > { %v2724_v10 = vpop.permute.xlu1 %2723 }
 0x5f8   : > { %2771 = vst.msk [vmem:[#allocation4 + $0x10] sm:$0xff] %vm1617_vm4, %v2724_v10  ;;  %2741 = vrot.lane.b32.xlu1 %v2700_v37, %s5414_s29 }
 0x5f9   : > { %v7243_v22 = vpop.permute.xlu0 %3479 }
 0x5fb   : > { %v3460_v49 = vpop.permute.xlu1 %3459 }
 0x5fc   : > { %3507 = vst.msk [vmem:[#allocation4 + $0x18] sm:$0xff] %vm1778_vm5, %v3460_v49  ;;  %3477 = vrot.lane.b32.xlu1 %v3436_v39, %s5415_s15  ;;  %v3438_v39 = vmul.f32 %v6001_v15, %v7052_v21  ;;  %v7780_v21 = vld [vmem:[#allocation26_spill] sm:$0xff] }
 0x5fd   : > { %v7249_v1 = vpop.permute.xlu0 %3161 }
 0x5ff   : > { %v2884_v30 = vpop.permute.xlu1 %2883 }
 0x600   : > { %2931 = vst.msk [vmem:[#allocation4 + $0x10] sm:$0xff] %vm1778_vm5, %v2884_v30  ;;  %3159 = vrot.lane.b32.xlu1 %v3117_v6, %s5413_s14 }
 0x601   : > { %v7259_v38 = vpop.permute.xlu0 %3321 }
 0x603   : > { %v2566_v7 = vpop.permute.xlu1 %2565  ;;  %v3526_v31 = vld [vmem:[#allocation4 + $0x18] sm:$0xff] }
 0x604   : > { %2612 = vst.msk [vmem:[#allocation4 + $0x30] sm:$0xff] %vm1456_vm3, %v2566_v7  ;;  %3319 = vrot.lane.b32.xlu1 %v3277_v32, %s5414_s29  ;;  %4057 = vmatprep.mubr.f32.mxu1 %v3526_v31  ;;  %v7778_v32 = vld [vmem:[#allocation61_spill] sm:$0xff] }
 0x605   : > { %v3119_v7 = vmul.f32 %v7778_v32, %v7757_v2  ;;  %v7779_v31 = vld [vmem:[#allocation21_spill] sm:$0xff] }
 0x607   : > { %v2726_v46 = vpop.permute.xlu1 %2725  ;;  %v3525_v29 = vld [vmem:[#allocation4 + $0x10] sm:$0xff] }
 0x608   : > { %2772 = vst.msk [vmem:[#allocation4 + $0x30] sm:$0xff] %vm1617_vm4, %v2726_v46  ;;  %3000 = vperm.xlu1 %5377, %v7776_v26   ;;  %4058 = vmatmul.mubr.f32.vlgmr.msra.gmra.mrb[16].mxu1 %v3525_v29  ;;  %v7781_v46 = vld [vmem:[#allocation17_spill] sm:$0xff]  ;;  %v7782_v26 = vld [vmem:[#allocation30_spill] sm:$0xff] }
 0x609   : > { %2932 = vst.msk [vmem:[#allocation4 + $0x30] sm:$0xff] %vm1778_vm5, %v6988_v56  ;;  %v7777_v56 = vld [vmem:[#allocation18_spill] sm:$0xff] }
 0x60a   : > { %v2702_v37 = vmul.f32 %v6001_v15, %v7777_v56 }
 0x60b   : > { %v3462_v33 = vpop.permute.xlu1 %3461 }
 0x60c   : > { %3508 = vst.msk [vmem:[#allocation4 + $0x38] sm:$0xff] %vm1778_vm5, %v3462_v33  ;;  %2903 = vrot.lane.b32.xlu1 %v2861_v27, %s5415_s15  ;;  %v7783_v27 = vld [vmem:[#allocation40_spill] sm:$0xff] }
 0x60f   : > { %v3144_v34 = vpop.permute.xlu1 %3143 }
 0x610   : > { %3189 = vst.msk [vmem:[#allocation4 + $0x58] sm:$0xff] %vm1456_vm3, %v3144_v34  ;;  %2585 = vrot.lane.b32.xlu1 %v2542_v28, %s5413_s14  ;;  %v3529_v24 = vld [vmem:[#allocation4 + $0x30] sm:$0xff]  ;;  %v7784_v28 = vld [vmem:[#allocation33_spill] sm:$0xff] }
 0x611   : > { %v3005_v8 = vpop.permute.xlu0 %3004 }
 0x612   : > { %v3025_v11 = vmul.f32 %v3005_v8, %v7764_v18  ;;  %v7786_v8 = vld [vmem:[#allocation48_spill] sm:$0xff] }
 0x613   : > { %v3304_v10 = vpop.permute.xlu1 %3303  ;;  %v3530_v54 = vld [vmem:[#allocation4 + $0x38] sm:$0xff] }
 0x614   : > { %3041 = vst.msk [vmem:[#allocation4 + $0x1d8] sm:$0xff] %vm627_vm1, %v3025_v11  ;;  %2745 = vrot.lane.b32.xlu1 %v2702_v37, %s5414_s29  ;;  %4062 = vmatprep.mubr.f32.mxu1 %v3530_v54  ;;  %v3532_v54 = vld [vmem:[#allocation4 + $0x48] sm:$0xff] }
 0x615   : > { %3349 = vst.msk [vmem:[#allocation4 + $0x58] sm:$0xff] %vm1617_vm4, %v3304_v10  ;;  %4063 = vmatmul.mubr.f32.gmra.mrb[18].mxu1 %v3529_v24  ;;  %v7787_v10 = vld [vmem:[#allocation41_spill] sm:$0xff]  ;;  %v7788_v24 = vld [vmem:[#allocation46_spill] sm:$0xff] }
 0x616   : > { %3509 = vst.msk [vmem:[#allocation4 + $0x58] sm:$0xff] %vm1778_vm5, %v7023_v61  ;;  %v1207_v49 = vpop.permute.xlu0 %1206 }
 0x617   : > { %v1280_v35 = vmul.f32 %v5937_v50, %v1207_v49  ;;  %v2969_v6 = vpop.permute.xlu1 %2968  ;;  %v7789_v49 = vld [vmem:[#allocation51_spill] sm:$0xff] }
 0x618   : > { %v3016_v30 = vmul.f32 %v5964_v16, %v2969_v6  ;;  %3481 = vrot.lane.b32.xlu1 %v3438_v39, %s5415_s15  ;;  %v3531_v6 = vld [vmem:[#allocation4 + $0x40] sm:$0xff] }
 0x619   : > { %1297 = vst.msk [vmem:[#allocation4 + $0x20] sm:$0xff] %vm627_vm1, %v1280_v35 }
 0x61a   : > { %1458 = vst.msk [vmem:[#allocation4 + $0x20] sm:$0xff] %vm1456_vm3, %v7779_v31  ;;  %v1222_v61 = vpop.permute.xlu0 %1221 }
 0x61b   : > { %3032 = vst.msk [vmem:[#allocation4 + $0xb8] sm:$0xff] %vm627_vm1, %v3016_v30  ;;  %v1283_v50 = vmul.f32 %v1222_v61, %v5968_v62  ;;  %v2888_v16 = vpop.permute.xlu1 %2887  ;;  %v7790_v30 = vld [vmem:[#allocation49_spill] sm:$0xff] }
 0x61c   : > { %1619 = vst.msk [vmem:[#allocation4 + $0x20] sm:$0xff] %vm1617_vm4, %v7780_v21  ;;  %3163 = vrot.lane.b32.xlu1 %v3119_v7, %s5413_s14  ;;  %v7792_v7 = vld [vmem:[#allocation53_spill] sm:$0xff]  ;;  %v3535_v21 = vld [vmem:[#allocation4 + $0x60] sm:$0xff] }
 0x61d   : > { %3192 = vst.msk [vmem:[#allocation4 + $0xb8] sm:$0xff] %vm1456_vm3, %v7077_v44  ;;  %v3534_v29 = vld [vmem:[#allocation4 + $0x58] sm:$0xff]  ;;  %v3279_v44 = vmul.f32 %v7074_v45, %v7757_v2  ;;  %v7785_v45 = vld [vmem:[#allocation37_spill] sm:$0xff] }
 0x61e   : > { %1780 = vst.msk [vmem:[#allocation4 + $0x20] sm:$0xff] %vm1778_vm5, %v7781_v46  ;;  %2933 = vst.msk [vmem:[#allocation4 + $0x50] sm:$0xff] %vm1778_vm5, %v2888_v16  ;;  %4067 = vmatprep.mubr.f32.mxu1 %v3534_v29  ;;  %v1232_v62 = vpop.permute.xlu0 %1231  ;;  %v7795_v46 = vld [vmem:[#allocation54_spill] sm:$0xff]  ;;  %v7796_v29 = vld [vmem:[#allocation56_spill] sm:$0xff] }
 0x61f   : > { %3352 = vst.msk [vmem:[#allocation4 + $0xb8] sm:$0xff] %vm1617_vm4, %v7083_v42  ;;  %v1285_v42 = vmul.f32 %v1232_v62, %v5981_v5  ;;  %v2570_v33 = vpop.permute.xlu1 %2569 }
 0x620   : > { %1300 = vst.msk [vmem:[#allocation4 + $0x80] sm:$0xff] %vm627_vm1, %v1283_v50  ;;  %3323 = vrot.lane.b32.xlu1 %v3279_v44, %s5414_s29  ;;  %v7793_v50 = vld [vmem:[#allocation52_spill] sm:$0xff] }
 0x621   : > { %1461 = vst.msk [vmem:[#allocation4 + $0x80] sm:$0xff] %vm1456_vm3, %v7782_v26  ;;  %2614 = vst.msk [vmem:[#allocation4 + $0x70] sm:$0xff] %vm1456_vm3, %v2570_v33  ;;  %v3544_v33 = vld [vmem:[#allocation4 + $0xa8] sm:$0xff] }
 0x622   : > { %1622 = vst.msk [vmem:[#allocation4 + $0x80] sm:$0xff] %vm1617_vm4, %v7783_v27  ;;  %v1242_v34 = vpop.permute.xlu0 %1241 }
 0x623   : > { %1783 = vst.msk [vmem:[#allocation4 + $0x80] sm:$0xff] %vm1778_vm5, %v7784_v28  ;;  %v1287_v56 = vmul.f32 %v1242_v34, %v5992_v12  ;;  %v2730_v5 = vpop.permute.xlu1 %2729  ;;  %v2863_v12 = vmul.f32 %v7089_v36, %v7757_v2  ;;  %v2544_v36 = vmul.f32 %v7762_v52, %v7101_v53  ;;  %v7794_v53 = vld [vmem:[#allocation19_spill] sm:$0xff]  ;;  %v7798_v34 = vld [vmem:[#allocation57_spill] sm:$0xff] }
 0x624   : > { %1302 = vst.msk [vmem:[#allocation4 + $0xc0] sm:$0xff] %vm627_vm1, %v1285_v42  ;;  %3008 = vperm.xlu1 %5377, %v7687_v47   ;;  %v2704_v16 = vmul.f32 %v7762_v52, %v7794_v53  ;;  %v7797_v42 = vld [vmem:[#allocation55_spill] sm:$0xff]  ;;  %v2866_v53 = vmul.f32 %v7768_v59, %v7214_v48 }
 0x625   : > { %1463 = vst.msk [vmem:[#allocation4 + $0xc0] sm:$0xff] %vm1456_vm3, %v7785_v45  ;;  %v3527_v37 = vld [vmem:[#allocation4 + $0x20] sm:$0xff]  ;;  %v3533_v11 = vld [vmem:[#allocation4 + $0x50] sm:$0xff]  ;;  %v2864_v45 = vmul.f32 %v7762_v52, %v7126_v13  ;;  %v3548_v13 = vld [vmem:[#allocation4 + $0xc8] sm:$0xff] }
 0x626   : > { %1624 = vst.msk [vmem:[#allocation4 + $0xc0] sm:$0xff] %vm1617_vm4, %v7786_v8  ;;  %2774 = vst.msk [vmem:[#allocation4 + $0x70] sm:$0xff] %vm1617_vm4, %v2730_v5  ;;  %3918 = vmatmul.mubr.f32.gmra.mrb[18].mxu0 %v3527_v37  ;;  %4068 = vmatmul.mubr.f32.gmra.mrb[20].mxu1 %v3533_v11  ;;  %v1252_v39 = vpop.permute.xlu0 %1251  ;;  %v3543_v37 = vld [vmem:[#allocation4 + $0xa0] sm:$0xff]  ;;  %v7800_v11 = vld [vmem:[#allocation58_spill] sm:$0xff] }
 0x627   : > { %1785 = vst.msk [vmem:[#allocation4 + $0xc0] sm:$0xff] %vm1778_vm5, %v7787_v10  ;;  %2934 = vst.msk [vmem:[#allocation4 + $0x70] sm:$0xff] %vm1778_vm5, %v7054_v23  ;;  %3922 = vmatprep.mubr.f32.mxu0 %v3532_v54  ;;  %v1289_v47 = vmul.f32 %v1252_v39, %v6005_v17  ;;  %v3466_v35 = vpop.permute.xlu1 %3465  ;;  %v3536_v23 = vld [vmem:[#allocation4 + $0x68] sm:$0xff]  ;;  %v7791_v17 = vld [vmem:[#allocation50_spill] sm:$0xff]  ;;  %v2545_v10 = vmul.f32 %v7138_v40, %v7764_v18  ;;  %v2705_v39 = vmul.f32 %v7162_v51, %v7764_v18 }
 0x628   : > { %1304 = vst.msk [vmem:[#allocation4 + $0x100] sm:$0xff] %vm627_vm1, %v1287_v56  ;;  %2907 = vrot.lane.b32.xlu1 %v2863_v12, %s5415_s15  ;;  %v7799_v56 = vld [vmem:[#allocation59_spill] sm:$0xff] }
 0x629   : > { %1465 = vst.msk [vmem:[#allocation4 + $0x100] sm:$0xff] %vm1456_vm3, %v7788_v24  ;;  %5379 = vset.pattern.permute.xlu1 %v7756_v60  ;;  %v3540_v60 = vld [vmem:[#allocation4 + $0x88] sm:$0xff] }
 0x62a   : > { %1626 = vst.msk [vmem:[#allocation4 + $0x100] sm:$0xff] %vm1617_vm4, %v7789_v49  ;;  %3923 = vmatmul.mubr.f32.gmra.mrb[20].mxu0 %v3531_v6  ;;  %v1262_v32 = vpop.permute.xlu0 %1261  ;;  %v3539_v62 = vld [vmem:[#allocation4 + $0x80] sm:$0xff] }
 0x62b   : > { %1787 = vst.msk [vmem:[#allocation4 + $0x100] sm:$0xff] %vm1778_vm5, %v7790_v30  ;;  %3510 = vst.msk [vmem:[#allocation4 + $0x78] sm:$0xff] %vm1778_vm5, %v3466_v35  ;;  %3927 = vmatprep.mubr.f32.mxu0 %v3536_v23  ;;  %v1291_v31 = vmul.f32 %v1262_v32, %v7757_v2  ;;  %v3148_v61 = vpop.permute.xlu1 %3147  ;;  %v7801_v35 = vld [vmem:[#allocation65_spill] sm:$0xff]  ;;  %v2546_v32 = vmul.f32 %v7768_v59, %v7187_v19 }
 0x62c   : > { %1306 = vst.msk [vmem:[#allocation4 + $0x140] sm:$0xff] %vm627_vm1, %v1289_v47  ;;  %2589 = vrot.lane.b32.xlu1 %v2544_v36, %s5413_s14  ;;  %v3551_v47 = vld [vmem:[#allocation4 + $0xe0] sm:$0xff]  ;;  %v2865_v6 = vmul.f32 %v7801_v35, %v7764_v18  ;;  %v3568_v19 = vld [vmem:[#allocation4 + $0x168] sm:$0xff] }
 0x62d   : > { %1467 = vst.msk [vmem:[#allocation4 + $0x140] sm:$0xff] %vm1456_vm3, %v7791_v17  ;;  %3191 = vst.msk [vmem:[#allocation4 + $0x98] sm:$0xff] %vm1456_vm3, %v3148_v61  ;;  %v3560_v17 = vld [vmem:[#allocation4 + $0x128] sm:$0xff] }
 0x62e   : > { %1628 = vst.msk [vmem:[#allocation4 + $0x140] sm:$0xff] %vm1617_vm4, %v7792_v7  ;;  %3928 = vmatmul.mubr.f32.gmra.mrb[22].mxu0 %v3535_v21  ;;  %v1272_v2 = vpop.permute.xlu0 %1271  ;;  %v3537_v28 = vld [vmem:[#allocation4 + $0x70] sm:$0xff]  ;;  %v3547_v24 = vld [vmem:[#allocation4 + $0xc0] sm:$0xff]  ;;  %v3564_v61 = vld [vmem:[#allocation4 + $0x148] sm:$0xff]  ;;  %v2706_v21 = vmul.f32 %v7768_v59, %v7204_v57 }
 0x62f   : > { %1789 = vst.msk [vmem:[#allocation4 + $0x140] sm:$0xff] %vm1778_vm5, %v7793_v50  ;;  %3932 = vmatprep.mubr.f32.mxu0 %v3540_v60  ;;  %v1293_v44 = vmul.f32 %v1272_v2, %v7764_v18  ;;  %v3308_v26 = vpop.permute.xlu1 %3307  ;;  %v3567_v2 = vld [vmem:[#allocation4 + $0x160] sm:$0xff]  ;;  %v3572_v57 = vld [vmem:[#allocation4 + $0x188] sm:$0xff] }
 0x630   : > { %1308 = vst.msk [vmem:[#allocation4 + $0x180] sm:$0xff] %vm627_vm1, %v1291_v31  ;;  %2749 = vrot.lane.b32.xlu1 %v2704_v16, %s5414_s29  ;;  %v3559_v31 = vld [vmem:[#allocation4 + $0x120] sm:$0xff] }
 0x631   : > { %1469 = vst.msk [vmem:[#allocation4 + $0x180] sm:$0xff] %vm1456_vm3, %v7795_v46 }
 0x632   : > { %1630 = vst.msk [vmem:[#allocation4 + $0x180] sm:$0xff] %vm1617_vm4, %v7796_v29  ;;  %v3538_v27 = vld [vmem:[#allocation4 + $0x78] sm:$0xff]  ;;  %3351 = vst.msk [vmem:[#allocation4 + $0x98] sm:$0xff] %vm1617_vm4, %v3308_v26  ;;  %3933 = vmatmul.mubr.f32.gmra.mrb[24].mxu0 %v3539_v62  ;;  %v7363_v8 = vpop.permute.xlu0 %2905  ;;  %v3555_v36 = vld [vmem:[#allocation4 + $0x100] sm:$0xff] }
 0x633   : > { %1791 = vst.msk [vmem:[#allocation4 + $0x180] sm:$0xff] %vm1778_vm5, %v7797_v42  ;;  %3511 = vst.msk [vmem:[#allocation4 + $0x98] sm:$0xff] %vm1778_vm5, %v7069_v41  ;;  %4072 = vmatprep.mubr.f32.mxu1 %v3538_v27  ;;  %3937 = vmatprep.mubr.f32.mxu0 %v3544_v33  ;;  %v2977_v5 = vpop.permute.xlu1 %2976  ;;  %v3576_v42 = vld [vmem:[#allocation4 + $0x1a8] sm:$0xff] }
 0x634   : > { %1310 = vst.msk [vmem:[#allocation4 + $0x1c0] sm:$0xff] %vm627_vm1, %v1293_v44  ;;  %4073 = vmatmul.mubr.f32.gmra.mrb[22].mxu1 %v3537_v28  ;;  %v3018_v41 = vmul.f32 %v5978_v3, %v2977_v5  ;;  %2909 = vrot.lane.b32.xlu1 %v2864_v45, %s5415_s15  ;;  %v3552_v3 = vld [vmem:[#allocation4 + $0xe8] sm:$0xff]  ;;  %v3575_v28 = vld [vmem:[#allocation4 + $0x1a0] sm:$0xff] }
 0x635   : > { %1471 = vst.msk [vmem:[#allocation4 + $0x1c0] sm:$0xff] %vm1456_vm3, %v7798_v34 }
 0x636   : > { %1632 = vst.msk [vmem:[#allocation4 + $0x1c0] sm:$0xff] %vm1617_vm4, %v7799_v56  ;;  %3938 = vmatmul.mubr.f32.gmra.mrb[26].mxu0 %v3543_v37  ;;  %v2588_v54 = vpop.permute.xlu0 %2587  ;;  %v3563_v60 = vld [vmem:[#allocation4 + $0x140] sm:$0xff] }
 0x637   : > { %1793 = vst.msk [vmem:[#allocation4 + $0x1c0] sm:$0xff] %vm1778_vm5, %v7800_v11  ;;  %3942 = vmatprep.mubr.f32.mxu0 %v3548_v13  ;;  %v2892_v12 = vpop.permute.xlu1 %2891  ;;  %v3583_v11 = vld [vmem:[#allocation4 + $0x1e0] sm:$0xff] }
 0x638   : > { %3034 = vst.msk [vmem:[#allocation4 + $0xf8] sm:$0xff] %vm627_vm1, %v3018_v41  ;;  %2591 = vrot.lane.b32.xlu1 %v2545_v10, %s5413_s14 }
 0x639   : > { %3194 = vst.msk [vmem:[#allocation4 + $0xf8] sm:$0xff] %vm1456_vm3, %v7124_v0  ;;  %2623 = vst.msk [vmem:[#allocation4 + $0x190] sm:$0xff] %vm1456_vm3, %v2588_v54 }
 0x63a   : > { %3354 = vst.msk [vmem:[#allocation4 + $0xf8] sm:$0xff] %vm1617_vm4, %v7134_v55  ;;  %3943 = vmatmul.mubr.f32.gmra.mrb[28].mxu0 %v3547_v24  ;;  %v3542_v40 = vld [vmem:[#allocation4 + $0x98] sm:$0xff]  ;;  %v2748_v0 = vpop.permute.xlu0 %2747  ;;  %v3556_v55 = vld [vmem:[#allocation4 + $0x108] sm:$0xff]  ;;  %v3571_v62 = vld [vmem:[#allocation4 + $0x180] sm:$0xff] }
 0x63b   : > { %2935 = vst.msk [vmem:[#allocation4 + $0x90] sm:$0xff] %vm1778_vm5, %v2892_v12  ;;  %3947 = vmatprep.mubr.f32.mxu0 %v3552_v3  ;;  %4077 = vmatprep.mubr.f32.mxu1 %v3542_v40  ;;  %v2574_v49 = vpop.permute.xlu1 %2573 }
 0x63c   : > { %2783 = vst.msk [vmem:[#allocation4 + $0x190] sm:$0xff] %vm1617_vm4, %v2748_v0  ;;  %2751 = vrot.lane.b32.xlu1 %v2705_v39, %s5414_s29 }
 0x63d   : > { %2616 = vst.msk [vmem:[#allocation4 + $0xb0] sm:$0xff] %vm1456_vm3, %v2574_v49 }
 0x63e   : > { %3948 = vmatmul.mubr.f32.gmra.mrb[30].mxu0 %v3551_v47  ;;  %v7388_v30 = vpop.permute.xlu0 %3483  ;;  %v3579_v5 = vld [vmem:[#allocation4 + $0x1c0] sm:$0xff] }
 0x63f   : > { %3952 = vmatprep.mubr.f32.mxu0 %v3556_v55  ;;  %v2734_v23 = vpop.permute.xlu1 %2733 }
 0x640   : > { %2776 = vst.msk [vmem:[#allocation4 + $0xb0] sm:$0xff] %vm1617_vm4, %v2734_v23  ;;  %2911 = vrot.lane.b32.xlu1 %v2865_v6, %s5415_s15 }
 0x641   : > { %2936 = vst.msk [vmem:[#allocation4 + $0xb0] sm:$0xff] %vm1778_vm5, %v7097_v4 }
 0x642   : > { %v3541_v51 = vld [vmem:[#allocation4 + $0x90] sm:$0xff]  ;;  %3953 = vmatmul.mubr.f32.gmra.mrb[32].mxu0 %v3555_v36  ;;  %v7396_v18 = vpop.permute.xlu0 %3165 }
 0x643   : > { %4078 = vmatmul.mubr.f32.gmra.mrb[24].mxu1 %v3541_v51  ;;  %3957 = vmatprep.mubr.f32.mxu0 %v3560_v17  ;;  %v3470_v7 = vpop.permute.xlu1 %3469 }
 0x644   : > { %3512 = vst.msk [vmem:[#allocation4 + $0xb8] sm:$0xff] %vm1778_vm5, %v3470_v7  ;;  %2593 = vrot.lane.b32.xlu1 %v2546_v32, %s5413_s14  ;;  %s7821_s14 = sld [smem:[#allocation72_spill]] (!%p4734_p6) }
 0x646   : > { %3958 = vmatmul.mubr.f32.gmra.mrb[34].mxu0 %v3559_v31  ;;  %v7402_v4 = vpop.permute.xlu0 %3325 }
 0x647   : > { %3962 = vmatprep.mubr.f32.mxu0 %v3564_v61  ;;  %v3152_v50 = vpop.permute.xlu1 %3151 }
 0x648   : > { %3193 = vst.msk [vmem:[#allocation4 + $0xd8] sm:$0xff] %vm1456_vm3, %v3152_v50  ;;  %2753 = vrot.lane.b32.xlu1 %v2706_v21, %s5414_s29  ;;  %v3545_v44 = vld [vmem:[#allocation4 + $0xb0] sm:$0xff] }
 0x64a   : > { %3963 = vmatmul.mubr.f32.gmra.mrb[36].mxu0 %v3563_v60  ;;  %v7408_v16 = vpop.permute.xlu0 %3485 }
 0x64b   : > { %3967 = vmatprep.mubr.f32.mxu0 %v3568_v19  ;;  %v3312_v46 = vpop.permute.xlu1 %3311  ;;  %v3546_v29 = vld [vmem:[#allocation4 + $0xb8] sm:$0xff] }
 0x64c   : > { %3353 = vst.msk [vmem:[#allocation4 + $0xd8] sm:$0xff] %vm1617_vm4, %v3312_v46  ;;  %2913 = vrot.lane.b32.xlu1 %v2866_v53, %s5415_s15  ;;  %4082 = vmatprep.mubr.f32.mxu1 %v3546_v29 }
 0x64d   : > { %3513 = vst.msk [vmem:[#allocation4 + $0xd8] sm:$0xff] %vm1778_vm5, %v7117_v14  ;;  %4083 = vmatmul.mubr.f32.gmra.mrb[26].mxu1 %v3545_v44 }
 0x64e   : > { %3968 = vmatmul.mubr.f32.gmra.mrb[38].mxu0 %v3567_v2  ;;  %v3168_v26 = vpop.permute.xlu0 %3167 }
 0x64f   : > { %3972 = vmatprep.mubr.f32.mxu0 %v3572_v57  ;;  %3201 = vst.msk [vmem:[#allocation4 + $0x1d8] sm:$0xff] %vm1456_vm3, %v3168_v26  ;;  %v2985_v48 = vpop.permute.xlu1 %2984 }
 0x650   : > { %v3020_v27 = vmul.f32 %v5990_v9, %v2985_v48  ;;  %v3580_v9 = vld [vmem:[#allocation4 + $0x1c8] sm:$0xff] }
 0x652   : > { %3973 = vmatmul.mubr.f32.gmra.mrb[40].mxu0 %v3571_v62  ;;  %3036 = vst.msk [vmem:[#allocation4 + $0x138] sm:$0xff] %vm627_vm1, %v3020_v27  ;;  %v3328_v33 = vpop.permute.xlu0 %3327 }
 0x653   : > { %3977 = vmatprep.mubr.f32.mxu0 %v3576_v42  ;;  %3196 = vst.msk [vmem:[#allocation4 + $0x138] sm:$0xff] %vm1456_vm3, %v7192_v43  ;;  %v2896_v14 = vpop.permute.xlu1 %2895  ;;  %v3584_v43 = vld [vmem:[#allocation4 + $0x1e8] sm:$0xff] }
 0x654   : > { %3361 = vst.msk [vmem:[#allocation4 + $0x1d8] sm:$0xff] %vm1617_vm4, %v3328_v33  ;;  %3356 = vst.msk [vmem:[#allocation4 + $0x138] sm:$0xff] %vm1617_vm4, %v7202_v25  ;;  %v3550_v45 = vld [vmem:[#allocation4 + $0xd8] sm:$0xff]  ;;  %v5380_v33 = vld [vmem:[#allocation2] sm:$0xff] }
 0x655   : > { %2937 = vst.msk [vmem:[#allocation4 + $0xd0] sm:$0xff] %vm1778_vm5, %v2896_v14  ;;  %4087 = vmatprep.mubr.f32.mxu1 %v3550_v45  ;;  %v7802_v45 = vld [vmem:[#allocation68_spill] sm:$0xff] }
 0x656   : > { %3978 = vmatmul.mubr.f32.gmra.mrb[42].mxu0 %v3575_v28  ;;  %v3488_v34 = vpop.permute.xlu0 %3487 }
 0x657   : > { %3982 = vmatprep.mubr.f32.mxu0 %v3580_v9  ;;  %3521 = vst.msk [vmem:[#allocation4 + $0x1d8] sm:$0xff] %vm1778_vm5, %v3488_v34  ;;  %v2578_v56 = vpop.permute.xlu1 %2577 }
 0x658   : > { %2618 = vst.msk [vmem:[#allocation4 + $0xf0] sm:$0xff] %vm1456_vm3, %v2578_v56 }
 0x65a   : > { %3983 = vmatmul.mubr.f32.gmra.mrb[44].mxu0 %v3579_v5  ;;  %v3170_v17 = vpop.permute.xlu0 %3169 }
 0x65b   : > { %3987 = vmatprep.mubr.f32.mxu0 %v3584_v43  ;;  %v2738_v37 = vpop.permute.xlu1 %2737 }
 0x65c   : > { %v3549_v25 = vld [vmem:[#allocation4 + $0xd0] sm:$0xff]  ;;  %2778 = vst.msk [vmem:[#allocation4 + $0xf0] sm:$0xff] %vm1617_vm4, %v2738_v37 }
 0x65d   : > { %4088 = vmatmul.mubr.f32.gmra.mrb[28].mxu1 %v3549_v25  ;;  %2938 = vst.msk [vmem:[#allocation4 + $0xf0] sm:$0xff] %vm1778_vm5, %v7151_v20 }
 0x65e   : > { %3988 = vmatmul.mubr.f32.gmra.mrb[46].mxu0 %v3583_v11  ;;  %v3330_v31 = vpop.permute.xlu0 %3329  ;;  %v3582_v29 = vld [vmem:[#allocation4 + $0x1d8] sm:$0xff] }
 0x65f   : > { %v3474_v41 = vpop.permute.xlu1 %3473 }
 0x660   : > { %3514 = vst.msk [vmem:[#allocation4 + $0xf8] sm:$0xff] %vm1778_vm5, %v3474_v41 }
 0x663   : > { %v3156_v13 = vpop.permute.xlu1 %3155 }
 0x664   : > { %3195 = vst.msk [vmem:[#allocation4 + $0x118] sm:$0xff] %vm1456_vm3, %v3156_v13  ;;  %v3553_v12 = vld [vmem:[#allocation4 + $0xf0] sm:$0xff] }
 0x667   : > { %v3316_v10 = vpop.permute.xlu1 %3315  ;;  %v3554_v54 = vld [vmem:[#allocation4 + $0xf8] sm:$0xff] }
 0x668   : > { %3355 = vst.msk [vmem:[#allocation4 + $0x118] sm:$0xff] %vm1617_vm4, %v3316_v10  ;;  %4092 = vmatprep.mubr.f32.mxu1 %v3554_v54  ;;  %v7803_v54 = vld [vmem:[#allocation27_spill] sm:$0xff] }
 0x669   : > { %3515 = vst.msk [vmem:[#allocation4 + $0x118] sm:$0xff] %vm1778_vm5, %v7181_v58  ;;  %4093 = vmatmul.mubr.f32.gmra.mrb[30].mxu1 %v3553_v12 }
 0x66b   : > { %v2993_v24 = vpop.permute.xlu1 %2992 }
 0x66c   : > { %v3022_v3 = vmul.f32 %v6001_v15, %v2993_v24 }
 0x66e   : > { %3038 = vst.msk [vmem:[#allocation4 + $0x178] sm:$0xff] %vm627_vm1, %v3022_v3 }
 0x66f   : > { %3198 = vst.msk [vmem:[#allocation4 + $0x178] sm:$0xff] %vm1456_vm3, %v7249_v1  ;;  %v2900_v20 = vpop.permute.xlu1 %2899 }
 0x670   : > { %3358 = vst.msk [vmem:[#allocation4 + $0x178] sm:$0xff] %vm1617_vm4, %v7259_v38  ;;  %v3558_v40 = vld [vmem:[#allocation4 + $0x118] sm:$0xff] }
 0x671   : > { %2939 = vst.msk [vmem:[#allocation4 + $0x110] sm:$0xff] %vm1778_vm5, %v2900_v20  ;;  %4097 = vmatprep.mubr.f32.mxu1 %v3558_v40 }
 0x673   : > { %v2582_v39 = vpop.permute.xlu1 %2581 }
 0x674   : > { %2620 = vst.msk [vmem:[#allocation4 + $0x130] sm:$0xff] %vm1456_vm3, %v2582_v39  ;;  %v7804_v39 = vld [vmem:[#allocation29_spill] sm:$0xff] }
 0x677   : > { %v2742_v58 = vpop.permute.xlu1 %2741 }
 0x678   : > { %v3557_v0 = vld [vmem:[#allocation4 + $0x110] sm:$0xff]  ;;  %2780 = vst.msk [vmem:[#allocation4 + $0x130] sm:$0xff] %vm1617_vm4, %v2742_v58 }
 0x679   : > { %4098 = vmatmul.mubr.f32.gmra.mrb[32].mxu1 %v3557_v0  ;;  %2940 = vst.msk [vmem:[#allocation4 + $0x130] sm:$0xff] %vm1778_vm5, %v7218_v63 }
 0x67b   : > { %v3478_v15 = vpop.permute.xlu1 %3477 }
 0x67c   : > { %3516 = vst.msk [vmem:[#allocation4 + $0x138] sm:$0xff] %vm1778_vm5, %v3478_v15 }
 0x67f   : > { %v3160_v1 = vpop.permute.xlu1 %3159 }
 0x680   : > { %3197 = vst.msk [vmem:[#allocation4 + $0x158] sm:$0xff] %vm1456_vm3, %v3160_v1  ;;  %v3561_v47 = vld [vmem:[#allocation4 + $0x130] sm:$0xff] }
 0x683   : > { %v3320_v38 = vpop.permute.xlu1 %3319  ;;  %v3562_v49 = vld [vmem:[#allocation4 + $0x138] sm:$0xff] }
 0x684   : > { %3357 = vst.msk [vmem:[#allocation4 + $0x158] sm:$0xff] %vm1617_vm4, %v3320_v38  ;;  %4102 = vmatprep.mubr.f32.mxu1 %v3562_v49 }
 0x685   : > { %3517 = vst.msk [vmem:[#allocation4 + $0x158] sm:$0xff] %vm1778_vm5, %v7243_v22  ;;  %4103 = vmatmul.mubr.f32.gmra.mrb[34].mxu1 %v3561_v47  ;;  %v7805_v47 = vld [vmem:[#allocation28_spill] sm:$0xff] }
 0x687   : > { %v3001_v55 = vpop.permute.xlu1 %3000 }
 0x688   : > { %v3024_v35 = vmul.f32 %v7762_v52, %v3001_v55 }
 0x68a   : > { %3040 = vst.msk [vmem:[#allocation4 + $0x1b8] sm:$0xff] %vm627_vm1, %v3024_v35 }
 0x68b   : > { %3200 = vst.msk [vmem:[#allocation4 + $0x1b8] sm:$0xff] %vm1456_vm3, %v7396_v18  ;;  %v2904_v63 = vpop.permute.xlu1 %2903 }
 0x68c   : > { %3360 = vst.msk [vmem:[#allocation4 + $0x1b8] sm:$0xff] %vm1617_vm4, %v7402_v4  ;;  %v3566_v6 = vld [vmem:[#allocation4 + $0x158] sm:$0xff]  ;;  %v3490_v4 = vpop.permute.xlu0 %3489 }
 0x68d   : > { %2941 = vst.msk [vmem:[#allocation4 + $0x150] sm:$0xff] %vm1778_vm5, %v2904_v63  ;;  %3520 = vst.msk [vmem:[#allocation4 + $0x1b8] sm:$0xff] %vm1778_vm5, %v7408_v16  ;;  %4107 = vmatprep.mubr.f32.mxu1 %v3566_v6  ;;  %v4251_v63 = vld [vmem:[%s5557_s25] sm:$0xff]  ;;  %v4252_v6 = vld [vmem:[%s5557_s25 + $0x8] sm:$0xff] }
 0x68f   : > { %v2586_v22 = vpop.permute.xlu1 %2585 }
 0x690   : > { %2622 = vst.msk [vmem:[#allocation4 + $0x170] sm:$0xff] %vm1456_vm3, %v2586_v22 }
 0x693   : > { %v2746_v52 = vpop.permute.xlu1 %2745 }
 0x694   : > { %v3565_v23 = vld [vmem:[#allocation4 + $0x150] sm:$0xff]  ;;  %2782 = vst.msk [vmem:[#allocation4 + $0x170] sm:$0xff] %vm1617_vm4, %v2746_v52  ;;  %v5217_v52 = vpack.c.bf16 %v4252_v6, %v4251_v63 }
 0x695   : > { %4108 = vmatmul.mubr.f32.gmra.mrb[36].mxu1 %v3565_v23  ;;  %2942 = vst.msk [vmem:[#allocation4 + $0x170] sm:$0xff] %vm1778_vm5, %v7363_v8 }
 0x696   : > { %5218 = vmatprep.subr.bf16.mxu1 %v5217_v52 }
 0x697   : > { %v3482_v36 = vpop.permute.xlu1 %3481  ;;  %5220 = vmatpush3.bf16.msra.mxu1 %v5217_v52 }
 0x698   : > { %3518 = vst.msk [vmem:[#allocation4 + $0x178] sm:$0xff] %vm1778_vm5, %v3482_v36 }
 0x69b   : > { %v3164_v51 = vpop.permute.xlu1 %3163 }
 0x69c   : > { %3199 = vst.msk [vmem:[#allocation4 + $0x198] sm:$0xff] %vm1456_vm3, %v3164_v51  ;;  %v3569_v7 = vld [vmem:[#allocation4 + $0x170] sm:$0xff] }
 0x69f   : > { %v3324_v32 = vpop.permute.xlu1 %3323  ;;  %v3570_v18 = vld [vmem:[#allocation4 + $0x178] sm:$0xff] }
 0x6a0   : > { %3359 = vst.msk [vmem:[#allocation4 + $0x198] sm:$0xff] %vm1617_vm4, %v3324_v32  ;;  %4112 = vmatprep.mubr.f32.mxu1 %v3570_v18 }
 0x6a1   : > { %3519 = vst.msk [vmem:[#allocation4 + $0x198] sm:$0xff] %vm1778_vm5, %v7388_v30  ;;  %4113 = vmatmul.mubr.f32.gmra.mrb[38].mxu1 %v3569_v7 }
 0x6a3   : > { %v3009_v61 = vpop.permute.xlu1 %3008 }
 0x6a4   : > { %v3026_v8 = vmul.f32 %v7768_v59, %v3009_v61  ;;  %v3578_v59 = vld [vmem:[#allocation4 + $0x1b8] sm:$0xff] }
 0x6a6   : > { %3042 = vst.msk [vmem:[#allocation4 + $0x1f8] sm:$0xff] %vm627_vm1, %v3026_v8 }
 0x6a7   : > { %3202 = vst.msk [vmem:[#allocation4 + $0x1f8] sm:$0xff] %vm1456_vm3, %v3170_v17  ;;  %v2908_v21 = vpop.permute.xlu1 %2907  ;;  %v7806_v17 = vld [vmem:[#allocation32_spill] sm:$0xff] }
 0x6a8   : > { %3362 = vst.msk [vmem:[#allocation4 + $0x1f8] sm:$0xff] %vm1617_vm4, %v3330_v31  ;;  %v3574_v50 = vld [vmem:[#allocation4 + $0x198] sm:$0xff] }
 0x6a9   : > { %2943 = vst.msk [vmem:[#allocation4 + $0x190] sm:$0xff] %vm1778_vm5, %v2908_v21  ;;  %3522 = vst.msk [vmem:[#allocation4 + $0x1f8] sm:$0xff] %vm1778_vm5, %v3490_v4  ;;  %4117 = vmatprep.mubr.f32.mxu1 %v3574_v50  ;;  %v7807_v21 = vld [vmem:[#allocation31_spill] sm:$0xff] }
 0x6ab   : > { %v2590_v30 = vpop.permute.xlu1 %2589 }
 0x6ac   : > { %2624 = vst.msk [vmem:[#allocation4 + $0x1b0] sm:$0xff] %vm1456_vm3, %v2590_v30 }
 0x6af   : > { %v2750_v60 = vpop.permute.xlu1 %2749 }
 0x6b0   : > { %v3573_v19 = vld [vmem:[#allocation4 + $0x190] sm:$0xff]  ;;  %2784 = vst.msk [vmem:[#allocation4 + $0x1b0] sm:$0xff] %vm1617_vm4, %v2750_v60  ;;  %v3586_v62 = vld [vmem:[#allocation4 + $0x1f8] sm:$0xff] }
 0x6b1   : > { %4118 = vmatmul.mubr.f32.gmra.mrb[40].mxu1 %v3573_v19 }
 0x6b2   : > { %4122 = vmatprep.mubr.f32.mxu1 %v3578_v59  ;;  %v7808_v59 = vld [vmem:[#allocation35_spill] sm:$0xff] }
 0x6b3   : > { %v2910_v53 = vpop.permute.xlu1 %2909 }
 0x6b4   : > { %2944 = vst.msk [vmem:[#allocation4 + $0x1b0] sm:$0xff] %vm1778_vm5, %v2910_v53 }
 0x6b7   : > { %v2592_v16 = vpop.permute.xlu1 %2591 }
 0x6b8   : > { %2625 = vst.msk [vmem:[#allocation4 + $0x1d0] sm:$0xff] %vm1456_vm3, %v2592_v16 }
 0x6bb   : > { %v2752_v46 = vpop.permute.xlu1 %2751  ;;  %v3577_v2 = vld [vmem:[#allocation4 + $0x1b0] sm:$0xff] }
 0x6bc   : > { %2785 = vst.msk [vmem:[#allocation4 + $0x1d0] sm:$0xff] %vm1617_vm4, %v2752_v46  ;;  %4123 = vmatmul.mubr.f32.gmra.mrb[42].mxu1 %v3577_v2 }
 0x6bd   : > { %4127 = vmatprep.mubr.f32.mxu1 %v3582_v29  ;;  %v7809_v29 = vld [vmem:[#allocation34_spill] sm:$0xff] }
 0x6bf   : > { %v2912_v57 = vpop.permute.xlu1 %2911 }
 0x6c0   : > { %2945 = vst.msk [vmem:[#allocation4 + $0x1d0] sm:$0xff] %vm1778_vm5, %v2912_v57 }
 0x6c3   : > { %v2594_v44 = vpop.permute.xlu1 %2593 }
 0x6c4   : > { %2626 = vst.msk [vmem:[#allocation4 + $0x1f0] sm:$0xff] %vm1456_vm3, %v2594_v44 }
 0x6c7   : > { %v2754_v26 = vpop.permute.xlu1 %2753  ;;  %v3581_v48 = vld [vmem:[#allocation4 + $0x1d0] sm:$0xff] }
 0x6c8   : > { %2786 = vst.msk [vmem:[#allocation4 + $0x1f0] sm:$0xff] %vm1617_vm4, %v2754_v26  ;;  %4128 = vmatmul.mubr.f32.gmra.mrb[44].mxu1 %v3581_v48 }
 0x6c9   : > { %4132 = vmatprep.mubr.f32.mxu1 %v3586_v62 }
 0x6cb   : > { %v2914_v27 = vpop.permute.xlu1 %2913 }
 0x6cc   : > { %2946 = vst.msk [vmem:[#allocation4 + $0x1f0] sm:$0xff] %vm1778_vm5, %v2914_v27 }
 0x6d3   : > { %v3585_v42 = vld [vmem:[#allocation4 + $0x1f0] sm:$0xff] }
 0x6d4   : > { %4133 = vmatmul.mubr.f32.gmra.mrb[46].mxu1 %v3585_v42 }
 0x6d5   : > { %5084 = vmatprep.mubr.msk.f32.mxu1 %vm627_vm1, %v5380_v33  ;;  %v7810_v33 = vld [vmem:[#allocation38_spill] sm:$0xff] }
 0x6db   : > { %v4897_v14 = vpop.f32.mrb[16].mxu1 }
 0x6dc   : > { %v4898_v28 = vpop.f32.mrb[17].mxu1 }
 0x6dd   : > { %v4899_v9 = vadd.f32 %v4898_v28, %v4897_v14 }
 0x6df   : > { %v4060_v34 = vadd.f32 %v4899_v9, %v7802_v45 }
 0x6e8   : > { %v4900_v56 = vpop.f32.mrb[18].mxu1 }
 0x6e9   : > { %v4901_v5 = vpop.f32.mrb[19].mxu1 }
 0x6ea   : > { %v4902_v43 = vadd.f32 %v4901_v5, %v4900_v56  ;;  %v7811_v56 = vld [vmem:[#allocation36_spill] sm:$0xff] }
 0x6f9   : > { %v4820_v37 = vpop.f32.mrb[18].mxu0  ;;  %v4903_v11 = vpop.f32.mrb[20].mxu1 }
 0x6fa   : > { %v4821_v25 = vpop.f32.mrb[19].mxu0  ;;  %v4904_v13 = vpop.f32.mrb[21].mxu1 }
 0x6fb   : > { %v4822_v41 = vadd.f32 %v4821_v25, %v4820_v37  ;;  %v4905_v10 = vadd.f32 %v4904_v13, %v4903_v11  ;;  %v7812_v25 = vld [vmem:[#allocation42_spill] sm:$0xff] }
 0x6fd   : > { %v3920_v12 = vadd.f32 %v7803_v54, %v4822_v41  ;;  %v4823_v24 = vpop.f32.mrb[20].mxu0  ;;  %v4254_v54 = vld [vmem:[%s5557_s25 + $0x18] sm:$0xff] }
 0x6fe   : > { %v4824_v3 = vpop.f32.mrb[21].mxu0 }
 0x6ff   : > { %v4065_v20 = vadd.f32 %v4902_v43, %v3920_v12  ;;  %v4825_v40 = vadd.f32 %v4824_v3, %v4823_v24 }
 0x701   : > { %v3925_v58 = vadd.f32 %v4825_v40, %v7804_v39  ;;  %v4826_v0 = vpop.f32.mrb[22].mxu0  ;;  %v5185_v15 = vpack.c.bf16 %v4065_v20, %v4060_v34  ;;  %v7813_v39 = vld [vmem:[#allocation39_spill] sm:$0xff] }
 0x702   : > { %v4827_v1 = vpop.f32.mrb[23].mxu0 }
 0x703   : > { %v4070_v38 = vadd.f32 %v4905_v10, %v3925_v58  ;;  %v4828_v49 = vadd.f32 %v4827_v1, %v4826_v0  ;;  %5186 = vmatprep.subr.bf16.mxu0 %v5185_v15  ;;  %v4253_v10 = vld [vmem:[%s5557_s25 + $0x10] sm:$0xff] }
 0x704   : > { %5188 = vmatpush3.bf16.msra.mxu0 %v5185_v15  ;;  %v5221_v24 = vpack.c.bf16 %v4254_v54, %v4253_v10 }
 0x705   : > { %v3930_v55 = vadd.f32 %v7805_v47, %v4828_v49  ;;  %v4829_v35 = vpop.f32.mrb[24].mxu0  ;;  %v5381_v47 = vld [vmem:[#allocation2 + $0x8] sm:$0xff] }
 0x706   : > { %v4830_v22 = vpop.f32.mrb[25].mxu0  ;;  %5222 = vmatprep.subr.bf16.mxu1 %v5221_v24 }
 0x707   : > { %v4831_v23 = vadd.f32 %v4830_v22, %v4829_v35  ;;  %v4906_v36 = vpop.f32.mrb[22].mxu1  ;;  %5224 = vmatpush3.bf16.msra.mxu1 %v5221_v24 }
 0x708   : > { %v4907_v51 = vpop.f32.mrb[23].mxu1 }
 0x709   : > { %v3935_v32 = vadd.f32 %v4831_v23, %v7806_v17  ;;  %v4908_v18 = vadd.f32 %v4907_v51, %v4906_v36  ;;  %v4832_v7 = vpop.f32.mrb[26].mxu0  ;;  %v7815_v23 = vld [vmem:[#allocation43_spill] sm:$0xff] }
 0x70a   : > { %v4833_v31 = vpop.f32.mrb[27].mxu0  ;;  %5085 = vmatmul.mubr.msk.f32.vlgmr.msra.gmra.mrb[48].mxu1 %vm627_vm1, %v5381_v47 }
 0x70b   : > { %v4075_v61 = vadd.f32 %v4908_v18, %v3930_v55  ;;  %v4834_v8 = vadd.f32 %v4833_v31, %v4832_v7  ;;  %v7814_v55 = vld [vmem:[#allocation44_spill] sm:$0xff]  ;;  %v7816_v18 = vld [vmem:[#allocation47_spill] sm:$0xff] }
 0x70d   : > { %v3940_v4 = vadd.f32 %v7807_v21, %v4834_v8  ;;  %v4835_v50 = vpop.f32.mrb[28].mxu0  ;;  %v5189_v30 = vpack.c.bf16 %v4075_v61, %v4070_v38 }
 0x70e   : > { %v4836_v60 = vpop.f32.mrb[29].mxu0 }
 0x70f   : > { %v4837_v19 = vadd.f32 %v4836_v60, %v4835_v50  ;;  %5190 = vmatprep.subr.bf16.mxu0 %v5189_v30  ;;  %v7817_v60 = vld [vmem:[#allocation8_spill] sm:$0xff] }
 0x710   : > { %5192 = vmatpush3.bf16.msra.mxu0 %v5189_v30 }
 0x711   : > { %v3945_v53 = vadd.f32 %v4837_v19, %v7808_v59  ;;  %v4838_v16 = vpop.f32.mrb[30].mxu0  ;;  %v5426_v19 = vmov 1.0   ;;  %v7818_v59 = vld [vmem:[#allocation45_spill] sm:$0xff] }
 0x712   : > { %v4839_v46 = vpop.f32.mrb[31].mxu0 }
 0x713   : > { %v4840_v2 = vadd.f32 %v4839_v46, %v4838_v16 }
 0x715   : > { %v7493_v57 = vadd.f32 %v7809_v29, %v4840_v2  ;;  %v4841_v44 = vpop.f32.mrb[32].mxu0  ;;  %v4238_v2 = vld [vmem:[%s7591_s4 + $0x8] sm:$0xff] }
 0x716   : > { %v4909_v26 = vpop.f32.mrb[24].mxu1  ;;  %v4842_v48 = vpop.f32.mrb[33].mxu0  ;;  %4246 = vperm.xlu1 %5379, %v4238_v2   ;;  %v4355_v2 = vld [vmem:[%s7598_s11] sm:$0xff] (!%p4734_p6) }
 0x717   : > { %v4843_v62 = vadd.f32 %v4842_v48, %v4841_v44  ;;  %v4910_v27 = vpop.f32.mrb[25].mxu1 }
 0x718   : > { %v4911_v42 = vadd.f32 %v4910_v27, %v4909_v26 }
 0x719   : > { %v7496_v14 = vadd.f32 %v4843_v62, %v7810_v33  ;;  %v4844_v28 = vpop.f32.mrb[34].mxu0 }
 0x71a   : > { %v4080_v9 = vadd.f32 %v4911_v42, %v3935_v32  ;;  %v4845_v45 = vpop.f32.mrb[35].mxu0 }
 0x71b   : > { %v4846_v34 = vadd.f32 %v4845_v45, %v4844_v28 }
 0x71d   : > { %v7499_v5 = vadd.f32 %v7811_v56, %v4846_v34  ;;  %v4847_v43 = vpop.f32.mrb[36].mxu0 }
 0x71e   : > { %v4848_v37 = vpop.f32.mrb[37].mxu0 }
 0x71f   : > { %v4849_v11 = vadd.f32 %v4848_v37, %v4847_v43 }
 0x720   : > { %v4912_v20 = vpop.f32.mrb[26].mxu1 }
 0x721   : > { %v7502_v41 = vadd.f32 %v4849_v11, %v7812_v25  ;;  %v4850_v13 = vpop.f32.mrb[38].mxu0  ;;  %v4913_v40 = vpop.f32.mrb[27].mxu1 }
 0x722   : > { %v4851_v12 = vpop.f32.mrb[39].mxu0  ;;  %v4914_v0 = vadd.f32 %v4913_v40, %v4912_v20 }
 0x723   : > { %v4852_v3 = vadd.f32 %v4851_v12, %v4850_v13 }
 0x724   : > { %v4085_v38 = vadd.f32 %v4914_v0, %v3940_v4  ;;  %v7514_v4 = vld [vmem:[%s7588_s1] ss:$0 sm:$0xff] }
 0x725   : > { %v3970_v58 = vadd.f32 %v7813_v39, %v4852_v3  ;;  %v4853_v15 = vpop.f32.mrb[40].mxu0  ;;  %vm4145_vm6 = vcmp.eq.s32.totalorder %v7817_v60, %v7514_v4 }
 0x726   : > { %v4854_v1 = vpop.f32.mrb[41].mxu0  ;;  %v5193_v6 = vpack.c.bf16 %v4085_v38, %v4080_v9  ;;  %5073 = vmatprep.mubr.msk.f32.mxu0 %vm4145_vm6, %v5426_v19 }
 0x727   : > { %v4855_v49 = vadd.f32 %v4854_v1, %v4853_v15 }
 0x728   : > { %5194 = vmatprep.subr.bf16.mxu0 %v5193_v6 }
 0x729   : > { %v3975_v35 = vadd.f32 %v4855_v49, %v7814_v55  ;;  %v4856_v63 = vpop.f32.mrb[42].mxu0  ;;  %5196 = vmatpush3.bf16.msra.mxu0 %v5193_v6  ;;  %v4140_v6 = vadd.s32 8, %v7817_v60 }
 0x72a   : > { %v4857_v22 = vpop.f32.mrb[43].mxu0 }
 0x72b   : > { %v4858_v52 = vadd.f32 %v4857_v22, %v4856_v63  ;;  %vm4146_vm7 = vcmp.eq.s32.totalorder %v4140_v6, %v7514_v4 }
 0x72d   : > { %v3980_v36 = vadd.f32 %v7815_v23, %v4858_v52  ;;  %v4859_v51 = vpop.f32.mrb[44].mxu0  ;;  %v4152_v23 = vld [vmem:[#allocation3 + $0x8] sm:$0xff] }
 0x72e   : > { %v4860_v17 = vpop.f32.mrb[45].mxu0 }
 0x72f   : > { %v4861_v32 = vadd.f32 %v4860_v17, %v4859_v51 }
 0x730   : > { %v4915_v61 = vpop.f32.mrb[28].mxu1 }
 0x731   : > { %v3985_v7 = vadd.f32 %v4861_v32, %v7816_v18  ;;  %v4862_v31 = vpop.f32.mrb[46].mxu0  ;;  %v4916_v21 = vpop.f32.mrb[29].mxu1 }
 0x732   : > { %v4863_v8 = vpop.f32.mrb[47].mxu0  ;;  %v4917_v30 = vadd.f32 %v4916_v21, %v4915_v61  ;;  %v4242_v61 = vpop.permute.xlu0 %4241 }
 0x733   : > { %v4864_v50 = vadd.f32 %v4863_v8, %v4862_v31 }
 0x734   : > { %v4090_v46 = vadd.f32 %v4917_v30, %v3945_v53 }
 0x735   : > { %v3990_v16 = vadd.f32 %v7818_v59, %v4864_v50  ;;  %v4733_v50 = vld [vmem:[%s612_s28] ss:$0 sm:$0xff] }
 0x73c   : > { %v4918_v29 = vpop.f32.mrb[30].mxu1 }
 0x73d   : > { %v4919_v44 = vpop.f32.mrb[31].mxu1 }
 0x73e   : > { %v4920_v26 = vadd.f32 %v4919_v44, %v4918_v29  ;;  %v4356_v29 = vld [vmem:[%s7598_s11 + $0x8] sm:$0xff] (!%p4734_p6)  ;;  %v4357_v44 = vld [vmem:[%s7598_s11 + $0x10] sm:$0xff] (!%p4734_p6) }
 0x740   : > { %v4095_v48 = vadd.f32 %v4920_v26, %v7493_v57  ;;  %v5225_v26 = vpack.c.bf16 (!%p4734_p6), %v4356_v29, %v4355_v2 }
 0x742   : > { %v5197_v62 = vpack.c.bf16 %v4095_v48, %v4090_v46  ;;  %v4358_v48 = vld [vmem:[%s7598_s11 + $0x18] sm:$0xff] (!%p4734_p6) }
 0x744   : > { %5198 = vmatprep.subr.bf16.mxu0 %v5197_v62 }
 0x745   : > { %5200 = vmatpush3.bf16.msra.mxu0 %v5197_v62  ;;  %v4449_v62 = vld [vmem:[%s7600_s13] sm:$0xff] (!%p4734_p6) }
 0x74c   : > { %v4921_v27 = vpop.f32.mrb[32].mxu1 }
 0x74d   : > { %v4922_v42 = vpop.f32.mrb[33].mxu1 }
 0x74e   : > { %v4923_v33 = vadd.f32 %v4922_v42, %v4921_v27  ;;  %v4450_v27 = vld [vmem:[%s7600_s13 + $0x8] sm:$0xff] (!%p4734_p6)  ;;  %v5229_v42 = vpack.c.bf16 (!%p4734_p6), %v4358_v48, %v4357_v44 }
 0x750   : > { %v4100_v28 = vadd.f32 %v4923_v33, %v7496_v14  ;;  %v5233_v33 = vpack.c.bf16 (!%p4734_p6), %v4450_v27, %v4449_v62 }
 0x752   : > { %5234 = vmatprep.subr.bf16.mxu1 (!%p4734_p6), %v5233_v33 }
 0x753   : > { %5236 = vmatpush3.bf16.msra.mxu1 (!%p4734_p6), %v5233_v33 }
 0x758   : > { %v4924_v9 = vpop.f32.mrb[34].mxu1 }
 0x759   : > { %v4925_v53 = vpop.f32.mrb[35].mxu1 }
 0x75a   : > { %v4926_v45 = vadd.f32 %v4925_v53, %v4924_v9  ;;  %v4452_v9 = vld [vmem:[%s7600_s13 + $0x18] sm:$0xff] (!%p4734_p6) }
 0x75c   : > { %v4105_v34 = vadd.f32 %v4926_v45, %v7499_v5  ;;  %v4735_v45 = vld [vmem:[%s7819_s16] ss:$0 sm:$0xff] (!%p4734_p6) }
 0x75e   : > { %v5201_v56 = vpack.c.bf16 %v4105_v34, %v4100_v28  ;;  %v4451_v28 = vld [vmem:[%s7600_s13 + $0x10] sm:$0xff] (!%p4734_p6) }
 0x75f   : > { %v5237_v53 = vpack.c.bf16 (!%p4734_p6), %v4452_v9, %v4451_v28 }
 0x760   : > { %5202 = vmatprep.subr.bf16.mxu0 %v5201_v56 }
 0x761   : > { %5204 = vmatpush3.bf16.msra.mxu0 %v5201_v56  ;;  %5238 = vmatprep.subr.bf16.mxu1 (!%p4734_p6), %v5237_v53 }
 0x762   : > { %5240 = vmatpush3.bf16.msra.mxu1 (!%p4734_p6), %v5237_v53 }
 0x768   : > { %v4927_v43 = vpop.f32.mrb[36].mxu1 }
 0x769   : > { %v4928_v37 = vpop.f32.mrb[37].mxu1 }
 0x76a   : > { %v4929_v11 = vadd.f32 %v4928_v37, %v4927_v43 }
 0x76c   : > { %v4110_v57 = vadd.f32 %v4929_v11, %v7502_v41 }
 0x774   : > { %v4930_v25 = vpop.f32.mrb[38].mxu1 }
 0x775   : > { %v4931_v13 = vpop.f32.mrb[39].mxu1 }
 0x776   : > { %v4932_v10 = vadd.f32 %v4931_v13, %v4930_v25  ;;  %v4738_v25 = vld [vmem:[%s7820_s22] ss:$0 sm:$0xff] (!%p4734_p6) }
 0x778   : > { %v4115_v54 = vadd.f32 %v4932_v10, %v3970_v58 }
 0x77a   : > { %v5205_v12 = vpack.c.bf16 %v4115_v54, %v4110_v57 }
 0x77c   : > { %5206 = vmatprep.subr.bf16.mxu0 %v5205_v12 }
 0x77d   : > { %5208 = vmatpush3.bf16.msra.mxu0 %v5205_v12 }
 0x784   : > { %v4933_v14 = vpop.f32.mrb[40].mxu1 }
 0x785   : > { %v4934_v24 = vpop.f32.mrb[41].mxu1 }
 0x786   : > { %v4935_v3 = vadd.f32 %v4934_v24, %v4933_v14 }
 0x788   : > { %v4120_v20 = vadd.f32 %v4935_v3, %v3975_v35 }
 0x78f   : > { %v4936_v5 = vpop.f32.mrb[42].mxu1 }
 0x790   : > { %v4937_v40 = vpop.f32.mrb[43].mxu1 }
 0x791   : > { %v4938_v39 = vadd.f32 %v4937_v40, %v4936_v5 }
 0x793   : > { %v4125_v0 = vadd.f32 %v4938_v39, %v3980_v36  ;;  %v4151_v36 = vld [vmem:[#allocation3] sm:$0xff] }
 0x795   : > { %v5209_v15 = vpack.c.bf16 %v4125_v0, %v4120_v20 }
 0x797   : > { %5210 = vmatprep.subr.bf16.mxu0 %v5209_v15 }
 0x798   : > { %5212 = vmatpush3.bf16.msra.mxu0 %v5209_v15 }
 0x79b   : > { %v4939_v1 = vpop.f32.mrb[44].mxu1 }
 0x79c   : > { %v4940_v41 = vpop.f32.mrb[45].mxu1 }
 0x79d   : > { %v4941_v38 = vadd.f32 %v4940_v41, %v4939_v1 }
 0x79f   : > { %v4130_v49 = vadd.f32 %v4941_v38, %v3985_v7  ;;  %v4247_v7 = vpop.permute.xlu1 %4246 }
 0x7a7   : > { %v4942_v47 = vpop.f32.mrb[46].mxu1 }
 0x7a8   : > { %v4943_v58 = vpop.f32.mrb[47].mxu1 }
 0x7a9   : > { %v4944_v55 = vadd.f32 %v4943_v58, %v4942_v47 }
 0x7ab   : > { %v4135_v63 = vadd.f32 %v4944_v55, %v3990_v16 }
 0x7ad   : > { %v5213_v22 = vpack.c.bf16 %v4135_v63, %v4130_v49 }
 0x7af   : > { %5214 = vmatprep.subr.bf16.mxu0 %v5213_v22 }
 0x7b0   : > { %5216 = vmatpush3.bf16.msra.mxu0 %v5213_v22 }
 0x7b1   : > { %5226 = vmatprep.subr.bf16.mxu0 (!%p4734_p6), %v5225_v26 }
 0x7b3   : > { %5074 = vmatmul.mubr.msk.f32.vlgmr.msra.gmra.mrb[48].mxu0 %vm4146_vm7, %v5426_v19 }
 0x7b4   : > { %5228 = vmatpush3.bf16.msra.mxu0 (!%p4734_p6), %v5225_v26 }
 0x7b5   : > { %5230 = vmatprep.subr.bf16.mxu0 (!%p4734_p6), %v5229_v42 }
 0x7b8   : > { %5232 = vmatpush3.bf16.msra.mxu0 (!%p4734_p6), %v5229_v42 }
 0x7dd   : > { %v5086_v35 = vpop.f32.mrb[48].mxu1 }
 0x7de   : > { %v4327_v52 = vpop.f32.mrb[49].mxu1 }
 0x886   : > { %v5075_v51 = vpop.f32.mrb[48].mxu0 }
 0x887   : > { %v4229_v17 = vadd.f32 %v5075_v51, %v4152_v23  ;;  %v4219_v32 = vpop.f32.mrb[49].mxu0 }
 0x888   : > { %v4228_v18 = vadd.f32 %v4219_v32, %v4151_v36 }
 0x889   : > { %4231 = vst.msk [vmem:[#allocation3 + $0x8] sm:$0xff] %vm627_vm1, %v4229_v17 }
 0x88a   : > { %4230 = vst.msk [vmem:[#allocation3] sm:$0xff] %vm627_vm1, %v4228_v18 }
 0x890   : > { %v4236_v31 = vld [vmem:[#allocation3 + $0x8] sm:$0xff] }
 0x891   : > { %v4235_v8 = vld [vmem:[#allocation3] sm:$0xff]  ;;  %v4250_v21 = vmul.f32 %v4247_v7, %v4236_v31 }
 0x892   : > { %v4249_v4 = vmul.f32 %v4242_v61, %v4235_v8 }
 0x893   : > { %v4337_v30 = vadd.f32 %v5086_v35, %v4250_v21 }
 0x894   : > { %v4336_v60 = vadd.f32 %v4327_v52, %v4249_v4  ;;  %4354 = sbr.rel (%p4734_p6) target bundleno = 2637 (0xa4d), region = 96 }
 0x895   : > { %v4346_v19 = vadd.f32 %v4733_v50, %v4337_v30 }
 0x896   : > { %v4345_v59 = vadd.f32 %v4733_v50, %v4336_v60 }
 0x897   : > { %v4348_v16 = vmax.f32 %v4346_v19, 0.0 }
 0x898   : > { %v4347_v46 = vmax.f32 %v4345_v59, 0.0 }
 0x899   : > { %4350 = vst.msk [vmem:[#allocation2 + $0x8] sm:$0xff] %vm627_vm1, %v4348_v16 }
 0x89a   : > { %4349 = vst.msk [vmem:[#allocation2] sm:$0xff] %vm627_vm1, %v4347_v46  ;;  %5095 = vmatprep.mubr.msk.f32.mxu0 (!%p4734_p6), %vm627_vm1, %v4347_v46 }
 0x89b   : > { %5096 = vmatmul.mubr.msk.f32.vlgmr.msra.gmra.mrb[0].mxu0 %vm627_vm1, %v4348_v16 }
 0x96e   : > { %v5097_v34 = vpop.f32.mrb[0].mxu0 }
 0x96f   : > { %v4444_v56 = vadd.f32 %v5097_v34, %v4735_v45  ;;  %v4438_v43 = vpop.f32.mrb[1].mxu0 }
 0x970   : > { %v4439_v37 = vadd.f32 %v4735_v45, %v4438_v43 }
 0x971   : > { %v4448_v57 = vmax.f32 %v4444_v56, 0.0 }
 0x972   : > { %v4447_v11 = vmax.f32 %v4439_v37, 0.0 }
 0x974   : > { %5106 = vmatprep.mubr.msk.f32.mxu1 %vm627_vm1, %v4447_v11 }
 0x975   : > { %5107 = vmatmul.mubr.msk.f32.vlgmr.msra.gmra.mrb[0].mxu1 %vm627_vm1, %v4448_v57 }
 0xa48   : > { %v5108_v13 = vpop.f32.mrb[0].mxu1 }
 0xa49   : > { %v4538_v10 = vadd.f32 %v5108_v13, %v4738_v25  ;;  %v4532_v54 = vpop.f32.mrb[1].mxu1 }
 0xa4a   : > { %v4533_v12 = vadd.f32 %v4738_v25, %v4532_v54 }
 0xa4b   : > { %4542 = vst [vmem:[%s7821_s14 + $0x8] sm:$0xff] %v4538_v10 }
 0xa4c   : > { %4541 = vst [vmem:[%s7821_s14] sm:$0xff] %v4533_v12 }
 0xa4d PF: > { %s7822_s15 = sld [smem:[#allocation6_spill]]  ;;  %s7823_s18 = sld [smem:[#allocation5_spill]] }
 0xa4e   : > { %s7824_s19 = sld [smem:[#allocation7_spill]] }
 0xa53   : > { %s25_s20 = sadd.s32 1, %s7822_s15  }
 0xa54   : > { %p22_p7 = scmp.ge.s32.totalorder %s25_s20, 4  }
 0xa56   :  { %24 = sbr.rel (!%p22_p7) target bundleno = 4 (0x4), region = 144 }

</bundles_post_ra>
